<compile_context>
chip_gen: v5e
topology: v5e:2x2
jax: 0.10.0
libtpu: 0.0.40
codegen_flags: <defaults>
</compile_context>

<pallas_src>
import functools

import jax
import jax.numpy as jnp
from jax.experimental import pallas as pl
from jax.experimental.pallas import tpu as pltpu

# ----------------------------- small config ---------------------------------
MAX_LEN = 16          # config.max_len
WORD_DIM = 16         # config.word_dim
POS_DIM = 4           # config.pos_dim
TAG_DIM = 8           # config.tag_dim
POS_DIS = 5           # config.pos_dis
POS_NUM = 10          # number of tag ids
FILTER_NUM = 32       # config.filter_num
WINDOW = 3            # config.window (conv kernel height)
CLASS_NUM = 8
VOCAB = 20
DIM = WORD_DIM + 2 * POS_DIM + TAG_DIM   # 32
LANE = 128
LP = 24               # padded sequence rows: [0, emb(16), zeros(7)]; LP % 8 == 0
C_PAD = LANE          # class dim padded to a full lane tile for dense stores


def _round_up(x, m):
    return -(-x // m) * m


# ------------------------------- kernel -------------------------------------
def attention_cnn_kernel(embp_ref, masks_ref, wmat_ref, wbot_ref,
                         dwp_ref, dwe_ref, vecs_ref, out_ref):
    Bt, LPk, D = embp_ref.shape
    L = MAX_LEN
    NEG = -1e30   # stands in for float('-inf'): tanh -> -1, softmax weight -> 0

    emb_pad = embp_ref[...]                  # [Bt, LP, D] f32, rows 0 & >=L+1 zero
    masks = masks_ref[...]                   # [Bt, 4, LP] f32
    vecs = vecs_ref[...]                     # [8, 128]   f32 packed small params

    conv_b = vecs[0:1]                       # [1, 128] (cols >= F are 0)
    we_b = vecs[1:2]                         # [1, 128] (cols >= 2D are 0)
    wa_vec = vecs[2:3]                       # [1, 128] (cols >= 2D are 0)
    dense_b = vecs[3:4]                      # [1, 128] (cols >= C are 0)
    wa_b = vecs[4:5, 0:1]                    # [1, 1]   (no output effect: softmax
                                             #           is shift invariant; kept
                                             #           for faithfulness)

    attn_mask = masks[:, 0, :]               # [Bt, LP]  1 = valid token row
    e1_mask = masks[:, 1, :]                 # [Bt, LP]
    e2_mask = masks[:, 2, :]                 # [Bt, LP]
    conv_mask = masks[:, 3, 0:L]             # [Bt, L]   1 = valid conv position

    # ---- one fused MXU pass: RHS = [W0 | W1 | W2 | W_top], 128 lanes each ----
    # LP % 8 == 0 makes this reshape a tile-aligned (free) view; cast after.
    embp_bf = emb_pad.reshape(Bt * LPk, D).astype(jnp.bfloat16)
    full = jnp.dot(embp_bf, wmat_ref[...],
                   preferred_element_type=jnp.float32)             # [Bt*LP, 512]
    full = full.reshape(Bt, LPk, 4 * LANE)                         # free split

    # ---- conv_layer: Conv2d(1, F, (3, D), pad=(1,0)) = 3 row-shifted slabs ---
    conv = (full[:, 0:L, 0:LANE]
            + full[:, 1:L + 1, LANE:2 * LANE]
            + full[:, 2:L + 2, 2 * LANE:3 * LANE]
            + conv_b)                                              # [Bt, L, 128]
    conv = jnp.tanh(jnp.where(conv_mask[:, :, None] > 0.5, conv, NEG))
    pool = jnp.max(conv, axis=1)             # [Bt, 128] (cols >= F hit 0-rows of dwp)

    # ---- entity_average (pad rows of emb_pad are zero; masks zero there too) -
    len1 = jnp.maximum(jnp.sum(e1_mask, axis=-1, keepdims=True), 1.0)   # [Bt, 1]
    len2 = jnp.maximum(jnp.sum(e2_mask, axis=-1, keepdims=True), 1.0)
    ent1 = jnp.sum(e1_mask[:, :, None] * emb_pad, axis=1) / len1        # [Bt, D]
    ent2 = jnp.sum(e2_mask[:, :, None] * emb_pad, axis=1) / len2
    ent = jnp.concatenate([ent1, ent2], axis=0)          # [2Bt, D] aligned concat

    # ---- attention_layer, both entities batched; MLP split algebraically ----
    # tanh(we([emb, ent])) == tanh(emb @ W_top + ent @ W_bot + b)
    emb_proj = full[:, :, 3 * LANE:4 * LANE]                         # [Bt, LP, 128]
    ent_proj = jnp.dot(ent.astype(jnp.bfloat16), wbot_ref[...],
                       preferred_element_type=jnp.float32)           # [2Bt, 128]
    ent_proj = ent_proj.reshape(2, Bt, LANE)                         # free split
    o = jnp.tanh(emb_proj[None, :, :, :] + ent_proj[:, :, None, :] + we_b)
    # wa is an N=1 linear layer: VPU multiply + lane reduce, not MXU.
    u = jnp.sum(o * wa_vec, axis=-1) + wa_b                          # [2, Bt, LP]
    score = jnp.where(attn_mask[None, :, :] > 0.5, u, NEG)
    # Fully-masked rows (batch padding) give a uniform softmax; harmless since
    # those rows are cropped by the wrapper.
    m = jnp.max(score, axis=-1, keepdims=True)
    e = jnp.exp(score - m)
    wgt = e / jnp.sum(e, axis=-1, keepdims=True)                     # softmax
    ctx = jnp.tanh(jnp.sum(emb_pad[None, :, :, :] * wgt[:, :, :, None], axis=2))
    # ctx: [2, Bt, D]  (e1 context, e2 context)

    # ---- final dense: split matmuls, no lane-axis feature concat -------------
    logits = jnp.dot(pool.astype(jnp.bfloat16), dwp_ref[...],
                     preferred_element_type=jnp.float32)             # [Bt, 128]
    res_e = jnp.dot(ctx.reshape(2 * Bt, D).astype(jnp.bfloat16), dwe_ref[...],
                    preferred_element_type=jnp.float32)              # [2Bt, 256]
    logits += res_e[0:Bt, 0:LANE] + res_e[Bt:2 * Bt, LANE:2 * LANE]
    out_ref[...] = logits + dense_b                                  # [Bt, C_PAD]


# ------------------------------ wrapper --------------------------------------
def _const_spec(shape):
    zeros = (0,) * len(shape)
    return pl.BlockSpec(shape, lambda i, _z=zeros: _z)


def prepare_kernel_params(p):
    """Convert torch-layout params into the kernel's packed bf16/f32 layout."""
    bf16 = jnp.bfloat16
    f32 = jnp.float32

    def pad_lanes(w, n=LANE):
        return jnp.pad(w, ((0, 0), (0, n - w.shape[1])))

    cw = p["conv_w"].astype(f32)                                  # [F, 1, 3, D]
    w0 = pad_lanes(cw[:, 0, 0, :].T)                              # [D, 128]
    w1 = pad_lanes(cw[:, 0, 1, :].T)
    w2 = pad_lanes(cw[:, 0, 2, :].T)
    # nn.Linear stores [out, in]; kernel uses x @ W^T.  Split we into halves.
    we_t = p["we_w"].T                                            # [2D, 2D]
    w_top = pad_lanes(we_t[:DIM, :])                              # emb half   [D,128]
    w_bot = pad_lanes(we_t[DIM:, :])                              # entity half[D,128]
    # Fused RHS for the single big matmul: [W0 | W1 | W2 | W_top] -> [D, 512].
    wmat = jnp.concatenate([w0, w1, w2, w_top], axis=1).astype(bf16)

    # Dense split row-wise (pool | e1_ctx | e2_ctx); class dim padded to 128.
    dw_t = p["dense_w"].T                                         # [F+2D, C]
    dw_pool = jnp.pad(pad_lanes(dw_t[:FILTER_NUM], C_PAD),
                      ((0, LANE - FILTER_NUM), (0, 0))).astype(bf16)   # [128, 128]
    dw_e1 = pad_lanes(dw_t[FILTER_NUM:FILTER_NUM + DIM], C_PAD)        # [D, 128]
    dw_e2 = pad_lanes(dw_t[FILTER_NUM + DIM:], C_PAD)                  # [D, 128]
    dw_ent = jnp.concatenate([dw_e1, dw_e2], axis=1).astype(bf16)      # [D, 256]

    # All the tiny f32 vectors packed into one (8, 128) buffer.
    vecs = jnp.zeros((8, LANE), f32)
    vecs = vecs.at[0, :FILTER_NUM].set(p["conv_b"].astype(f32))
    vecs = vecs.at[1, :2 * DIM].set(p["we_b"].astype(f32))
    vecs = vecs.at[2, :2 * DIM].set(p["wa_w"][0].astype(f32))
    vecs = vecs.at[3, :CLASS_NUM].set(p["dense_b"].astype(f32))
    vecs = vecs.at[4, 0].set(p["wa_b"][0].astype(f32))

    return dict(wmat=wmat, wbot=w_bot.astype(bf16),
                dw_pool=dw_pool, dw_ent=dw_ent, vecs=vecs)


def _attention_cnn_forward(data, params, *, block_b=128):
    """data: int32 [B, 7, MAX_LEN] — (token, pos1, pos2, mask, tags, e1, e2)."""
    B = data.shape[0]
    L = MAX_LEN

    token, pos1, pos2, mask, tags, e1m, e2m = (data[:, i, :] for i in range(7))

    # encoder_layer — embedding gathers are plain-JAX glue (XLA gather) fused
    # into the same jit as the pallas_call.
    emb = jnp.concatenate(
        [params["word_vec"][token], params["pos1_emb"][pos1],
         params["pos2_emb"][pos2], params["tag_emb"][tags]],
        axis=-1).astype(jnp.float32)                                  # [B, L, DIM]

    # Sequence padded to LP = 24 rows: row 0 = conv top pad, rows 1..L = emb,
    # rows L+1..23 = conv bottom pad + sublane-tile alignment (LP % 8 == 0).
    emb_pad = jnp.pad(emb, ((0, 0), (1, LP - 1 - L), (0, 0)))         # [B, LP, DIM]

    mask_f = mask.astype(jnp.float32)
    lp_pad = ((0, 0), (1, LP - 1 - L))
    masks = jnp.stack(
        [jnp.pad(mask_f, lp_pad),                        # row 0: attention mask (LP)
         jnp.pad(e1m.astype(jnp.float32), lp_pad),       # row 1: e1 mask (LP)
         jnp.pad(e2m.astype(jnp.float32), lp_pad),       # row 2: e2 mask (LP)
         jnp.pad(mask_f, ((0, 0), (0, LP - L)))],        # row 3: conv mask (L-domain)
        axis=1)                                          # [B, 4, LP]

    # Effective batch tile: multiple of 8, capped at block_b, sized so the grid
    # has >= 2 steps whenever possible (keeps both v7x TensorCores busy).
    bb = min(int(block_b), max(8, _round_up(B, 16) // 2))
    bb = max(8, (bb // 8) * 8)
    Bp = _round_up(B, bb)
    if Bp != B:
        padn = Bp - B                       # padded rows are cropped from output
        emb_pad = jnp.pad(emb_pad, ((0, padn), (0, 0), (0, 0)))
        masks = jnp.pad(masks, ((0, padn), (0, 0), (0, 0)))

    kp = prepare_kernel_params(params)

    in_specs = [
        pl.BlockSpec((bb, LP, DIM), lambda i: (i, 0, 0)),   # emb_pad  (batch-major)
        pl.BlockSpec((bb, 4, LP), lambda i: (i, 0, 0)),     # packed masks
        _const_spec((DIM, 4 * LANE)),                       # fused conv/attn RHS
        _const_spec((DIM, LANE)),                           # w_bot
        _const_spec((LANE, C_PAD)),                         # dense pool part
        _const_spec((DIM, 2 * LANE)),                       # dense e1|e2 part
        _const_spec((8, LANE)),                             # packed small vectors
    ]
    out_spec = pl.BlockSpec((bb, C_PAD), lambda i: (i, 0))

    logits_pad = pl.pallas_call(
        attention_cnn_kernel,
        out_shape=jax.ShapeDtypeStruct((Bp, C_PAD), jnp.float32),
        grid=(Bp // bb,),
        in_specs=in_specs,
        out_specs=out_spec,
        compiler_params=pltpu.CompilerParams(
            dimension_semantics=("parallel",),
            vmem_limit_bytes=48 * 1024 * 1024),
    )(emb_pad, masks, kp["wmat"], kp["wbot"],
      kp["dw_pool"], kp["dw_ent"], kp["vecs"])

    return logits_pad[:B, :CLASS_NUM]


attention_cnn_forward = jax.jit(_attention_cnn_forward,
                                static_argnames=("block_b",))


# --------------------------- deterministic init -------------------------------
def init_params(key):
    """Torch-layout parameters, matching the module's init scheme."""
    ks = jax.random.split(key, 8)
    u = lambda k, shape: jax.random.uniform(k, shape, jnp.float32, -0.1, 0.1)

    return dict(
        word_vec=jax.random.normal(ks[0], (VOCAB, WORD_DIM), jnp.float32) * 0.1,
        pos1_emb=u(ks[1], (2 * POS_DIS + 3, POS_DIM)),
        pos2_emb=u(ks[2], (2 * POS_DIS + 3, POS_DIM)),
        tag_emb=u(ks[3], (POS_NUM, TAG_DIM)),
        conv_w=u(ks[4], (FILTER_NUM, 1, WINDOW, DIM)),
        conv_b=jnp.zeros((FILTER_NUM,), jnp.float32),
        we_w=u(ks[5], (2 * DIM, 2 * DIM)),            # [out, in]
        we_b=jnp.zeros((2 * DIM,), jnp.float32),
        wa_w=u(ks[6], (1, 2 * DIM)),
        wa_b=jnp.zeros((1,), jnp.float32),
        dense_w=u(ks[7], (CLASS_NUM, FILTER_NUM + 2 * DIM)),
        dense_b=jnp.zeros((CLASS_NUM,), jnp.float32),
    )


# --------------------------------- main ---------------------------------------
if __name__ == "__main__":
    B = 16
    key = jax.random.PRNGKey(0)
    k_param, k_data = jax.random.split(key)
    params = init_params(k_param)

    kt, k1, k2, k3, kl = jax.random.split(k_data, 5)
    token = jax.random.randint(kt, (B, MAX_LEN), 0, VOCAB)
    pos1 = jax.random.randint(k1, (B, MAX_LEN), 0, 2 * POS_DIS + 3)
    pos2 = jax.random.randint(k2, (B, MAX_LEN), 0, 2 * POS_DIS + 3)
    tags = jax.random.randint(k3, (B, MAX_LEN), 0, POS_NUM)

    pos_ids = jnp.arange(MAX_LEN)[None, :]
    sent_len = jax.random.randint(kl, (B, 1), 8, MAX_LEN + 1)
    mask = (pos_ids < sent_len).astype(jnp.int32)                      # valid tokens
    ones_b = jnp.ones((B, 1), jnp.int32)
    e1_mask = ((pos_ids >= 2) & (pos_ids <= 3)).astype(jnp.int32) * ones_b
    e2_mask = ((pos_ids >= 5) & (pos_ids <= 7)).astype(jnp.int32) * ones_b

    data = jnp.stack([token, pos1, pos2, mask, tags, e1_mask, e2_mask],
                     axis=1).astype(jnp.int32)                         # [B, 7, L]

    logits = attention_cnn_forward(data, params)
    jax.block_until_ready(logits)
    assert logits.shape == (B, CLASS_NUM)
    assert bool(jnp.all(jnp.isfinite(logits)))
    print("KERNEL_OK")
</pallas_src>

<mosaic_0001>
module attributes {stable_mosaic.version = 11 : i64} {
  func.func @attention_cnn_kernel(%arg0: i32, %arg1: memref<8x24x32xf32, #tpu.memory_space<vmem>>, %arg2: memref<8x4x24xf32, #tpu.memory_space<vmem>>, %arg3: memref<32x512xbf16, #tpu.memory_space<vmem>>, %arg4: memref<32x128xbf16, #tpu.memory_space<vmem>>, %arg5: memref<128x128xbf16, #tpu.memory_space<vmem>>, %arg6: memref<32x256xbf16, #tpu.memory_space<vmem>>, %arg7: memref<8x128xf32, #tpu.memory_space<vmem>>, %arg8: memref<8x128xf32, #tpu.memory_space<vmem>>) attributes {dimension_semantics = [#tpu.dimension_semantics<parallel>], iteration_bounds = array<i64: 2>, scalar_prefetch = 0 : i64, scratch_operands = 0 : i64, tpu.core_type = #tpu.core_type<tc>, window_params = [{transform_indices = @transform_0, window_bounds = array<i64: 8, 24, 32>}, {transform_indices = @transform_1, window_bounds = array<i64: 8, 4, 24>}, {pipeline_mode = #tpu.pipeline_mode<synchronous>, transform_indices = @transform_2, window_bounds = array<i64: 32, 512>}, {pipeline_mode = #tpu.pipeline_mode<synchronous>, transform_indices = @transform_3, window_bounds = array<i64: 32, 128>}, {pipeline_mode = #tpu.pipeline_mode<synchronous>, transform_indices = @transform_4, window_bounds = array<i64: 128, 128>}, {pipeline_mode = #tpu.pipeline_mode<synchronous>, transform_indices = @transform_5, window_bounds = array<i64: 32, 256>}, {pipeline_mode = #tpu.pipeline_mode<synchronous>, transform_indices = @transform_6, window_bounds = array<i64: 8, 128>}, {transform_indices = @transform_7, window_bounds = array<i64: 8, 128>}]} {
    %c0 = arith.constant 0 : index
    %c0_0 = arith.constant 0 : index
    %c0_1 = arith.constant 0 : index
    %0 = vector.load %arg1[%c0, %c0_0, %c0_1] : memref<8x24x32xf32, #tpu.memory_space<vmem>>, vector<8x24x32xf32>
    %c0_2 = arith.constant 0 : index
    %c0_3 = arith.constant 0 : index
    %c0_4 = arith.constant 0 : index
    %1 = vector.load %arg2[%c0_2, %c0_3, %c0_4] : memref<8x4x24xf32, #tpu.memory_space<vmem>>, vector<8x4x24xf32>
    %c0_5 = arith.constant 0 : index
    %c0_6 = arith.constant 0 : index
    %2 = vector.load %arg7[%c0_5, %c0_6] : memref<8x128xf32, #tpu.memory_space<vmem>>, vector<8x128xf32>
    %3 = vector.extract_strided_slice %2 {offsets = [0, 0], sizes = [1, 128], strides = [1, 1]} : vector<8x128xf32> to vector<1x128xf32>
    %4 = vector.extract_strided_slice %2 {offsets = [1, 0], sizes = [1, 128], strides = [1, 1]} : vector<8x128xf32> to vector<1x128xf32>
    %5 = vector.extract_strided_slice %2 {offsets = [2, 0], sizes = [1, 128], strides = [1, 1]} : vector<8x128xf32> to vector<1x128xf32>
    %6 = vector.extract_strided_slice %2 {offsets = [3, 0], sizes = [1, 128], strides = [1, 1]} : vector<8x128xf32> to vector<1x128xf32>
    %7 = vector.extract_strided_slice %2 {offsets = [4, 0], sizes = [1, 1], strides = [1, 1]} : vector<8x128xf32> to vector<1x1xf32>
    %8 = vector.extract_strided_slice %1 {offsets = [0, 0, 0], sizes = [8, 1, 24], strides = [1, 1, 1]} : vector<8x4x24xf32> to vector<8x1x24xf32>
    %9 = vector.shape_cast %8 : vector<8x1x24xf32> to vector<8x24xf32>
    %10 = vector.extract_strided_slice %1 {offsets = [0, 1, 0], sizes = [8, 1, 24], strides = [1, 1, 1]} : vector<8x4x24xf32> to vector<8x1x24xf32>
    %11 = vector.shape_cast %10 : vector<8x1x24xf32> to vector<8x24xf32>
    %12 = vector.extract_strided_slice %1 {offsets = [0, 2, 0], sizes = [8, 1, 24], strides = [1, 1, 1]} : vector<8x4x24xf32> to vector<8x1x24xf32>
    %13 = vector.shape_cast %12 : vector<8x1x24xf32> to vector<8x24xf32>
    %14 = vector.extract_strided_slice %1 {offsets = [0, 3, 0], sizes = [8, 1, 16], strides = [1, 1, 1]} : vector<8x4x24xf32> to vector<8x1x16xf32>
    %15 = vector.shape_cast %14 : vector<8x1x16xf32> to vector<8x16xf32>
    %16 = vector.shape_cast %0 : vector<8x24x32xf32> to vector<192x32xf32>
    %17 = arith.truncf %16 : vector<192x32xf32> to vector<192x32xbf16>
    %c0_7 = arith.constant 0 : index
    %c0_8 = arith.constant 0 : index
    %18 = vector.load %arg3[%c0_7, %c0_8] : memref<32x512xbf16, #tpu.memory_space<vmem>>, vector<32x512xbf16>
    %cst = arith.constant dense<0.000000e+00> : vector<192x512xf32>
    %19 = tpu.matmul %17, %18, %cst {dimension_numbers = #tpu.dot_dimension_numbers<[1], [0], [0], [1], [0, 0, 1, 1], [], []>} : vector<192x32xbf16>, vector<32x512xbf16>, vector<192x512xf32> -> vector<192x512xf32>
    %20 = vector.shape_cast %19 : vector<192x512xf32> to vector<8x24x512xf32>
    %21 = vector.extract_strided_slice %20 {offsets = [0, 0, 0], sizes = [8, 16, 128], strides = [1, 1, 1]} : vector<8x24x512xf32> to vector<8x16x128xf32>
    %22 = vector.extract_strided_slice %20 {offsets = [0, 1, 128], sizes = [8, 16, 128], strides = [1, 1, 1]} : vector<8x24x512xf32> to vector<8x16x128xf32>
    %23 = arith.addf %21, %22 : vector<8x16x128xf32>
    %24 = vector.extract_strided_slice %20 {offsets = [0, 2, 256], sizes = [8, 16, 128], strides = [1, 1, 1]} : vector<8x24x512xf32> to vector<8x16x128xf32>
    %25 = arith.addf %23, %24 : vector<8x16x128xf32>
    %26 = vector.shape_cast %3 : vector<1x128xf32> to vector<1x1x128xf32>
    %27 = vector.broadcast %26 : vector<1x1x128xf32> to vector<8x16x128xf32>
    %28 = arith.addf %25, %27 : vector<8x16x128xf32>
    %29 = vector.shape_cast %15 : vector<8x16xf32> to vector<8x16x1xf32>
    %cst_9 = arith.constant 5.000000e-01 : f32
    %30 = vector.broadcast %cst_9 : f32 to vector<8x16x1xf32>
    %31 = arith.cmpf ogt, %29, %30 : vector<8x16x1xf32>
    %cst_10 = arith.constant -1.000000e+30 : f32
    %32 = vector.shape_cast %31 : vector<8x16x1xi1> to vector<8x16x1xi1>
    %33 = vector.broadcast %32 : vector<8x16x1xi1> to vector<8x16x128xi1>
    %34 = vector.broadcast %cst_10 : f32 to vector<8x16x128xf32>
    %35 = arith.select %33, %28, %34 : vector<8x16x128xi1>, vector<8x16x128xf32>
    %36 = math.tanh %35 : vector<8x16x128xf32>
    %cst_11 = arith.constant dense<0xFF800000> : vector<8x128xf32>
    %37 = vector.multi_reduction <maximumf>, %36, %cst_11 [1] : vector<8x16x128xf32> to vector<8x128xf32>
    %cst_12 = arith.constant dense<0.000000e+00> : vector<8xf32>
    %38 = vector.multi_reduction <add>, %11, %cst_12 [1] : vector<8x24xf32> to vector<8xf32>
    %39 = vector.shape_cast %38 : vector<8xf32> to vector<8x1xf32>
    %cst_13 = arith.constant 1.000000e+00 : f32
    %40 = vector.broadcast %cst_13 : f32 to vector<8x1xf32>
    %41 = arith.maximumf %39, %40 : vector<8x1xf32>
    %cst_14 = arith.constant dense<0.000000e+00> : vector<8xf32>
    %42 = vector.multi_reduction <add>, %13, %cst_14 [1] : vector<8x24xf32> to vector<8xf32>
    %43 = vector.shape_cast %42 : vector<8xf32> to vector<8x1xf32>
    %cst_15 = arith.constant 1.000000e+00 : f32
    %44 = vector.broadcast %cst_15 : f32 to vector<8x1xf32>
    %45 = arith.maximumf %43, %44 : vector<8x1xf32>
    %46 = vector.shape_cast %11 : vector<8x24xf32> to vector<8x24x1xf32>
    %47 = vector.broadcast %46 : vector<8x24x1xf32> to vector<8x24x32xf32>
    %48 = arith.mulf %47, %0 : vector<8x24x32xf32>
    %cst_16 = arith.constant dense<0.000000e+00> : vector<8x32xf32>
    %49 = vector.multi_reduction <add>, %48, %cst_16 [1] : vector<8x24x32xf32> to vector<8x32xf32>
    %50 = vector.broadcast %41 : vector<8x1xf32> to vector<8x32xf32>
    %51 = arith.divf %49, %50 : vector<8x32xf32>
    %52 = vector.shape_cast %13 : vector<8x24xf32> to vector<8x24x1xf32>
    %53 = vector.broadcast %52 : vector<8x24x1xf32> to vector<8x24x32xf32>
    %54 = arith.mulf %53, %0 : vector<8x24x32xf32>
    %cst_17 = arith.constant dense<0.000000e+00> : vector<8x32xf32>
    %55 = vector.multi_reduction <add>, %54, %cst_17 [1] : vector<8x24x32xf32> to vector<8x32xf32>
    %56 = vector.broadcast %45 : vector<8x1xf32> to vector<8x32xf32>
    %57 = arith.divf %55, %56 : vector<8x32xf32>
    %58 = tpu.concatenate %51, %57 in 0 : vector<8x32xf32>, vector<8x32xf32> -> vector<16x32xf32>
    %59 = vector.extract_strided_slice %20 {offsets = [0, 0, 384], sizes = [8, 24, 128], strides = [1, 1, 1]} : vector<8x24x512xf32> to vector<8x24x128xf32>
    %60 = arith.truncf %58 : vector<16x32xf32> to vector<16x32xbf16>
    %c0_18 = arith.constant 0 : index
    %c0_19 = arith.constant 0 : index
    %61 = vector.load %arg4[%c0_18, %c0_19] : memref<32x128xbf16, #tpu.memory_space<vmem>>, vector<32x128xbf16>
    %cst_20 = arith.constant dense<0.000000e+00> : vector<16x128xf32>
    %62 = tpu.matmul %60, %61, %cst_20 {dimension_numbers = #tpu.dot_dimension_numbers<[1], [0], [0], [1], [0, 0, 1, 1], [], []>} : vector<16x32xbf16>, vector<32x128xbf16>, vector<16x128xf32> -> vector<16x128xf32>
    %63 = vector.shape_cast %62 : vector<16x128xf32> to vector<2x8x128xf32>
    %64 = vector.shape_cast %59 : vector<8x24x128xf32> to vector<1x8x24x128xf32>
    %65 = vector.shape_cast %63 : vector<2x8x128xf32> to vector<2x8x1x128xf32>
    %66 = vector.broadcast %64 : vector<1x8x24x128xf32> to vector<2x8x24x128xf32>
    %67 = vector.broadcast %65 : vector<2x8x1x128xf32> to vector<2x8x24x128xf32>
    %68 = arith.addf %66, %67 : vector<2x8x24x128xf32>
    %69 = vector.shape_cast %4 : vector<1x128xf32> to vector<1x1x1x128xf32>
    %70 = vector.broadcast %69 : vector<1x1x1x128xf32> to vector<2x8x24x128xf32>
    %71 = arith.addf %68, %70 : vector<2x8x24x128xf32>
    %72 = math.tanh %71 : vector<2x8x24x128xf32>
    %73 = vector.shape_cast %5 : vector<1x128xf32> to vector<1x1x1x128xf32>
    %74 = vector.broadcast %73 : vector<1x1x1x128xf32> to vector<2x8x24x128xf32>
    %75 = arith.mulf %72, %74 : vector<2x8x24x128xf32>
    %cst_21 = arith.constant dense<0.000000e+00> : vector<2x8x24xf32>
    %76 = vector.multi_reduction <add>, %75, %cst_21 [3] : vector<2x8x24x128xf32> to vector<2x8x24xf32>
    %77 = vector.shape_cast %7 : vector<1x1xf32> to vector<1x1x1xf32>
    %78 = vector.broadcast %77 : vector<1x1x1xf32> to vector<2x8x24xf32>
    %79 = arith.addf %76, %78 : vector<2x8x24xf32>
    %80 = vector.shape_cast %9 : vector<8x24xf32> to vector<1x8x24xf32>
    %cst_22 = arith.constant 5.000000e-01 : f32
    %81 = vector.broadcast %cst_22 : f32 to vector<1x8x24xf32>
    %82 = arith.cmpf ogt, %80, %81 : vector<1x8x24xf32>
    %cst_23 = arith.constant -1.000000e+30 : f32
    %83 = vector.shape_cast %82 : vector<1x8x24xi1> to vector<1x8x24xi1>
    %84 = vector.broadcast %83 : vector<1x8x24xi1> to vector<2x8x24xi1>
    %85 = vector.broadcast %cst_23 : f32 to vector<2x8x24xf32>
    %86 = arith.select %84, %79, %85 : vector<2x8x24xi1>, vector<2x8x24xf32>
    %cst_24 = arith.constant dense<0xFF800000> : vector<2x8xf32>
    %87 = vector.multi_reduction <maximumf>, %86, %cst_24 [2] : vector<2x8x24xf32> to vector<2x8xf32>
    %88 = vector.shape_cast %87 : vector<2x8xf32> to vector<2x8x1xf32>
    %89 = vector.broadcast %88 : vector<2x8x1xf32> to vector<2x8x24xf32>
    %90 = arith.subf %86, %89 : vector<2x8x24xf32>
    %91 = math.exp %90 : vector<2x8x24xf32>
    %cst_25 = arith.constant dense<0.000000e+00> : vector<2x8xf32>
    %92 = vector.multi_reduction <add>, %91, %cst_25 [2] : vector<2x8x24xf32> to vector<2x8xf32>
    %93 = vector.shape_cast %92 : vector<2x8xf32> to vector<2x8x1xf32>
    %94 = vector.broadcast %93 : vector<2x8x1xf32> to vector<2x8x24xf32>
    %95 = arith.divf %91, %94 : vector<2x8x24xf32>
    %96 = vector.shape_cast %0 : vector<8x24x32xf32> to vector<1x8x24x32xf32>
    %97 = vector.shape_cast %95 : vector<2x8x24xf32> to vector<2x8x24x1xf32>
    %98 = vector.broadcast %96 : vector<1x8x24x32xf32> to vector<2x8x24x32xf32>
    %99 = vector.broadcast %97 : vector<2x8x24x1xf32> to vector<2x8x24x32xf32>
    %100 = arith.mulf %98, %99 : vector<2x8x24x32xf32>
    %cst_26 = arith.constant dense<0.000000e+00> : vector<2x8x32xf32>
    %101 = vector.multi_reduction <add>, %100, %cst_26 [2] : vector<2x8x24x32xf32> to vector<2x8x32xf32>
    %102 = math.tanh %101 : vector<2x8x32xf32>
    %103 = arith.truncf %37 : vector<8x128xf32> to vector<8x128xbf16>
    %c0_27 = arith.constant 0 : index
    %c0_28 = arith.constant 0 : index
    %104 = vector.load %arg5[%c0_27, %c0_28] : memref<128x128xbf16, #tpu.memory_space<vmem>>, vector<128x128xbf16>
    %cst_29 = arith.constant dense<0.000000e+00> : vector<8x128xf32>
    %105 = tpu.matmul %103, %104, %cst_29 {dimension_numbers = #tpu.dot_dimension_numbers<[1], [0], [0], [1], [0, 0, 1, 1], [], []>} : vector<8x128xbf16>, vector<128x128xbf16>, vector<8x128xf32> -> vector<8x128xf32>
    %106 = vector.shape_cast %102 : vector<2x8x32xf32> to vector<16x32xf32>
    %107 = arith.truncf %106 : vector<16x32xf32> to vector<16x32xbf16>
    %c0_30 = arith.constant 0 : index
    %c0_31 = arith.constant 0 : index
    %108 = vector.load %arg6[%c0_30, %c0_31] : memref<32x256xbf16, #tpu.memory_space<vmem>>, vector<32x256xbf16>
    %cst_32 = arith.constant dense<0.000000e+00> : vector<16x256xf32>
    %109 = tpu.matmul %107, %108, %cst_32 {dimension_numbers = #tpu.dot_dimension_numbers<[1], [0], [0], [1], [0, 0, 1, 1], [], []>} : vector<16x32xbf16>, vector<32x256xbf16>, vector<16x256xf32> -> vector<16x256xf32>
    %110 = vector.extract_strided_slice %109 {offsets = [0, 0], sizes = [8, 128], strides = [1, 1]} : vector<16x256xf32> to vector<8x128xf32>
    %111 = vector.extract_strided_slice %109 {offsets = [8, 128], sizes = [8, 128], strides = [1, 1]} : vector<16x256xf32> to vector<8x128xf32>
    %112 = arith.addf %110, %111 : vector<8x128xf32>
    %113 = arith.addf %105, %112 : vector<8x128xf32>
    %114 = vector.broadcast %6 : vector<1x128xf32> to vector<8x128xf32>
    %115 = arith.addf %113, %114 : vector<8x128xf32>
    %c0_33 = arith.constant 0 : index
    %c0_34 = arith.constant 0 : index
    %116 = vector.load %arg8[%c0_33, %c0_34] : memref<8x128xf32, #tpu.memory_space<vmem>>, vector<8x128xf32>
    tpu.vector_store %arg8[%c0_33, %c0_34], %115 {strides = array<i32>} : memref<8x128xf32, #tpu.memory_space<vmem>>, vector<8x128xf32>,
    return
  }
  func.func @transform_0(%arg0: i32) -> (i32, i32, i32) {
    %c0_i32 = arith.constant 0 : i32
    %c0_i32_0 = arith.constant 0 : i32
    %c0_i32_1 = arith.constant 0 : i32
    return %arg0, %c0_i32, %c0_i32_0 : i32, i32, i32
  }
  func.func @transform_1(%arg0: i32) -> (i32, i32, i32) {
    %c0_i32 = arith.constant 0 : i32
    %c0_i32_0 = arith.constant 0 : i32
    %c0_i32_1 = arith.constant 0 : i32
    return %arg0, %c0_i32, %c0_i32_0 : i32, i32, i32
  }
  func.func @transform_2(%arg0: i32) -> (i32, i32) {
    %c0_i32 = arith.constant 0 : i32
    %c0_i32_0 = arith.constant 0 : i32
    %c0_i32_1 = arith.constant 0 : i32
    return %c0_i32, %c0_i32_0 : i32, i32
  }
  func.func @transform_3(%arg0: i32) -> (i32, i32) {
    %c0_i32 = arith.constant 0 : i32
    %c0_i32_0 = arith.constant 0 : i32
    %c0_i32_1 = arith.constant 0 : i32
    return %c0_i32, %c0_i32_0 : i32, i32
  }
  func.func @transform_4(%arg0: i32) -> (i32, i32) {
    %c0_i32 = arith.constant 0 : i32
    %c0_i32_0 = arith.constant 0 : i32
    %c0_i32_1 = arith.constant 0 : i32
    return %c0_i32, %c0_i32_0 : i32, i32
  }
  func.func @transform_5(%arg0: i32) -> (i32, i32) {
    %c0_i32 = arith.constant 0 : i32
    %c0_i32_0 = arith.constant 0 : i32
    %c0_i32_1 = arith.constant 0 : i32
    return %c0_i32, %c0_i32_0 : i32, i32
  }
  func.func @transform_6(%arg0: i32) -> (i32, i32) {
    %c0_i32 = arith.constant 0 : i32
    %c0_i32_0 = arith.constant 0 : i32
    %c0_i32_1 = arith.constant 0 : i32
    return %c0_i32, %c0_i32_0 : i32, i32
  }
  func.func @transform_7(%arg0: i32) -> (i32, i32) {
    %c0_i32 = arith.constant 0 : i32
    %c0_i32_0 = arith.constant 0 : i32
    return %arg0, %c0_i32 : i32, i32
  }
}

</mosaic_0001>

<bundles_post_ra>
// kernel: _attention_cnn_forward.1
= control target key start
LH: loop header
LB: loop body
LE: loop exit
PB: predicated region body
PF: predicated region fallthrough
CT: control target
= control target key end

     0   :  { %s4562_s24 = smov 0   ;;  %s6954_s0 = inlined_call_operand.vmem [shape: f32[16,24,32], index: 0, kind: input, shape index: {}]   ;;  %s6955_s1 = inlined_call_operand.vmem [shape: f32[16,4,24], index: 1, kind: input, shape index: {}]   ;;  %s6956_s2 = inlined_call_operand.vmem [shape: bf16[32,512], index: 2, kind: input, shape index: {}]   ;;  %s6957_s3 = inlined_call_operand.vmem [shape: bf16[32,128], index: 3, kind: input, shape index: {}]   ;;  %s6958_s4 = inlined_call_operand.vmem [shape: bf16[128,128], index: 4, kind: input, shape index: {}]   ;;  %s6959_s5 = inlined_call_operand.vmem [shape: bf16[32,256], index: 5, kind: input, shape index: {}]   ;;  %s6960_s6 = inlined_call_operand.vmem [shape: f32[8,128], index: 6, kind: input, shape index: {}]   ;;  %s6961_s7 = inlined_call_operand.vmem [shape: f32[16,128], index: 7, kind: output, shape index: {}]  }
   0x1 LB: > { %s4568_s25 = sadd.s32 4294967295, %s4520_s24   ;;  %p3975_p0 = scmp.ge.s32.totalorder %s4520_s24, 1  ;;  %s4520_s24 = sphi %s4562_s24, %s17_s24  }
   0x2   : > { %p250_p1 = scmp.lt.s32.totalorder %s4520_s24, 3 }
   0x4   : > { %p251_p2 = pnand %p3975_p0, %p250_p1 }
   0x6   : > { %254 = sbr.rel (%p251_p2) target bundleno = 1632 (0x660), region = 48 }
   0xb   : > { %v6962_v0 = vlaneseq  ;;  %v4007_v1 = vld [vmem:[%s6956_s2 + $0x28] sm:$0xf]  ;;  %v4129_v2 = vld [vmem:[%s6956_s2 + $0x34] sm:$0xf0]  ;;  %v4126_v3 = vld [vmem:[%s6956_s2 + $0x24] sm:$0xf] }
   0xc   : > { %v4008_v4 = vor.u32 %v4129_v2, %v4007_v1  ;;  %v4001_v5 = vld [vmem:[%s6956_s2 + $0x30] sm:$0xf0]  ;;  %v3991_v6 = vld [vmem:[%s6956_s2 + $0x8] sm:$0xf]  ;;  %v4125_v7 = vld [vmem:[%s6956_s2 + $0x14] sm:$0xf0] }
   0xd   : > { %v4591_v8 = vshrl.u32 %v6962_v0, 7  ;;  %v4004_v9 = vor.u32 %v4126_v3, %v4001_v5  ;;  %s3976_s15 = sshll.u32 %s4568_s25, 3  ;;  %v4122_v10 = vld [vmem:[%s6956_s2 + $0x4] sm:$0xf]  ;;  %v3992_v11 = vor.u32 %v4125_v7, %v3991_v6  ;;  %v3985_v12 = vld [vmem:[%s6956_s2 + $0x10] sm:$0xf0] }
   0xe   : > { %571 = vmatpush.bf16.msra.mxu2 %v4008_v4  ;;  %p288_p3 = scmp.lt.s32.totalorder %s3976_s15, 15  ;;  %v3999_v13 = vld [vmem:[%s6956_s2 + $0x20] sm:$0xf]  ;;  %v3988_v15 = vor.u32 %v4122_v10, %v3985_v12  ;;  %v4128_v16 = vld [vmem:[%s6956_s2 + $0x2c] sm:$0xf0]  ;;  %vm398_vm0 = vcmask 261120  }
   0xf   : > { %4155 = vset.pattern.permute.xlu2 %v4591_v8  ;;  %v4605_v14 = vadd.s32 8, %v4591_v8  ;;  %502 = vmatpush.bf16.msra.mxu1 %v4004_v9  ;;  %v3983_v17 = vld [vmem:[%s6956_s2] sm:$0xf]  ;;  %v4000_v18 = vor.u32 %v4128_v16, %v3999_v13  ;;  %v4124_v19 = vld [vmem:[%s6956_s2 + $0xc] sm:$0xf0]  ;;  %vm6973_vm1 = vcmask 1043459  }
  0x10   : > { %s7077_s15 = smov (!%p288_p3, %s3976_s15), 15  ;;  %4158 = vset.pattern.permute.xlu0 %v4591_v8  ;;  %v3984_v20 = vor.u32 %v4124_v19, %v3983_v17  ;;  %vm1169_vm2 = vcmask 1044484   ;;  %vm6972_vm3 = vcmask 1045509   ;;  %vm6971_vm4 = vcmask 1046534   ;;  %p300_p4 = scmp.lt.s32.totalorder %s4568_s25, 1 }
  0x11   : > { %4156 = vset.pattern.permute.xlu1 %v4605_v14  ;;  %s4144_s30 = smul.u32 24, %s7077_s15  ;;  %s3979_s8 = sshll.u32 %s7077_s15, 2  ;;  %441 = vmatpush.bf16.msra.mxu0 %v4000_v18  ;;  %vm6970_vm5 = vcmask 1047559   ;;  %vm1202_vm6 = vcmask 195586   ;;  %vm1163_vm7 = vcmask 1042434   ;;  %vm1187_vm8 = vcmask 188416  }
  0x12   : > { %572 = vmatpush.bf16.msra.mxu2 %v3992_v11  ;;  %s4621_s11 = scalar_lea.vmem %s6955_s1, %s3979_s8  ;;  %vm1183_vm9 = vcmask 195585   ;;  %vm1198_vm10 = vcmask 1041409   ;;  %vm1206_vm11 = vcmask 189440   ;;  %vm727_vm12 = vcmask 1046528   ;;  %s7079_s25 = smov (!%p300_p4, %s4568_s25), 1 }
  0x13   : > { %503 = vmatpush.bf16.msra.mxu1 %v3988_v15  ;;  %s4626_s14 = scalar_lea.vmem %s6954_s0, %s4144_s30  ;;  %v4629_v21 = vld [vmem:[%s4621_s11 + $0x8] sm:$0xf]  ;;  %v4632_v22 = vld [vmem:[%s4621_s11 + $0x4] sm:$0xf]  ;;  %v4635_v23 = vld [vmem:[%s4621_s11 + $0x14] sm:$0xf] }
  0x14   : > { %v4638_v24 = vld [vmem:[%s4626_s14] sm:$0xff]  ;;  %v4641_v25 = vld [vmem:[%s4626_s14 + $0x8] sm:$0xff]  ;;  %v940_v26 = vperm.slane %v4629_v21, 3  ;;  %v927_v27 = vperm.slane %v4632_v22, 3  ;;  %v1162_v28 = vrot.slane %v4632_v22, 7  ;;  %v1165_v33 = vrot.slane %v4629_v21, 6 }
  0x15   : > { %v4648_v29 = vpack.c.bf16 %v4641_v25, %v4638_v24  ;;  %v4651_v30 = vld [vmem:[%s4621_s11 + $0x10] sm:$0xf]  ;;  %442 = vmatpush.bf16.msra.mxu0 %v3984_v20  ;;  %v4654_v31 = vld [vmem:[%s4621_s11] sm:$0xf]  ;;  %v4657_v32 = vld [vmem:[%s4621_s11 + $0xc] sm:$0xf] }
  0x16   : > { %v1168_v34 = vrot.slane %v4657_v32, 5  ;;  %v1171_v35 = vrot.slane %v4651_v30, 4  ;;  %v1174_v36 = vrot.slane %v4635_v23, 3  ;;  %v1193_v37 = vsel %vm6973_vm1, %v1162_v28, %v4654_v31  ;;  %v4682_v45 = vld [vmem:[%s4621_s11 + $0x18] sm:$0xf]  ;;  %v4685_v46 = vld [vmem:[%s4626_s14 + $0x10] sm:$0xff] }
  0x17   : > { %945 = vperm.xlu2 %4155, %v940_v26   ;;  %4037 = vmatmul.msk.bf16.vlgmr.msra.gmra.mxu2 %vm398_vm0, %v4648_v29  ;;  %v1194_v38 = vsel %vm1169_vm2, %v1165_v33, %v1193_v37  ;;  %v979_v40 = vperm.slane %v4635_v23, 3  ;;  %v966_v43 = vperm.slane %v4651_v30, 3  ;;  %v4688_v47 = vld [vmem:[%s4626_s14 + $0x18] sm:$0xff]  ;;  %v992_v48 = vperm.slane %v4682_v45, 3  ;;  %v4704_v51 = vld [vmem:[%s4626_s14 + $0x20] sm:$0xff]  ;;  %v4707_v52 = vld [vmem:[%s4626_s14 + $0x28] sm:$0xff] }
  0x18   : > { %4025 = vmatmul.msk.bf16.vlgmr.msra.gmra.mxu1 %vm398_vm0, %v4648_v29  ;;  %4013 = vmatmul.msk.bf16.vlgmr.msra.gmra.mxu0 %vm398_vm0, %v4648_v29  ;;  %v1195_v39 = vsel %vm6972_vm3, %v1168_v34, %v1194_v38  ;;  %v4693_v49 = vpack.c.bf16 %v4688_v47, %v4685_v46  ;;  %v914_v50 = vperm.slane %v4654_v31, 3  ;;  %v4712_v53 = vpack.c.bf16 %v4707_v52, %v4704_v51  ;;  %v4726_v56 = vld [vmem:[%s4626_s14 + $0x30] sm:$0xff]  ;;  %v4729_v57 = vld [vmem:[%s4626_s14 + $0x38] sm:$0xff]  ;;  %v4751_v6 = vld [vmem:[%s4626_s14 + $0x40] sm:$0xff] }
  0x19   : > { %938 = vperm.xlu1 %4156, %v927_v27   ;;  %v1196_v41 = vsel %vm6971_vm4, %v1171_v35, %v1195_v39  ;;  %v4721_v54 = vperm.slane %v4657_v32, 1  ;;  %v1164_v55 = vsel %vm1163_vm7, %v1162_v28, %v4654_v31  ;;  %v4735_v59 = vpack.c.bf16 %v4729_v57, %v4726_v56  ;;  %v336_v61 = vld [vmem:[%s4621_s11 + $0x1c] sm:$0xf]  ;;  %v4754_v7 = vld [vmem:[%s4626_s14 + $0x48] sm:$0xff]  ;;  %v4771_v13 = vld [vmem:[%s4626_s14 + $0x50] sm:$0xff] }
  0x1a   : > { %v1197_v42 = vsel %vm6970_vm5, %v1174_v36, %v1196_v41  ;;  %v1167_v58 = vsel %vm6973_vm1, %v1165_v33, %v1164_v55  ;;  %v1180_v63 = vrot.slane %v336_v61, 1  ;;  %v1177_v1 = vrot.slane %v4682_v45, 2  ;;  %v4774_v15 = vld [vmem:[%s4626_s14 + $0x58] sm:$0xff]  ;;  %v317_v20 = vld [vmem:[%s4626_s14 + $0x60] sm:$0xff]  ;;  %v318_v28 = vld [vmem:[%s4626_s14 + $0x68] sm:$0xff] }
  0x1b   : > { %v1203_v44 = vsel %vm1202_vm6, %v1197_v42, 0.0  ;;  %v1170_v60 = vsel %vm1169_vm2, %v1168_v34, %v1167_v58  ;;  %v4759_v10 = vpack.c.bf16 %v4754_v7, %v4751_v6  ;;  %v4768_v12 = vperm.slane %v4682_v45, 1  ;;  %v4127_v39 = vld [vmem:[%s6956_s2 + $0x2c] sm:$0xf]  ;;  %v321_v42 = vld [vmem:[%s4626_s14 + $0x80] sm:$0xff] }
  0x1c   : > { %1204 = vadd.xlane.f32.xlu0 %v1203_v44  ;;  %v1173_v62 = vsel %vm6972_vm3, %v1171_v35, %v1170_v60  ;;  %v1188_v3 = vsel %vm1187_vm8, %v1180_v63, 0.0  ;;  %v1199_v9 = vsel %vm1198_vm10, %v1180_v63, %v1177_v1  ;;  %v4779_v16 = vpack.c.bf16 %v4774_v15, %v4771_v13  ;;  %v319_v35 = vld [vmem:[%s4626_s14 + $0x70] sm:$0xff]  ;;  %v4123_v44 = vld [vmem:[%s6956_s2 + $0xc] sm:$0xf] }
  0x1d   : > { %v1176_v2 = vsel %vm6971_vm4, %v1174_v36, %v1173_v62  ;;  %v1207_v11 = vsel %vm1206_vm11, %v1199_v9, 0.0  ;;  %v4782_v17 = vperm.slane %v4629_v21, 2  ;;  %v4794_v18 = vperm.slane %v4651_v30, 2  ;;  %v320_v36 = vld [vmem:[%s4626_s14 + $0x78] sm:$0xff]  ;;  %v323_v9 = vld [vmem:[%s4626_s14 + $0x90] sm:$0xff] }
  0x1e   : > { %v1179_v4 = vsel %vm6970_vm5, %v1177_v1, %v1176_v2  ;;  %v953_v19 = vperm.slane %v4657_v32, 3  ;;  %v4802_v33 = vpack.c.bf16 %v318_v28, %v317_v20  ;;  %v4805_v34 = vadd.s32 16, %v4591_v8 }
  0x1f   : > { %984 = vperm.xlu2 %4155, %v979_v40   ;;  %v1184_v5 = vsel %vm1183_vm9, %v1179_v4, 0.0  ;;  %v4817_v37 = vpack.c.bf16 %v320_v36, %v319_v35  ;;  %v1231_v38 = vperm.slane %v4632_v22, 1  ;;  %v1250_v63 = vperm.slane %v4629_v21, 1 }
  0x20   : > { %vm824_vm13 = vcmask 1045504  }
  0x21   : > { %977 = vperm.xlu1 %4156, %v966_v43  }
  0x27   : > { %997 = vperm.xlu2 %4155, %v992_v48   ;;  %4038 = vmatmul.msk.bf16.gmra.mxu2 %vm398_vm0, %v4693_v49 }
  0x28   : > { %4026 = vmatmul.msk.bf16.gmra.mxu1 %vm398_vm0, %v4693_v49  ;;  %4014 = vmatmul.msk.bf16.gmra.mxu0 %vm398_vm0, %v4693_v49 }
  0x29   : > { %990 = vperm.xlu1 %4156, %v979_v40   ;;  %v4009_v40 = vld [vmem:[%s6956_s2 + $0x38] sm:$0xf0] }
  0x2a   : > { %v4012_v41 = vor.u32 %v4127_v39, %v4009_v40 }
  0x2c   : > { %640 = vmatpush.bf16.msra.mxu3 %v4012_v41 }
  0x2f   : > { %4159 = vset.pattern.permute.xlu2 %v4605_v14 }
  0x30   : > { %919 = vperm.xlu0 %4158, %v914_v50  }
  0x31   : > { %4157 = vset.pattern.permute.xlu1 %v4591_v8 }
  0x37   : > { %4039 = vmatmul.msk.bf16.gmra.mxu2 %vm398_vm0, %v4712_v53 }
  0x38   : > { %4027 = vmatmul.msk.bf16.gmra.mxu1 %vm398_vm0, %v4712_v53  ;;  %4015 = vmatmul.msk.bf16.gmra.mxu0 %vm398_vm0, %v4712_v53 }
  0x39   : > { %971 = vperm.xlu0 %4158, %v966_v43   ;;  %v322_v43 = vld [vmem:[%s4626_s14 + $0x88] sm:$0xff] }
  0x3a   : > { %v4841_v55 = vpack.c.bf16 %v322_v43, %v321_v42 }
  0x41   : > { %1274 = vperm.xlu0 %4158, %v4721_v54  }
  0x47   : > { %4040 = vmatmul.msk.bf16.gmra.mxu2 %vm398_vm0, %v4735_v59 }
  0x48   : > { %4028 = vmatmul.msk.bf16.gmra.mxu1 %vm398_vm0, %v4735_v59  ;;  %4016 = vmatmul.msk.bf16.gmra.mxu0 %vm398_vm0, %v4735_v59 }
  0x49   : > { %4164 = vset.pattern.permute.xlu0 %v4605_v14 }
  0x50   : > { %1189 = vadd.xlane.f32.xlu2 %v1188_v3 }
  0x51   : > { %925 = vperm.xlu0 %4164, %v914_v50  }
  0x53   : > { %1185 = vadd.xlane.f32.xlu1 %v1184_v5 }
  0x57   : > { %4041 = vmatmul.msk.bf16.gmra.mxu2 %vm398_vm0, %v4759_v10 }
  0x58   : > { %1208 = vadd.xlane.f32.xlu2 %v1207_v11  ;;  %4029 = vmatmul.msk.bf16.gmra.mxu1 %vm398_vm0, %v4759_v10  ;;  %v324_v11 = vld [vmem:[%s4626_s14 + $0x98] sm:$0xff] }
  0x59   : > { %4017 = vmatmul.msk.bf16.gmra.mxu0 %vm398_vm0, %v4759_v10  ;;  %1003 = vperm.xlu0 %4164, %v992_v48   ;;  %v3993_v48 = vld [vmem:[%s6956_s2 + $0x18] sm:$0xf0] }
  0x5a   : > { %v3996_v50 = vor.u32 %v4123_v44, %v3993_v48 }
  0x5c   : > { %641 = vmatpush.bf16.msra.mxu3 %v3996_v50 }
  0x5f   : > { %4049 = vmatmul.msk.bf16.vlgmr.msra.gmra.mxu3 %vm398_vm0, %v4648_v29  ;;  %v4857_v29 = vpack.c.bf16 %v324_v11, %v323_v9 }
  0x61   : > { %1337 = vperm.xlu0 %4164, %v4768_v12  }
  0x67   : > { %4042 = vmatmul.msk.bf16.gmra.mxu2 %vm398_vm0, %v4779_v16 }
  0x68   : > { %4030 = vmatmul.msk.bf16.gmra.mxu1 %vm398_vm0, %v4779_v16 }
  0x69   : > { %4018 = vmatmul.msk.bf16.gmra.mxu0 %vm398_vm0, %v4779_v16  ;;  %1662 = vperm.xlu0 %4164, %v4782_v17  }
  0x6c   : > { %932 = vperm.xlu1 %4157, %v927_v27   ;;  %v1005_v27 = vperm.slane %v336_v61, 3 }
  0x6f   : > { %4050 = vmatmul.msk.bf16.gmra.mxu3 %vm398_vm0, %v4693_v49 }
  0x70   : > { %951 = vperm.xlu2 %4159, %v940_v26   ;;  %v1212_v26 = vperm.slane %v4654_v31, 1 }
  0x71   : > { %1700 = vperm.xlu0 %4164, %v4794_v18   ;;  %v4878_v44 = vpop.permute.xlu2 %945 }
  0x72   : > { %vm1022_vm8 = vcmp.gt.f32.partialorder %v4878_v44, 0.5 }
  0x74   : > { %958 = vperm.xlu1 %4157, %v953_v19  }
  0x77   : > { %4043 = vmatmul.msk.bf16.gmra.mxu2 %vm398_vm0, %v4802_v33 }
  0x78   : > { %964 = vperm.xlu2 %4159, %v953_v19   ;;  %4031 = vmatmul.msk.bf16.gmra.mxu1 %vm398_vm0, %v4802_v33 }
  0x79   : > { %4019 = vmatmul.msk.bf16.gmra.mxu0 %vm398_vm0, %v4802_v33  ;;  %4174 = vset.pattern.permute.xlu0 %v4805_v34  ;;  %v4890_v9 = vpop.permute.xlu2 %984 }
  0x7c   : > { %1010 = vperm.xlu1 %4157, %v1005_v27  }
  0x7f   : > { %4051 = vmatmul.msk.bf16.gmra.mxu3 %vm398_vm0, %v4712_v53 }
  0x80   : > { %1016 = vperm.xlu2 %4159, %v1005_v27   ;;  %v4860_v27 = vperm.slane %v4651_v30, 1 }
  0x81   : > { %1229 = vperm.xlu0 %4174, %v1212_v26  }
  0x84   : > { %1217 = vperm.xlu1 %4157, %v1212_v26  }
  0x87   : > { %4044 = vmatmul.msk.bf16.gmra.mxu2 %vm398_vm0, %v4817_v37 }
  0x88   : > { %1223 = vperm.xlu2 %4159, %v1212_v26   ;;  %4032 = vmatmul.msk.bf16.gmra.mxu1 %vm398_vm0, %v4817_v37 }
  0x89   : > { %4020 = vmatmul.msk.bf16.gmra.mxu0 %vm398_vm0, %v4817_v37  ;;  %1305 = vperm.xlu0 %4174, %v4860_v27  }
  0x8b   : > { %v4896_v11 = vpop.permute.xlu1 %938 }
  0x8c   : > { %1236 = vperm.xlu1 %4157, %v1231_v38   ;;  %vm1021_vm6 = vcmp.gt.f32.partialorder %v4896_v11, 0.5 }
  0x8f   : > { %v4863_v36 = vpop.xlane.xlu0 %1204  ;;  %4052 = vmatmul.msk.bf16.gmra.mxu3 %vm398_vm0, %v4735_v59  ;;  %v4949_v59 = vperm.slane %v4632_v22, 2 }
  0x90   : > { %1242 = vperm.xlu2 %4159, %v1231_v38   ;;  %6974 = vst [vmem:[#allocation2_spill] sm:$0xff] %v4863_v36 }
  0x91   : > { %1649 = vperm.xlu0 %4174, %v4949_v59  }
  0x93   : > { %v4916_v53 = vpop.permute.xlu1 %977 }
  0x94   : > { %4160 = vset.pattern.permute.xlu1 %v4805_v34 }
  0x95   : > { %v505_v58 = vpop.f32.mrf.mxu1  ;;  %v444_v60 = vpop.f32.mrf.mxu0 }
  0x96   : > { %v728_v62 = vrot.slane %v505_v58, 1 }
  0x97   : > { %4045 = vmatmul.msk.bf16.gmra.mxu2 %vm398_vm0, %v4841_v55 }
  0x98   : > { %4161 = vset.pattern.permute.xlu2 %v4591_v8  ;;  %4033 = vmatmul.msk.bf16.gmra.mxu1 %vm398_vm0, %v4841_v55 }
  0x99   : > { %4021 = vmatmul.msk.bf16.gmra.mxu0 %vm398_vm0, %v4841_v55  ;;  %1706 = vperm.xlu0 %4174, %v4794_v18  }
  0x9a   : > { %v574_v61 = vpop.f32.mrf.mxu2 }
  0x9b   : > { %v825_v19 = vrot.slane %v574_v61, 2  ;;  %v325_v61 = vld [vmem:[%s4626_s14 + $0xa0] sm:$0xff] }
  0x9c   : > { %1248 = vperm.xlu1 %4160, %v1231_v38  }
  0x9d   : > { %v507_v1 = vpop.f32.mrf.mxu1  ;;  %v446_v3 = vpop.f32.mrf.mxu0 }
  0x9e   : > { %v729_v2 = vrot.slane %v507_v1, 1 }
  0x9f   : > { %4053 = vmatmul.msk.bf16.gmra.mxu3 %vm398_vm0, %v4759_v10 }
  0xa0   : > { %1255 = vperm.xlu2 %4161, %v1250_v63   ;;  %v730_v4 = vsel %vm727_vm12, %v728_v62, %v729_v2  ;;  %v326_v62 = vld [vmem:[%s4626_s14 + $0xa8] sm:$0xff] }
  0xa1   : > { %v784_v5 = vadd.f32 %v730_v4, %v444_v60  ;;  %v4888_v49 = vpack.c.bf16 %v326_v62, %v325_v61 }
  0xa2   : > { %v576_v20 = vpop.f32.mrf.mxu2  ;;  %v4883_v60 = vpop.permute.xlu0 %919 }
  0xa3   : > { %v826_v28 = vrot.slane %v576_v20, 2  ;;  %6975 = vst [vmem:[#allocation3_spill] sm:$0xff] %v4888_v49  ;;  %vm1018_vm14 = vcmp.gt.f32.partialorder %v4883_v60, 0.5 }
  0xa4   : > { %4162 = vset.pattern.permute.xlu1 %v4605_v14 }
  0xa5   : > { %v510_v21 = vpop.f32.mrf.mxu1  ;;  %v827_v26 = vsel %vm824_vm13, %v825_v19, %v826_v28  ;;  %v449_v38 = vpop.f32.mrf.mxu0 }
  0xa6   : > { %v731_v35 = vrot.slane %v510_v21, 1  ;;  %v4866_v39 = vadd.f32 %v827_v26, %v784_v5 }
  0xa7   : > { %4046 = vmatmul.msk.bf16.gmra.mxu2 %vm398_vm0, %v4857_v29 }
  0xa8   : > { %4163 = vset.pattern.permute.xlu2 %v4805_v34  ;;  %v732_v30 = vsel %vm727_vm12, %v729_v2, %v731_v35  ;;  %4034 = vmatmul.msk.bf16.gmra.mxu1 %vm398_vm0, %v4857_v29 }
  0xa9   : > { %4022 = vmatmul.msk.bf16.gmra.mxu0 %vm398_vm0, %v4857_v29  ;;  %v785_v41 = vadd.f32 %v732_v30, %v446_v3 }
  0xaa   : > { %v579_v40 = vpop.f32.mrf.mxu2 }
  0xab   : > { %v828_v42 = vrot.slane %v579_v40, 2 }
  0xac   : > { %1261 = vperm.xlu1 %4162, %v1250_v63  }
  0xad   : > { %v512_v43 = vpop.f32.mrf.mxu1  ;;  %v829_v48 = vsel %vm824_vm13, %v826_v28, %v828_v42  ;;  %v450_v50 = vpop.f32.mrf.mxu0 }
  0xae   : > { %v4881_v58 = vadd.f32 %v829_v48, %v785_v41  ;;  %v733_v2 = vrot.slane %v512_v43, 1  ;;  %v4902_v28 = vpop.permute.xlu0 %971  ;;  %v327_v43 = vld [vmem:[%s4626_s14 + $0xb0] sm:$0xff]  ;;  %v328_v48 = vld [vmem:[%s4626_s14 + $0xb8] sm:$0xff] }
  0xaf   : > { %4054 = vmatmul.msk.bf16.gmra.mxu3 %vm398_vm0, %v4779_v16 }
  0xb0   : > { %1267 = vperm.xlu2 %4163, %v1250_v63  }
  0xb2   : > { %v581_v1 = vpop.f32.mrf.mxu2 }
  0xb3   : > { %v830_v20 = vrot.slane %v581_v1, 2  ;;  %v4919_v1 = vpack.c.bf16 %v328_v48, %v327_v43 }
  0xb4   : > { %1280 = vperm.xlu1 %4162, %v4721_v54  }
  0xb5   : > { %v515_v3 = vpop.f32.mrf.mxu1  ;;  %v453_v5 = vpop.f32.mrf.mxu0  ;;  %6977 = vst [vmem:[#allocation5_spill] sm:$0xff] %v4919_v1 }
  0xb6   : > { %v734_v4 = vrot.slane %v515_v3, 1 }
  0xb7   : > { %4047 = vmatmul.msk.bf16.gmra.mxu2 %vm398_vm0, %v4888_v49 }
  0xb8   : > { %1286 = vperm.xlu2 %4163, %v4721_v54   ;;  %v735_v63 = vsel %vm727_vm12, %v733_v2, %v734_v4  ;;  %4035 = vmatmul.msk.bf16.gmra.mxu1 %vm398_vm0, %v4888_v49  ;;  %v4921_v2 = vpop.permute.xlu0 %1274 }
  0xb9   : > { %v786_v19 = vadd.f32 %v735_v63, %v450_v50  ;;  %4023 = vmatmul.msk.bf16.gmra.mxu0 %vm398_vm0, %v4888_v49  ;;  %v4914_v50 = vpop.permute.xlu2 %997 }
  0xba   : > { %v584_v54 = vpop.f32.mrf.mxu2  ;;  %6976 = vst [vmem:[#allocation4_spill] sm:$0xff] %v4914_v50 }
  0xbb   : > { %v831_v21 = vrot.slane %v584_v54, 2 }
  0xbc   : > { %4165 = vset.pattern.permute.xlu1 %v4591_v8 }
  0xbd   : > { %v517_v26 = vpop.f32.mrf.mxu1  ;;  %v832_v35 = vsel %vm824_vm13, %v830_v20, %v831_v21  ;;  %v455_v30 = vpop.f32.mrf.mxu0  ;;  %v1307_v20 = vperm.slane %v4635_v23, 1 }
  0xbe   : > { %v736_v38 = vrot.slane %v517_v26, 1  ;;  %v4908_v40 = vadd.f32 %v832_v35, %v786_v19 }
  0xbf   : > { %4055 = vmatmul.msk.bf16.gmra.mxu3 %vm398_vm0, %v4802_v33 }
  0xc0   : > { %4166 = vset.pattern.permute.xlu2 %v4605_v14  ;;  %v737_v41 = vsel %vm727_vm12, %v734_v4, %v736_v38  ;;  %v337_v4 = vld [vmem:[%s6960_s6] sm:$0xff]  ;;  %v4943_v38 = vpop.permute.xlu1 %990 }
  0xc1   : > { %v787_v42 = vadd.f32 %v737_v41, %v453_v5  ;;  %v4935_v54 = vperm.slane %v337_v4, 0  ;;  %vm1029_vm5 = vcmp.gt.f32.partialorder %v4943_v38, 0.5 }
  0xc2   : > { %v586_v61 = vpop.f32.mrf.mxu2 }
  0xc3   : > { %v833_v62 = vrot.slane %v586_v61, 2  ;;  %v898_v35 = vadd.f32 %v4935_v54, %v4866_v39  ;;  %v899_v43 = vadd.f32 %v4935_v54, %v4881_v58 }
  0xc4   : > { %1293 = vperm.xlu1 %4165, %v4860_v27  }
  0xc5   : > { %v520_v3 = vpop.f32.mrf.mxu1  ;;  %v834_v63 = vsel %vm824_vm13, %v831_v21, %v833_v62  ;;  %v457_v19 = vpop.f32.mrf.mxu0  ;;  %v1066_v61 = vsel %vm1018_vm14, %v898_v35, -1e+30 }
  0xc6   : > { %v884_v5 = vadd.f32 %v834_v63, %v787_v42  ;;  %v4939_v21 = vpop.xlane.xlu2 %1189  ;;  %v926_v42 = vpop.permute.xlu0 %925  ;;  %4199 = vtanh.f32 %v1066_v61 }
  0xc7   : > { %4048 = vmatmul.msk.bf16.gmra.mxu2 %vm398_vm0, %v4919_v1  ;;  %6978 = vst [vmem:[#allocation6_spill] sm:$0xff] %v4939_v21  ;;  %vm1019_vm15 = vcmp.gt.f32.partialorder %v926_v42, 0.5 }
  0xc8   : > { %1299 = vperm.xlu2 %4166, %v4860_v27   ;;  %4036 = vmatmul.msk.bf16.gmra.mxu1 %vm398_vm0, %v4919_v1  ;;  %v738_v27 = vrot.slane %v520_v3, 1  ;;  %v1067_v60 = vsel %vm1019_vm15, %v899_v43, -1e+30  ;;  %v4954_v58 = vpop.xlane.xlu1 %1185  ;;  %v901_v43 = vadd.f32 %v4935_v54, %v884_v5 }
  0xc9   : > { %4024 = vmatmul.msk.bf16.gmra.mxu0 %vm398_vm0, %v4919_v1  ;;  %4201 = vtanh.f32 %v1067_v60 }
  0xca   : > { %v589_v26 = vpop.f32.mrf.mxu2  ;;  %v1069_v5 = vsel %vm1021_vm6, %v901_v43, -1e+30  ;;  %vm1026_vm6 = vcmp.gt.f32.partialorder %v4902_v28, 0.5 }
  0xcb   : > { %v835_v3 = vrot.slane %v589_v26, 2  ;;  %4203 = vtanh.f32 %v1069_v5 }
  0xcc   : > { %1312 = vperm.xlu1 %4165, %v1307_v20   ;;  %v4200_v26 = vpop.eup %4199 }
  0xcd   : > { %v522_v30 = vpop.f32.mrf.mxu1  ;;  %v459_v48 = vpop.f32.mrf.mxu0 }
  0xce   : > { %v739_v41 = vrot.slane %v522_v30, 1  ;;  %v4956_v30 = vpop.xlane.xlu2 %1208 }
  0xcf   : > { %6979 = vst [vmem:[#allocation7_spill] sm:$0xff] %v4956_v30  ;;  %v4202_v60 = vpop.eup %4201  ;;  %4056 = vmatmul.msk.bf16.gmra.mxu3 %vm398_vm0, %v4817_v37 }
  0xd0   : > { %1318 = vperm.xlu2 %4166, %v1307_v20   ;;  %v740_v39 = vsel %vm727_vm12, %v738_v27, %v739_v41 }
  0xd1   : > { %v788_v62 = vadd.f32 %v740_v39, %v457_v19 }
  0xd2   : > { %v591_v63 = vpop.f32.mrf.mxu2 }
  0xd3   : > { %v836_v4 = vrot.slane %v591_v63, 2  ;;  %v1098_v63 = vmax.f32 %v4200_v26, %v4202_v60  ;;  %v4204_v26 = vpop.eup %4203 }
  0xd4   : > { %4167 = vset.pattern.permute.xlu1 %v4805_v34 }
  0xd5   : > { %v837_v22 = vsel %vm824_vm13, %v835_v3, %v836_v4  ;;  %v525_v35 = vpop.f32.mrf.mxu1 }
  0xd6   : > { %v462_v42 = vpop.f32.mrf.mxu0  ;;  %v885_v27 = vadd.f32 %v837_v22, %v788_v62  ;;  %v741_v19 = vrot.slane %v525_v35, 1  ;;  %v900_v62 = vadd.f32 %v4935_v54, %v4908_v40  ;;  %v952_v10 = vpop.permute.xlu2 %951 }
  0xd7   : > { %vm1023_vm11 = vcmp.gt.f32.partialorder %v952_v10, 0.5 }
  0xd8   : > { %4168 = vset.pattern.permute.xlu2 %v4591_v8  ;;  %v742_v61 = vsel %vm727_vm12, %v739_v41, %v741_v19  ;;  %v902_v22 = vadd.f32 %v4935_v54, %v885_v27 }
  0xd9   : > { %v789_v39 = vadd.f32 %v742_v61, %v459_v48 }
  0xda   : > { %v594_v3 = vpop.f32.mrf.mxu2  ;;  %v1070_v61 = vsel %vm1022_vm8, %v902_v22, -1e+30  ;;  %vm1027_vm8 = vcmp.gt.f32.partialorder %v4916_v53, 0.5  ;;  %v1373_v53 = vmul.f32 %v4921_v2, %v4754_v7 }
  0xdb   : > { %v838_v35 = vrot.slane %v594_v3, 2 }
  0xdc   : > { %1324 = vperm.xlu1 %4167, %v1307_v20   ;;  %v5085_v7 = vsel %vm398_vm0, %v1373_v53, 0.0 }
  0xdd   : > { %v839_v41 = vsel %vm824_vm13, %v836_v4, %v838_v35  ;;  %v527_v48 = vpop.f32.mrf.mxu1 }
  0xde   : > { %v933_v42 = vpop.permute.xlu1 %932  ;;  %v886_v19 = vadd.f32 %v839_v41, %v789_v39  ;;  %v463_v11 = vpop.f32.mrf.mxu0  ;;  %v743_v44 = vrot.slane %v527_v48, 1  ;;  %v1099_v41 = vrot.slane %v1098_v63, 4 }
  0xdf   : > { %vm1020_vm9 = vcmp.gt.f32.partialorder %v933_v42, 0.5  ;;  %v965_v42 = vpop.permute.xlu2 %964  ;;  %4057 = vmatmul.msk.bf16.gmra.mxu3 %vm398_vm0, %v4841_v55  ;;  %v4131_v55 = vld [vmem:[%s6957_s3 + $0x8] sm:$0xff] }
  0xe0   : > { %v1068_v40 = vsel %vm1020_vm9, %v900_v62, -1e+30  ;;  %1331 = vperm.xlu2 %4168, %v4768_v12   ;;  %v903_v27 = vadd.f32 %v4935_v54, %v886_v19  ;;  %vm1025_vm15 = vcmp.gt.f32.partialorder %v965_v42, 0.5  ;;  %2086 = vmatpush.bf16.msrb.mxu0 %v4131_v55 }
  0xe1   : > { %4205 = vtanh.f32 %v1068_v40 }
  0xe2   : > { %4207 = vtanh.f32 %v1070_v61  ;;  %v1071_v20 = vsel %vm1023_vm11, %v903_v27, -1e+30  ;;  %v596_v4 = vpop.f32.mrf.mxu2 }
  0xe3   : > { %4209 = vtanh.f32 %v1071_v20  ;;  %v840_v19 = vrot.slane %v596_v4, 2  ;;  %v1100_v20 = vmax.f32 %v1098_v63, %v1099_v41  ;;  %v4986_v41 = vpop.permute.xlu0 %1003 }
  0xe4   : > { %1343 = vperm.xlu1 %4167, %v4768_v12  }
  0xe5   : > { %v530_v43 = vpop.f32.mrf.mxu1 }
  0xe6   : > { %v744_v60 = vrot.slane %v530_v43, 1  ;;  %v466_v3 = vpop.f32.mrf.mxu0  ;;  %v959_v4 = vpop.permute.xlu1 %958 }
  0xe7   : > { %v4206_v39 = vpop.eup %4205  ;;  %v4982_v36 = vpop.permute.xlu2 %1016  ;;  %vm1024_vm14 = vcmp.gt.f32.partialorder %v959_v4, 0.5 }
  0xe8   : > { %v1105_v22 = vmax.f32 %v4206_v39, %v4204_v26  ;;  %1637 = vperm.xlu2 %4168, %v4949_v59   ;;  %v4208_v62 = vpop.eup %4207  ;;  %v745_v35 = vsel %vm727_vm12, %v743_v44, %v744_v60  ;;  %6980 = vst [vmem:[#allocation8_spill] sm:$0xff] %v4982_v36 }
  0xe9   : > { %v4210_v5 = vpop.eup %4209  ;;  %v790_v61 = vadd.f32 %v745_v35, %v463_v11  ;;  %v1101_v11 = vrot.slane %v1100_v20, 2 }
  0xea   : > { %v1106_v10 = vrot.slane %v1105_v22, 4  ;;  %v1112_v12 = vmax.f32 %v4208_v62, %v4210_v5  ;;  %v599_v48 = vpop.f32.mrf.mxu2 }
  0xeb   : > { %v841_v40 = vrot.slane %v599_v48, 2 }
  0xec   : > { %4169 = vset.pattern.permute.xlu1 %v4605_v14  ;;  %v1113_v27 = vrot.slane %v1112_v12, 4  ;;  %v1107_v26 = vmax.f32 %v1105_v22, %v1106_v10 }
  0xed   : > { %v842_v43 = vsel %vm824_vm13, %v840_v19, %v841_v40  ;;  %v532_v44 = vpop.f32.mrf.mxu1 }
  0xee   : > { %v1114_v39 = vmax.f32 %v1112_v12, %v1113_v27  ;;  %v887_v0 = vadd.f32 %v842_v43, %v790_v61  ;;  %v746_v21 = vrot.slane %v532_v44, 1  ;;  %v468_v30 = vpop.f32.mrf.mxu0  ;;  %v1108_v62 = vrot.slane %v1107_v26, 2 }
  0xef   : > { %v1102_v30 = vmax.f32 %v1100_v20, %v1101_v11  ;;  %v4997_v44 = vperm.slane %v4654_v31, 2  ;;  %v4999_v42 = vpop.permute.xlu2 %1223  ;;  %4058 = vmatmul.msk.bf16.gmra.mxu3 %vm398_vm0, %v4857_v29 }
  0xf0   : > { %1656 = vperm.xlu2 %4168, %v4782_v17   ;;  %v747_v16 = vsel %vm727_vm12, %v744_v60, %v746_v21  ;;  %v1115_v5 = vrot.slane %v1114_v39, 2  ;;  %v904_v63 = vadd.f32 %v4935_v54, %v887_v0  ;;  %v1109_v10 = vmax.f32 %v1107_v26, %v1108_v62 }
  0xf1   : > { %v791_v35 = vadd.f32 %v747_v16, %v466_v3  ;;  %v1103_v0 = vrot.slane %v1102_v30, 1 }
  0xf2   : > { %v601_v48 = vpop.f32.mrf.mxu2  ;;  %v1116_v21 = vmax.f32 %v1114_v39, %v1115_v5  ;;  %v1072_v12 = vsel %vm1024_vm14, %v904_v63, -1e+30  ;;  %v1110_v43 = vrot.slane %v1109_v10, 1 }
  0xf3   : > { %v843_v22 = vrot.slane %v601_v48, 2  ;;  %4211 = vtanh.f32 %v1072_v12  ;;  %v1104_v4 = vmax.f32 %v1102_v30, %v1103_v0  ;;  %v5004_v48 = vmax.f32 %v4954_v58, 1.0 }
  0xf4   : > { %1643 = vperm.xlu1 %4169, %v4949_v59   ;;  %v4991_v59 = vpop.permute.xlu1 %1010  ;;  %v1117_v20 = vrot.slane %v1116_v21, 1  ;;  %v1111_v16 = vmax.f32 %v1109_v10, %v1110_v43  ;;  %v5015_v43 = vperm.slane %v4657_v32, 2 }
  0xf5   : > { %v844_v19 = vsel %vm824_vm13, %v841_v40, %v843_v22  ;;  %v535_v61 = vpop.f32.mrf.mxu1  ;;  %6981 = vst [vmem:[#allocation9_spill] sm:$0xff] %v4991_v59  ;;  %v5023_v32 = vrot.slane %v5004_v48, 2 }
  0xf6   : > { %v888_v60 = vadd.f32 %v844_v19, %v791_v35  ;;  %v470_v3 = vpop.f32.mrf.mxu0  ;;  %v748_v39 = vrot.slane %v535_v61, 1  ;;  %v1118_v62 = vmax.f32 %v1116_v21, %v1117_v20  ;;  %v5001_v35 = vpop.permute.xlu0 %1337  ;;  %6983 = vst [vmem:[#allocation11_spill] sm:$0xff] %v5004_v48  ;;  %v3676_v19 = vpack.c.bf16 %v1104_v4, %v1104_v4 }
  0xf7   : > { %6982 = vst [vmem:[#allocation10_spill] sm:$0xff] %v5001_v35  ;;  %v3677_v30 = vpack.c.bf16 %v1111_v16, %v1111_v16  ;;  %v1517_v1 = vand.u32 2147483647, %v5023_v32 }
  0xf8   : > { %4171 = vset.pattern.permute.xlu2 %v4605_v14  ;;  %v905_v27 = vadd.f32 %v4935_v54, %v888_v60  ;;  %v3678_v60 = vpack.c.bf16 %v1118_v62, %v1118_v62 }
  0xf9   : > { %v4212_v63 = vpop.eup %4211 }
  0xfa   : > { %v1073_v40 = vsel %vm1025_vm15, %v905_v27, -1e+30  ;;  %v604_v26 = vpop.f32.mrf.mxu2  ;;  %v5009_v27 = vrot.slane %v5004_v48, 1  ;;  %v3827_v4 = vunpack.c.l.b16 %v3678_v60  ;;  %vm1513_vm15 = vweird.f32 %v5023_v32 }
  0xfb   : > { %4213 = vtanh.f32 %v1073_v40  ;;  %v845_v10 = vrot.slane %v604_v26, 2  ;;  %v3825_v40 = vunpack.c.l.b16 %v3676_v19 }
  0xfc   : > { %4170 = vset.pattern.permute.xlu1 %v4591_v8  ;;  %v5011_v0 = vpop.permute.xlu1 %1217  ;;  %4215 = vrcp.f32 %v5009_v27  ;;  %v1502_v36 = vand.u32 2147483647, %v5009_v27  ;;  %vm1498_vm11 = vweird.f32 %v5009_v27 }
  0xfd   : > { %v537_v11 = vpop.f32.mrf.mxu1  ;;  %4217 = vrcp.f32 %v5023_v32 }
  0xfe   : > { %v749_v33 = vrot.slane %v537_v11, 1  ;;  %v472_v5 = vpop.f32.mrf.mxu0 }
 0x100   : > { %1624 = vperm.xlu2 %4171, %v4997_v44   ;;  %v750_v31 = vsel %vm727_vm12, %v748_v39, %v749_v33  ;;  %v3826_v39 = vunpack.c.l.b16 %v3677_v30 }
 0x101   : > { %v4214_v22 = vpop.eup %4213  ;;  %v792_v61 = vadd.f32 %v750_v31, %v470_v3  ;;  %v5019_v31 = vpop.permute.xlu2 %1242 }
 0x102   : > { %v1119_v12 = vmax.f32 %v4212_v63, %v4214_v22  ;;  %v606_v21 = vpop.f32.mrf.mxu2  ;;  %v5025_v22 = vpop.permute.xlu0 %1662 }
 0x103   : > { %v846_v58 = vrot.slane %v606_v21, 2  ;;  %6984 = vst [vmem:[#allocation12_spill] sm:$0xff] %v5025_v22  ;;  %v5041_v37 = vpop.eup %4215 }
 0x104   : > { %1618 = vperm.xlu1 %4170, %v4997_v44   ;;  %v1120_v20 = vrot.slane %v1119_v12, 4  ;;  %vm1499_vm9 = vweird.f32 %v5041_v37 }
 0x105   : > { %v847_v26 = vsel %vm824_vm13, %v845_v10, %v846_v58  ;;  %v540_v3 = vpop.f32.mrf.mxu1  ;;  %v3833_v10 = vsel %vm1198_vm10, %v3826_v39, %v3825_v40  ;;  %vm5188_vm4 = vmor %vm1498_vm11, %vm1499_vm9 }
 0x106   : > { %v1121_v16 = vmax.f32 %v1119_v12, %v1120_v20  ;;  %v889_v11 = vadd.f32 %v847_v26, %v792_v61  ;;  %v751_v62 = vrot.slane %v540_v3, 1  ;;  %v475_v63 = vpop.f32.mrf.mxu0  ;;  %v5033_v21 = vsel %vm1163_vm7, %v3827_v4, %v3833_v10 }
 0x107   : > { %v5037_v20 = vrot.slane %v5004_v48, 3 }
 0x108   : > { %1681 = vperm.xlu2 %4171, %v5015_v43   ;;  %v752_v19 = vsel %vm727_vm12, %v749_v33, %v751_v62  ;;  %v1122_v61 = vrot.slane %v1121_v16, 2  ;;  %v906_v60 = vadd.f32 %v4935_v54, %v889_v11  ;;  %v1237_v33 = vpop.permute.xlu1 %1236  ;;  %v1494_v62 = vmul.f32 %v5041_v37, %v5009_v27 }
 0x109   : > { %v793_v30 = vadd.f32 %v752_v19, %v472_v5  ;;  %4219 = vrcp.f32 %v5037_v20  ;;  %v1256_v28 = vpop.permute.xlu2 %1255 }
 0x10a   : > { %v609_v12 = vpop.f32.mrf.mxu2  ;;  %v1123_v39 = vmax.f32 %v1121_v16, %v1122_v61  ;;  %v1074_v3 = vsel %vm1026_vm6, %v906_v60, -1e+30  ;;  %v5056_v16 = vpop.permute.xlu0 %1700  ;;  %v5061_v61 = vrot.slane %v5004_v48, 4  ;;  %v5065_v60 = vrot.slane %v5004_v48, 5 }
 0x10b   : > { %v848_v26 = vrot.slane %v609_v12, 2  ;;  %4221 = vtanh.f32 %v1074_v3  ;;  %6985 = vst [vmem:[#allocation13_spill] sm:$0xff] %v5056_v16  ;;  %v1495_v12 = vsub.f32 1.0, %v1494_v62  ;;  %v1504_v16 = vand.u32 2147483648, %v5009_v27 }
 0x10c   : > { %1675 = vperm.xlu1 %4170, %v5015_v43   ;;  %v1124_v19 = vrot.slane %v1123_v39, 1  ;;  %vm5158_vm6 = vcmp.eq.f32.partialorder %v1502_v36, 8.507059e+37  ;;  %v1532_v27 = vand.u32 2147483647, %v5037_v20 }
 0x10d   : > { %v849_v5 = vsel %vm824_vm13, %v846_v58, %v848_v26  ;;  %v5044_v40 = vpop.f32.mrf.mxu1  ;;  %v5054_v58 = vpop.eup %4217  ;;  %v1496_v2 = vmul.f32 %v5041_v37, %v1495_v12 }
 0x10e   : > { %v890_v4 = vadd.f32 %v849_v5, %v793_v30  ;;  %v5046_v11 = vpop.f32.mrf.mxu0  ;;  %v5072_v5 = vrot.slane %v5004_v48, 6  ;;  %v1509_v3 = vmul.f32 %v5054_v58, %v5023_v32  ;;  %v5098_v48 = vor.u32 1.1754944e-38, %v1504_v16 }
 0x10f   : > { %v5069_v26 = vpop.eup %4219  ;;  %v5116_v16 = vadd.f32 %v5041_v37, %v1496_v2  ;;  %v753_v2 = vrot.slane %v5044_v40, 1  ;;  %vm1514_vm14 = vweird.f32 %v5054_v58 }
 0x110   : > { %4173 = vset.pattern.permute.xlu2 %v4591_v8  ;;  %v907_v63 = vadd.f32 %v4935_v54, %v890_v4  ;;  %6986 = vst [vmem:[#allocation14_spill] sm:$0xff] %v5072_v5  ;;  %v1249_v4 = vpop.permute.xlu1 %1248  ;;  %v5090_v62 = vmul.f32 %v5069_v26, %v5037_v20  ;;  %vm1529_vm3 = vweird.f32 %v5069_v26  ;;  %vm5208_vm9 = vmor %vm1513_vm15, %vm1514_vm14  ;;  %vm5249_vm14 = vcmp.eq.f32.partialorder %v1532_v27, 8.507059e+37 }
 0x111   : > { %v4222_v59 = vpop.eup %4221  ;;  %v1268_v35 = vpop.permute.xlu2 %1267 }
 0x112   : > { %v1075_v30 = vsel %vm1027_vm8, %v907_v63, -1e+30  ;;  %v5058_v10 = vpop.f32.mrf.mxu2  ;;  %vm5168_vm8 = vcmp.eq.f32.partialorder %v1517_v1, 8.507059e+37 }
 0x113   : > { %4223 = vtanh.f32 %v1075_v30  ;;  %v1125_v30 = vmax.f32 %v1123_v39, %v1124_v19  ;;  %v1365_v19 = vmul.f32 %v4999_v42, %v4641_v25  ;;  %v1364_v25 = vmul.f32 %v5011_v0, %v4638_v24 }
 0x114   : > { %4172 = vset.pattern.permute.xlu1 %v4805_v34  ;;  %4225 = vrcp.f32 %v5061_v61  ;;  %v1370_v24 = vmul.f32 %v1256_v28, %v4726_v56 }
 0x115   : > { %v5076_v63 = vpop.f32.mrf.mxu1  ;;  %4227 = vrcp.f32 %v5065_v60  ;;  %v3679_v53 = vpack.c.bf16 %v1125_v30, %v1125_v30 }
 0x116   : > { %v5079_v22 = vpop.f32.mrf.mxu0  ;;  %4229 = vrcp.f32 %v5072_v5  ;;  %v1368_v5 = vmul.f32 %v5019_v31, %v4704_v51  ;;  %v1230_v51 = vpop.permute.xlu0 %1229  ;;  %v1367_v31 = vmul.f32 %v1237_v33, %v4688_v47  ;;  %v754_v33 = vrot.slane %v5076_v63, 1 }
 0x117   : > { %v3828_v56 = vunpack.c.l.b16 %v3679_v53  ;;  %v1366_v55 = vmul.f32 %v1230_v51, %v4685_v46  ;;  %v1410_v49 = vsel %vm398_vm0, %v1370_v24, 0.0  ;;  %v5150_v46 = vperm.slane %v4682_v45, 2 }
 0x118   : > { %1694 = vperm.xlu2 %4173, %v4794_v18   ;;  %v1510_v18 = vsub.f32 1.0, %v1509_v3  ;;  %v1389_v3 = vsel %vm398_vm0, %v1365_v19, 0.0  ;;  %v1400_v40 = vsel %vm398_vm0, %v1368_v5, 0.0  ;;  %v1399_v53 = vsel %vm398_vm0, %v1367_v31, 0.0 }
 0x119   : > { %v4224_v39 = vpop.eup %4223  ;;  %v850_v5 = vrot.slane %v5058_v10, 2  ;;  %v755_v31 = vsel %vm727_vm12, %v753_v2, %v754_v33  ;;  %v1401_v10 = vadd.f32 %v1400_v40, %v1399_v53 }
 0x11a   : > { %v1126_v12 = vmax.f32 %v4222_v59, %v4224_v39  ;;  %v5101_v50 = vpop.f32.mrf.mxu2  ;;  %v5113_v59 = vperm.slane %v4635_v23, 2  ;;  %v1511_v30 = vmul.f32 %v5054_v58, %v1510_v18  ;;  %v1369_v23 = vmul.f32 %v1249_v4, %v4707_v52 }
 0x11b   : > { %v1388_v18 = vsel %vm398_vm0, %v1364_v25, 0.0  ;;  %v1372_v25 = vmul.f32 %v1268_v35, %v4751_v6  ;;  %v851_v51 = vrot.slane %v5101_v50, 2  ;;  %v1287_v6 = vpop.permute.xlu2 %1286 }
 0x11c   : > { %1668 = vperm.xlu1 %4172, %v4782_v17   ;;  %v5122_v17 = vpop.eup %4225  ;;  %1725 = vperm.xlu0 %4174, %v5113_v59   ;;  %v1127_v0 = vrot.slane %v1126_v12, 4  ;;  %v1390_v50 = vadd.f32 %v1389_v3, %v1388_v18  ;;  %v1512_v2 = vadd.f32 %v5054_v58, %v1511_v30  ;;  %v1375_v1 = vmul.f32 %v1287_v6, %v4774_v15 }
 0x11d   : > { %v547_v42 = vpop.f32.mrf.mxu1  ;;  %v5129_v47 = vpop.eup %4227  ;;  %v852_v30 = vsel %vm824_vm13, %v850_v5, %v851_v51  ;;  %vm1544_vm15 = vweird.f32 %v5122_v17 }
 0x11e   : > { %v1262_v39 = vpop.permute.xlu1 %1261  ;;  %v756_v19 = vrot.slane %v547_v42, 1  ;;  %v481_v52 = vpop.f32.mrf.mxu0  ;;  %v1402_v42 = vsel %vm398_vm0, %v1369_v23, 0.0  ;;  %v1128_v23 = vmax.f32 %v1126_v12, %v1127_v0  ;;  %v1413_v12 = vsel %vm398_vm0, %v1372_v25, 0.0 }
 0x11f   : > { %v1371_v28 = vmul.f32 %v1262_v39, %v4729_v57  ;;  %v5135_v4 = vpop.eup %4229  ;;  %v794_v0 = vadd.f32 %v755_v31, %v5046_v11 }
 0x120   : > { %4175 = vset.pattern.permute.xlu2 %v4805_v34  ;;  %v757_v63 = vsel %vm727_vm12, %v754_v33, %v756_v19  ;;  %v1129_v18 = vrot.slane %v1128_v23, 2 }
 0x121   : > { %v1411_v57 = vsel %vm398_vm0, %v1371_v28, 0.0  ;;  %v5156_v28 = vsel %vm6973_vm1, %v3828_v56, %v5033_v21  ;;  %v795_v45 = vadd.f32 %v757_v63, %v5079_v22  ;;  %v1539_v21 = vmul.f32 %v5122_v17, %v5061_v61 }
 0x122   : > { %v1412_v24 = vadd.f32 %v1411_v57, %v1410_v49  ;;  %v616_v39 = vpop.f32.mrf.mxu2  ;;  %v1391_v49 = vsel %vm398_vm0, %v1366_v55, 0.0  ;;  %v1403_v56 = vadd.f32 %v1402_v42, %v1401_v10  ;;  %v6993_v55 = vsub.f32 1.0, %v5090_v62 }
 0x123   : > { %v853_v35 = vrot.slane %v616_v39, 2  ;;  %vm1028_vm1 = vcmp.gt.f32.partialorder %v4890_v9, 0.5  ;;  %v1540_v57 = vsub.f32 1.0, %v1539_v21  ;;  %v1392_v62 = vadd.f32 %v1391_v49, %v1390_v50 }
 0x124   : > { %1630 = vperm.xlu1 %4172, %v4997_v44   ;;  %1744 = vperm.xlu0 %4174, %v5150_v46   ;;  %v1414_v33 = vadd.f32 %v1413_v12, %v1412_v24  ;;  %v1526_v53 = vmul.f32 %v5069_v26, %v6993_v55  ;;  %v891_v5 = vadd.f32 %v852_v30, %v794_v0  ;;  %v5237_v12 = vpop.f32.mrf.mxu3  ;;  %v1300_v30 = vpop.permute.xlu2 %1299 }
 0x125   : > { %v854_v22 = vsel %vm824_vm13, %v851_v51, %v853_v35  ;;  %v5175_v3 = vpop.f32.mrf.mxu1  ;;  %v1534_v51 = vand.u32 2147483648, %v5037_v20  ;;  %v1130_v39 = vmax.f32 %v1128_v23, %v1129_v18  ;;  %v1393_v23 = vrot.slane %v1392_v62, 4  ;;  %v1306_v55 = vpop.permute.xlu0 %1305 }
 0x126   : > { %v1281_v44 = vpop.permute.xlu1 %1280  ;;  %v5182_v40 = vpop.f32.mrf.mxu0  ;;  %v892_v15 = vadd.f32 %v854_v22, %v795_v45  ;;  %v1415_v31 = vrot.slane %v1414_v33, 4  ;;  %v1527_v10 = vadd.f32 %v5069_v26, %v1526_v53  ;;  %v1541_v45 = vmul.f32 %v5122_v17, %v1540_v57 }
 0x127   : > { %v1374_v52 = vmul.f32 %v1281_v44, %v4771_v13  ;;  %v1501_v13 = vsel %vm5188_vm4, %v5041_v37, %v5116_v16  ;;  %v1516_v37 = vsel %vm5208_vm9, %v5054_v58, %v1512_v2  ;;  %v1424_v16 = vsel %vm398_vm0, %v1375_v1, 0.0 }
 0x128   : > { %1687 = vperm.xlu2 %4175, %v5015_v43   ;;  %v1404_v43 = vrot.slane %v1403_v56, 4  ;;  %v909_v6 = vadd.f32 %v4935_v54, %v892_v15  ;;  %v5228_v29 = vsel %vm5158_vm6, %v5098_v48, %v1501_v13  ;;  %v6996_v58 = vand.u32 2147483648, %v5023_v32  ;;  %v5278_v13 = vld [vmem:[%s4626_s14 + $0x68] sm:$0xff] }
 0x129   : > { %v1422_v63 = vsel %vm398_vm0, %v1374_v52, 0.0  ;;  %vm1528_vm4 = vweird.f32 %v5037_v20  ;;  %v908_v49 = vadd.f32 %v4935_v54, %v891_v5  ;;  %v1535_v19 = vor.u32 1.1754944e-38, %v1534_v51 }
 0x12a   : > { %v1423_v25 = vadd.f32 %v1422_v63, %v5085_v7  ;;  %v5220_v24 = vpop.f32.mrf.mxu2  ;;  %v1520_v35 = vor.u32 1.1754944e-38, %v6996_v58  ;;  %v1405_v50 = vadd.f32 %v1404_v43, %v1403_v56  ;;  %vm5245_vm11 = vmor %vm1528_vm4, %vm1529_vm3  ;;  %v1416_v56 = vadd.f32 %v1415_v31, %v1414_v33 }
 0x12b   : > { %v1131_v22 = vrot.slane %v1130_v39, 1  ;;  %v1531_v36 = vsel %vm5245_vm11, %v5069_v26, %v1527_v10  ;;  %v1077_v44 = vsel %vm1029_vm5, %v909_v6, -1e+30  ;;  %vm1543_vm3 = vweird.f32 %v5061_v61 }
 0x12c   : > { %v1425_v7 = vadd.f32 %v1424_v16, %v1423_v25  ;;  %4176 = vset.pattern.permute.xlu1 %v4591_v8  ;;  %v5241_v48 = vsel %vm5168_vm8, %v1520_v35, %v1516_v37  ;;  %v5263_v1 = vadd.f32 %v5122_v17, %v1541_v45  ;;  %v1549_v33 = vand.u32 2147483648, %v5061_v61  ;;  %v5300_v37 = vld [vmem:[%s4626_s14 + $0x70] sm:$0xff]  ;;  %v5308_v35 = vld [vmem:[%s4626_s14 + $0x60] sm:$0xff] }
 0x12d   : > { %v5235_v21 = vpop.f32.mrf.mxu1  ;;  %v1394_v11 = vadd.f32 %v1393_v23, %v1392_v62  ;;  %v1406_v18 = vrot.slane %v1405_v50, 2  ;;  %v1076_v38 = vsel %vm1028_vm1, %v908_v49, -1e+30  ;;  %v5271_v26 = vmul.f32 %v5129_v47, %v5065_v60  ;;  %vm5287_vm1 = vmor %vm1543_vm3, %vm1544_vm15  ;;  %v5311_v49 = vpop.f32.mrf.mxu3 }
 0x12e   : > { %v1426_v2 = vrot.slane %v1425_v7, 4  ;;  %v5253_v0 = vpop.f32.mrf.mxu0  ;;  %v5275_v53 = vsel %vm5249_vm14, %v1535_v19, %v1531_v36  ;;  %v1417_v15 = vrot.slane %v1416_v56, 2  ;;  %4231 = vtanh.f32 %v1077_v44 }
 0x12f   : > { %v1377_v27 = vmul.f32 %v5278_v13, %v1300_v30  ;;  %v1132_v9 = vmax.f32 %v1130_v39, %v1131_v22  ;;  %v1547_v62 = vand.u32 2147483647, %v5061_v61  ;;  %v758_v42 = vrot.slane %v5175_v3, 1 }
 0x130   : > { %4177 = vset.pattern.permute.xlu2 %v4605_v14  ;;  %v1427_v52 = vadd.f32 %v1426_v2, %v1425_v7  ;;  %v759_v43 = vrot.slane %v5235_v21, 1  ;;  %4233 = vtanh.f32 %v1076_v38  ;;  %v1546_v5 = vsel %vm5287_vm1, %v5122_v17, %v5263_v1  ;;  %v7003_v38 = vld [vmem:[#allocation3_spill] sm:$0xff] }
 0x131   : > { %v1378_v16 = vmul.f32 %v5300_v37, %v1306_v55  ;;  %v1395_v51 = vrot.slane %v1394_v11, 2  ;;  %v1407_v31 = vadd.f32 %v1406_v18, %v1405_v50  ;;  %v5303_v39 = vor.u32 1.1754944e-38, %v1549_v33  ;;  %4059 = vmatmul.msk.bf16.gmra.mxu3 %vm398_vm0, %v7003_v38 }
 0x132   : > { %v5281_v57 = vpop.f32.mrf.mxu2  ;;  %v1428_v25 = vrot.slane %v1427_v52, 2  ;;  %v1555_v6 = vsub.f32 1.0, %v5271_v26  ;;  %v1418_v7 = vadd.f32 %v1417_v15, %v1416_v56  ;;  %v1433_v58 = vsel %vm398_vm0, %v1377_v27, 0.0 }
 0x133   : > { %v855_v21 = vrot.slane %v5220_v24, 2  ;;  %v856_v50 = vrot.slane %v5281_v57, 2  ;;  %v760_v32 = vsel %vm727_vm12, %v758_v42, %v759_v43  ;;  %v3680_v20 = vpack.c.bf16 %v1132_v9, %v1132_v9  ;;  %v1319_v24 = vpop.permute.xlu2 %1318 }
 0x134   : > { %1713 = vperm.xlu1 %4176, %v5113_v59   ;;  %v4232_v19 = vpop.eup %4231  ;;  %v1429_v56 = vadd.f32 %v1428_v25, %v1427_v52  ;;  %v1435_v36 = vsel %vm398_vm0, %v1378_v16, 0.0  ;;  %vm1031_vm5 = vcmp.gt.f32.partialorder %v4986_v41, 0.5  ;;  %v1396_v30 = vadd.f32 %v1395_v51, %v1394_v11  ;;  %v5330_v16 = vld [vmem:[%s4626_s14 + $0x80] sm:$0xff] }
 0x135   : > { %v555_v10 = vpop.f32.mrf.mxu1  ;;  %v1408_v33 = vrot.slane %v1407_v31, 1  ;;  %vm1559_vm6 = vweird.f32 %v5129_v47  ;;  %v1419_v26 = vrot.slane %v1418_v7, 1  ;;  %v796_v55 = vadd.f32 %v760_v32, %v5182_v40 }
 0x136   : > { %v1294_v3 = vpop.permute.xlu1 %1293  ;;  %v761_v23 = vrot.slane %v555_v10, 1  ;;  %v488_v2 = vpop.f32.mrf.mxu0  ;;  %v1562_v15 = vand.u32 2147483647, %v5065_v60  ;;  %v857_v9 = vsel %vm824_vm13, %v855_v21, %v856_v50  ;;  %v1430_v25 = vrot.slane %v1429_v56, 1 }
 0x137   : > { %v1376_v45 = vmul.f32 %v5308_v35, %v1294_v3  ;;  %v4234_v52 = vpop.eup %4233  ;;  %v1380_v51 = vmul.f32 %v5330_v16, %v1319_v24  ;;  %v1556_v40 = vmul.f32 %v5129_v47, %v1555_v6  ;;  %v1397_v10 = vrot.slane %v1396_v30, 1 }
 0x138   : > { %1719 = vperm.xlu2 %4177, %v5113_v59   ;;  %v762_v44 = vsel %vm727_vm12, %v759_v43, %v761_v23  ;;  %v3829_v59 = vunpack.c.l.b16 %v3680_v20  ;;  %v1133_v11 = vmax.f32 %v4234_v52, %v4232_v19  ;;  %v1420_v32 = vadd.f32 %v1419_v26, %v1418_v7 }
 0x139   : > { %v1432_v22 = vsel %vm398_vm0, %v1376_v45, 0.0  ;;  %v797_v57 = vadd.f32 %v762_v44, %v5253_v0  ;;  %v7004_v0 = vld [vmem:[#allocation4_spill] sm:$0xff]  ;;  %v893_v20 = vadd.f32 %v857_v9, %v796_v55  ;;  %v1564_v24 = vand.u32 2147483648, %v5065_v60 }
 0x13a   : > { %v1434_v18 = vadd.f32 %v1433_v58, %v1432_v22  ;;  %v624_v27 = vpop.f32.mrf.mxu2  ;;  %v5336_v3 = vsel %vm1169_vm2, %v3829_v59, %v5156_v28  ;;  %vm1030_vm8 = vcmp.gt.f32.partialorder %v7004_v0, 0.5  ;;  %v1409_v58 = vadd.f32 %v1408_v33, %v1407_v31  ;;  %v5341_v22 = vld [vmem:[%s4626_s14 + $0x78] sm:$0xff] }
 0x13b   : > { %v858_v43 = vrot.slane %v624_v27, 2  ;;  %v1134_v44 = vrot.slane %v1133_v11, 4  ;;  %v4460_v33 = vld [vmem:[%s4621_s11 + $0x1c] sm:$0xf]  ;;  %v1444_v7 = vsel %vm398_vm0, %v1380_v51, 0.0  ;;  %v1557_v26 = vadd.f32 %v5129_v47, %v1556_v40 }
 0x13c   : > { %v1436_v42 = vadd.f32 %v1435_v36, %v1434_v18  ;;  %1732 = vperm.xlu1 %4176, %v5150_v46   ;;  %v5344_v36 = vpop.f32.mrf.mxu3  ;;  %v1431_v18 = vadd.f32 %v1430_v25, %v1429_v56  ;;  %v1522_v52 = vmul.f32 %v5241_v48, %v1409_v58  ;;  %vm1548_vm9 = vcmp.eq.f32.partialorder %v1547_v62, 8.507059e+37 }
 0x13d   : > { %v859_v23 = vsel %vm824_vm13, %v856_v50, %v858_v43  ;;  %v557_v21 = vpop.f32.mrf.mxu1  ;;  %v5349_v50 = vperm.slane %v4460_v33, 1  ;;  %v910_v56 = vadd.f32 %v4935_v54, %v893_v20  ;;  %v1551_v48 = vsel %vm1548_vm9, %v5303_v39, %v1546_v5  ;;  %v4139_v20 = vld [vmem:[%s6958_s4 + $0x38] sm:$0xff] }
 0x13e   : > { %v1437_v45 = vrot.slane %v1436_v42, 4  ;;  %v1313_v2 = vpop.permute.xlu1 %1312  ;;  %v894_v19 = vadd.f32 %v859_v23, %v797_v57  ;;  %v489_v28 = vpop.f32.mrf.mxu0  ;;  %v1398_v57 = vadd.f32 %v1397_v10, %v1396_v30  ;;  %vm1558_vm4 = vweird.f32 %v5065_v60  ;;  %3890 = vmatpush.bf16.msrb.mxu3 %v4139_v20 }
 0x13f   : > { %v1379_v6 = vmul.f32 %v5341_v22, %v1313_v2  ;;  %vm5372_vm11 = vmor %vm1558_vm4, %vm1559_vm6  ;;  %vm5376_vm14 = vcmp.eq.f32.partialorder %v1562_v15, 8.507059e+37  ;;  %v763_v1 = vrot.slane %v557_v21, 1  ;;  %v2022_v63 = vrot.slane %v1522_v52, 7  ;;  %v1332_v21 = vpop.permute.xlu2 %1331 }
 0x140   : > { %v1438_v31 = vadd.f32 %v1437_v45, %v1436_v42  ;;  %1738 = vperm.xlu2 %4177, %v5150_v46   ;;  %v911_v38 = vadd.f32 %v4935_v54, %v894_v19  ;;  %v1537_v46 = vmul.f32 %v5275_v53, %v1420_v32  ;;  %v1135_v42 = vmax.f32 %v1133_v11, %v1134_v44  ;;  %v7009_v19 = vld [vmem:[#allocation5_spill] sm:$0xff] }
 0x141   : > { %v1443_v59 = vsel %vm398_vm0, %v1379_v6, 0.0  ;;  %v1552_v53 = vmul.f32 %v1551_v48, %v1431_v18  ;;  %v1561_v60 = vsel %vm5372_vm11, %v5129_v47, %v1557_v26  ;;  %v1565_v5 = vor.u32 1.1754944e-38, %v1564_v24  ;;  %4060 = vmatmul.msk.bf16.gmra.mxu3 %vm398_vm0, %v7009_v19  ;;  %v7010_v24 = vld [vmem:[#allocation14_spill] sm:$0xff] }
 0x142   : > { %v1439_v55 = vrot.slane %v1438_v31, 2  ;;  %v5356_v27 = vadd.f32 %v1444_v7, %v1443_v59  ;;  %v626_v9 = vpop.f32.mrf.mxu2  ;;  %v1079_v17 = vsel %vm1031_vm5, %v911_v38, -1e+30  ;;  %v1507_v11 = vmul.f32 %v5228_v29, %v1398_v57  ;;  %v4138_v59 = vld [vmem:[%s6958_s4 + $0x30] sm:$0xff] }
 0x143   : > { %v2024_v25 = vrot.slane %v1537_v46, 6  ;;  %v1078_v15 = vsel %vm1030_vm8, %v910_v56, -1e+30  ;;  %v1136_v10 = vrot.slane %v1135_v42, 2  ;;  %4235 = vtanh.f32 %v1079_v17  ;;  %3891 = vmatpush.bf16.msrb.mxu3 %v4138_v59  ;;  %v7016_v59 = vld [vmem:[#allocation9_spill] sm:$0xff] }
 0x144   : > { %v1440_v43 = vadd.f32 %v1439_v55, %v1438_v31  ;;  %1350 = vperm.xlu1 %4176, %v5349_v50   ;;  %v5388_v40 = vpop.f32.mrf.mxu3  ;;  %v5391_v45 = vperm.slane %v4460_v33, 2  ;;  %v2026_v47 = vrot.slane %v1552_v53, 5  ;;  %v1566_v23 = vsel %vm5376_vm14, %v1565_v5, %v1561_v60  ;;  %v7014_v60 = vld [vmem:[#allocation10_spill] sm:$0xff] }
 0x145   : > { %v560_v30 = vpop.f32.mrf.mxu1  ;;  %v2023_v0 = vsel %vm1198_vm10, %v2022_v63, %v1507_v11  ;;  %4237 = vtanh.f32 %v1078_v15  ;;  %v860_v32 = vrot.slane %v626_v9, 2  ;;  %v1569_v31 = vmul.f32 %v5135_v4, %v7010_v24  ;;  %v7012_v9 = vld [vmem:[#allocation2_spill] sm:$0xff]  ;;  %v5427_v63 = vld [vmem:[%s4626_s14 + $0x98] sm:$0xff]  ;;  %v4137_v11 = vld [vmem:[%s6958_s4 + $0x28] sm:$0xff] }
 0x146   : > { %v1441_v39 = vrot.slane %v1440_v43, 1  ;;  %v764_v51 = vrot.slane %v560_v30, 1  ;;  %v492_v41 = vpop.f32.mrf.mxu0  ;;  %v2025_v6 = vsel %vm1163_vm7, %v2024_v25, %v2023_v0  ;;  %v1137_v33 = vmax.f32 %v1135_v42, %v1136_v10  ;;  %v7013_v42 = vld [vmem:[#allocation11_spill] sm:$0xff]  ;;  %v5436_v10 = vld [vmem:[%s4626_s14 + $0x90] sm:$0xff] }
 0x147   : > { %vm7011_vm3 = vcmask 1043459   ;;  %v5418_v48 = vrot.slane %v7013_v42, 7  ;;  %v1383_v5 = vmul.f32 %v5427_v63, %v7014_v60  ;;  %v1570_v30 = vsub.f32 1.0, %v1569_v31  ;;  %v5446_v19 = vpop.permute.xlu2 %1637  ;;  %3892 = vmatpush.bf16.msrb.mxu3 %v4137_v11 }
 0x148   : > { %v1442_v58 = vadd.f32 %v1441_v39, %v1440_v43  ;;  %1356 = vperm.xlu2 %4177, %v5349_v50   ;;  %v765_v29 = vsel %vm727_vm12, %v763_v1, %v764_v51  ;;  %v2027_v52 = vsel %vm7011_vm3, %v2026_v47, %v2025_v6  ;;  %v5421_v43 = vld [vmem:[%s4626_s14 + $0x88] sm:$0xff]  ;;  %v1138_v25 = vrot.slane %v1137_v33, 1 }
 0x149   : > { %v798_v38 = vadd.f32 %v765_v29, %v489_v28  ;;  %v4236_v26 = vpop.eup %4235  ;;  %v5415_v28 = vmax.f32 %v7012_v9, 1.0  ;;  %4239 = vrcp.f32 %v5418_v48  ;;  %vm1032_vm15 = vcmp.gt.f32.partialorder %v7016_v59, 0.5  ;;  %v5462_v9 = vld [vmem:[%s4626_s14 + $0xa0] sm:$0xff] }
 0x14a   : > { %v1567_v2 = vmul.f32 %v1566_v23, %v1442_v58  ;;  %v629_v44 = vpop.f32.mrf.mxu2  ;;  %v1382_v58 = vmul.f32 %v5436_v10, %v1332_v21  ;;  %v1139_v20 = vmax.f32 %v1137_v33, %v1138_v25  ;;  %v1571_v21 = vmul.f32 %v5135_v4, %v1570_v30 }
 0x14b   : > { %v861_v7 = vrot.slane %v629_v44, 2  ;;  %v4238_v1 = vpop.eup %4237  ;;  %v5443_v0 = vrot.slane %v5415_v28, 3  ;;  %vm1574_vm1 = vweird.f32 %v5135_v4  ;;  %vm7019_vm6 = vcmask 1045509  }
 0x14c   : > { %v2028_v18 = vrot.slane %v1567_v2, 4  ;;  %1751 = vperm.xlu1 %4176, %v5391_v45   ;;  %v5424_v62 = vpop.f32.mrf.mxu3  ;;  %v1140_v15 = vmax.f32 %v4238_v1, %v4236_v26  ;;  %v1454_v33 = vsel %vm398_vm0, %v1382_v58, 0.0  ;;  %v1572_v1 = vadd.f32 %v5135_v4, %v1571_v21  ;;  %vm7020_vm9 = vmmov %vm7019_vm6 }
 0x14d   : > { %v862_v57 = vsel %vm824_vm13, %v860_v32, %v861_v7  ;;  %v562_v56 = vpop.f32.mrf.mxu1  ;;  %v1577_v58 = vand.u32 2147483647, %v7010_v24  ;;  %vm1588_vm11 = vweird.f32 %v5418_v48  ;;  %vm1914_vm3 = vweird.f32 %v5443_v0 }
 0x14e   : > { %v5411_v55 = vsel %vm1169_vm2, %v2028_v18, %v2027_v52  ;;  %v1325_v46 = vpop.permute.xlu1 %1324  ;;  %v766_v61 = vrot.slane %v562_v56, 1  ;;  %v494_v17 = vpop.f32.mrf.mxu0  ;;  %v895_v39 = vadd.f32 %v862_v57, %v798_v38  ;;  %v3681_v18 = vpack.c.bf16 %v1139_v20, %v1139_v20  ;;  %v7015_v38 = vld [vmem:[#allocation8_spill] sm:$0xff] }
 0x14f   : > { %v1381_v53 = vmul.f32 %v5421_v43, %v1325_v46  ;;  %v1579_v46 = vand.u32 2147483648, %v7010_v24  ;;  %v4134_v20 = vld [vmem:[%s6958_s4 + $0x10] sm:$0xff]  ;;  %vm1578_vm8 = vcmp.eq.f32.partialorder %v1577_v58, 8.507059e+37 }
 0x150   : > { %1757 = vperm.xlu2 %4177, %v5391_v45   ;;  %v767_v23 = vsel %vm727_vm12, %v764_v51, %v766_v61  ;;  %v912_v6 = vadd.f32 %v4935_v54, %v895_v39  ;;  %v1455_v51 = vsel %vm398_vm0, %v1383_v5, 0.0  ;;  %vm1033_vm12 = vcmp.gt.f32.partialorder %v7015_v38, 0.5  ;;  %v5472_v5 = vpop.eup %4239 }
 0x151   : > { %v1446_v47 = vsel %vm398_vm0, %v1381_v53, 0.0  ;;  %v799_v32 = vadd.f32 %v767_v23, %v492_v41  ;;  %v1141_v41 = vrot.slane %v1140_v15, 4  ;;  %v1456_v61 = vadd.f32 %v1455_v51, %v1454_v33 }
 0x152   : > { %v1447_v29 = vadd.f32 %v1446_v47, %v5356_v27  ;;  %v631_v2 = vpop.f32.mrf.mxu2  ;;  %v4136_v27 = vld [vmem:[%s6958_s4 + $0x20] sm:$0xff]  ;;  %v1080_v17 = vsel %vm1032_vm15, %v912_v6, -1e+30  ;;  %v3830_v25 = vunpack.c.l.b16 %v3681_v18  ;;  %v1580_v21 = vor.u32 1.1754944e-38, %v1579_v46 }
 0x153   : > { %v863_v31 = vrot.slane %v631_v2, 2  ;;  %3893 = vmatpush.bf16.msrb.mxu3 %v4136_v27  ;;  %v1142_v39 = vmax.f32 %v1140_v15, %v1141_v41  ;;  %4241 = vtanh.f32 %v1080_v17  ;;  %v4133_v41 = vld [vmem:[%s6958_s4 + $0x8] sm:$0xff]  ;;  %v4465_v17 = vld [vmem:[%s4626_s14 + $0x18] sm:$0xff]  ;;  %vm1589_vm4 = vweird.f32 %v5472_v5 }
 0x154   : > { %v1448_v44 = vrot.slane %v1447_v29, 4  ;;  %4178 = vset.pattern.permute.xlu1 %v4805_v34  ;;  %v5465_v53 = vpop.f32.mrf.mxu3  ;;  %vm5537_vm14 = vmor %vm1588_vm11, %vm1589_vm4 }
 0x155   : > { %v864_v26 = vsel %vm824_vm13, %v861_v7, %v863_v31  ;;  %v4135_v7 = vld [vmem:[%s6958_s4 + $0x18] sm:$0xff]  ;;  %vm1573_vm13 = vweird.f32 %v7010_v24  ;;  %v1143_v6 = vrot.slane %v1142_v39, 2 }
 0x156   : > { %v1449_v52 = vadd.f32 %v1448_v44, %v1447_v29  ;;  %v1344_v57 = vpop.permute.xlu1 %1343  ;;  %v896_v56 = vadd.f32 %v864_v26, %v799_v32  ;;  %vm5480_vm5 = vmor %vm1573_vm13, %vm1574_vm1  ;;  %vm7025_vm13 = vcmask 1046534  }
 0x157   : > { %v1384_v42 = vmul.f32 %v5462_v9, %v1344_v57  ;;  %v1576_v24 = vsel %vm5480_vm5, %v5135_v4, %v1572_v1  ;;  %3894 = vmatpush.bf16.msrb.mxu3 %v4135_v7  ;;  %v1584_v4 = vmul.f32 %v5472_v5, %v5418_v48  ;;  %v1144_v18 = vmax.f32 %v1142_v39, %v1143_v6  ;;  %v4466_v7 = vld [vmem:[%s4626_s14 + $0x28] sm:$0xff] }
 0x158   : > { %v1450_v60 = vrot.slane %v1449_v52, 2  ;;  %4179 = vset.pattern.permute.xlu2 %v4805_v34  ;;  %v913_v30 = vadd.f32 %v4935_v54, %v896_v56  ;;  %v5488_v54 = vsel %vm7019_vm6, %v3830_v25, %v5336_v3  ;;  %v5498_v3 = vpop.permute.xlu2 %1656  ;;  %v1581_v31 = vsel %vm1578_vm8, %v1580_v21, %v1576_v24  ;;  %vm7027_vm8 = vmmov %vm7025_vm13 }
 0x159   : > { %v1457_v11 = vsel %vm398_vm0, %v1384_v42, 0.0  ;;  %v4242_v33 = vpop.eup %4241  ;;  %v1585_v46 = vsub.f32 1.0, %v1584_v4  ;;  %v4132_v42 = vld [vmem:[%s6958_s4] sm:$0xff]  ;;  %v1768_v1 = vmul.f32 %v4465_v17, %v5446_v19  ;;  %vm7026_vm5 = vcmask 1047559  }
 0x15a   : > { %v1451_v47 = vadd.f32 %v1450_v60, %v1449_v52  ;;  %v1458_v23 = vadd.f32 %v1457_v11, %v1456_v61  ;;  %v1081_v15 = vsel %vm1033_vm12, %v913_v30, -1e+30  ;;  %v1650_v52 = vpop.permute.xlu0 %1649  ;;  %v1145_v61 = vrot.slane %v1144_v18, 1 }
 0x15b   : > { %4243 = vtanh.f32 %v1081_v15  ;;  %3895 = vmatpush.bf16.msrb.mxu3 %v4134_v20  ;;  %v1770_v39 = vmul.f32 %v4466_v7, %v1650_v52  ;;  %v1586_v58 = vmul.f32 %v5472_v5, %v1585_v46  ;;  %v1800_v19 = vsel %vm398_vm0, %v1768_v1, 0.0 }
 0x15c   : > { %v1452_v2 = vrot.slane %v1451_v47, 1  ;;  %v1459_v32 = vrot.slane %v1458_v23, 4  ;;  %1362 = vperm.xlu1 %4178, %v5349_v50   ;;  %4245 = vrcp.f32 %v5443_v0  ;;  %v5502_v27 = vpop.f32.mrf.mxu3  ;;  %v1146_v24 = vmax.f32 %v1144_v18, %v1145_v61 }
 0x15e   : > { %v1453_v44 = vadd.f32 %v1452_v2, %v1451_v47  ;;  %v1460_v51 = vadd.f32 %v1459_v32, %v1458_v23  ;;  %v4467_v47 = vld [vmem:[%s4626_s14 + $0x20] sm:$0xff]  ;;  %v1803_v32 = vsel %vm398_vm0, %v1770_v39, 0.0 }
 0x15f   : > { %3896 = vmatpush.bf16.msrb.mxu3 %v4133_v41  ;;  %v1594_v41 = vand.u32 2147483648, %v5418_v48 }
 0x160   : > { %v1582_v50 = vmul.f32 %v1581_v31, %v1453_v44  ;;  %1763 = vperm.xlu2 %4179, %v5391_v45   ;;  %v1461_v45 = vrot.slane %v1460_v51, 2  ;;  %v5521_v30 = vpop.permute.xlu2 %1624  ;;  %v1587_v44 = vadd.f32 %v5472_v5, %v1586_v58 }
 0x161   : > { %v4244_v38 = vpop.eup %4243 }
 0x162   : > { %v2030_v59 = vrot.slane %v1582_v50, 3  ;;  %v5508_v26 = vpop.eup %4245  ;;  %v1147_v57 = vmax.f32 %v4242_v33, %v4244_v38  ;;  %v1462_v15 = vadd.f32 %v1461_v45, %v1460_v51  ;;  %v3682_v51 = vpack.c.bf16 %v1146_v24, %v1146_v24 }
 0x163   : > { %v1910_v11 = vmul.f32 %v5508_v26, %v5443_v0  ;;  %3897 = vmatpush.bf16.msrb.mxu3 %v4132_v42  ;;  %v1592_v38 = vand.u32 2147483647, %v5418_v48  ;;  %vm1915_vm12 = vweird.f32 %v5508_v26  ;;  %v1920_v48 = vand.u32 2147483648, %v5443_v0 }
 0x164   : > { %v5512_v56 = vsel %vm7020_vm9, %v2030_v59, %v5411_v55  ;;  %4180 = vset.pattern.permute.xlu1 %v4591_v8  ;;  %v1148_v60 = vrot.slane %v1147_v57, 4  ;;  %v5527_v29 = vpop.f32.mrf.mxu3  ;;  %v1463_v4 = vrot.slane %v1462_v15, 1  ;;  %v3831_v1 = vunpack.c.l.b16 %v3682_v51  ;;  %vm5555_vm1 = vmor %vm1914_vm3, %vm1915_vm12 }
 0x165   : > { %v1911_v21 = vsub.f32 1.0, %v1910_v11  ;;  %vm1593_vm15 = vcmp.eq.f32.partialorder %v1592_v38, 8.507059e+37  ;;  %v1921_v24 = vor.u32 1.1754944e-38, %v1920_v48  ;;  %v5577_v51 = vrot.slane %v5415_v28, 4  ;;  %v4468_v38 = vld [vmem:[%s4626_s14 + $0x48] sm:$0xff] }
 0x166   : > { %v1644_v55 = vpop.permute.xlu1 %1643  ;;  %v1149_v25 = vmax.f32 %v1147_v57, %v1148_v60  ;;  %v1591_v57 = vsel %vm5537_vm14, %v5472_v5, %v1587_v44  ;;  %v1464_v42 = vadd.f32 %v1463_v4, %v1462_v15  ;;  %v1595_v60 = vor.u32 1.1754944e-38, %v1594_v41 }
 0x167   : > { %v1769_v23 = vmul.f32 %v4467_v47, %v1644_v55  ;;  %v1912_v59 = vmul.f32 %v5508_v26, %v1911_v21  ;;  %v1918_v5 = vand.u32 2147483647, %v5443_v0  ;;  %v3838_v15 = vsel %vm7025_vm13, %v3831_v1, %v5488_v54 }
 0x168   : > { %4181 = vset.pattern.permute.xlu2 %v4605_v14  ;;  %v1150_v20 = vrot.slane %v1149_v25, 2  ;;  %v1682_v17 = vpop.permute.xlu2 %1681  ;;  %v1596_v11 = vsel %vm1593_vm15, %v1595_v60, %v1591_v57  ;;  %4247 = vrcp.f32 %v5577_v51  ;;  %v5591_v1 = vrot.slane %v5415_v28, 2 }
 0x169   : > { %v1801_v2 = vsel %vm398_vm0, %v1769_v23, 0.0  ;;  %v1913_v39 = vadd.f32 %v5508_v26, %v1912_v59  ;;  %v1597_v47 = vmul.f32 %v1596_v11, %v1464_v42  ;;  %vm1919_vm6 = vcmp.eq.f32.partialorder %v1918_v5, 8.507059e+37  ;;  %v7028_v11 = vld [vmem:[#allocation12_spill] sm:$0xff] }
 0x16a   : > { %v1802_v6 = vadd.f32 %v1801_v2, %v1800_v19  ;;  %v1151_v31 = vmax.f32 %v1149_v25, %v1150_v20  ;;  %vm1929_vm9 = vweird.f32 %v5577_v51  ;;  %vm1899_vm15 = vweird.f32 %v5591_v1 }
 0x16b   : > { %v1917_v2 = vsel %vm5555_vm1, %v5508_v26, %v1913_v39  ;;  %v2032_v44 = vrot.slane %v1597_v47, 2 }
 0x16c   : > { %v1804_v50 = vadd.f32 %v1803_v32, %v1802_v6  ;;  %v1152_v33 = vrot.slane %v1151_v31, 1  ;;  %v5547_v45 = vpop.f32.mrf.mxu3  ;;  %v4130_v6 = vld [vmem:[%s6957_s3] sm:$0xff] }
 0x16d   : > { %2087 = vmatpush.bf16.msrb.mxu0 %v4130_v6 }
 0x16e   : > { %v1805_v52 = vrot.slane %v1804_v50, 4  ;;  %v1153_v46 = vmax.f32 %v1151_v31, %v1152_v33  ;;  %v1922_v31 = vsel %vm1919_vm6, %v1921_v24, %v1917_v2  ;;  %v5580_v33 = vrot.slane %v5415_v28, 5  ;;  %v5597_v39 = vpop.eup %4247 }
 0x16f   : > { %v1925_v24 = vmul.f32 %v5597_v39, %v5577_v51  ;;  %vm1930_vm4 = vweird.f32 %v5597_v39 }
 0x170   : > { %v1806_v61 = vadd.f32 %v1805_v52, %v1804_v50  ;;  %v3683_v7 = vpack.c.bf16 %v1153_v46, %v1153_v46  ;;  %v5574_v50 = vsel %vm7027_vm8, %v2032_v44, %v5512_v56  ;;  %4249 = vrcp.f32 %v5580_v33  ;;  %v4469_v56 = vld [vmem:[%s4626_s14 + $0x50] sm:$0xff]  ;;  %v4470_v46 = vld [vmem:[%s4626_s14 + $0x58] sm:$0xff]  ;;  %vm5659_vm11 = vmor %vm1929_vm9, %vm1930_vm4 }
 0x171   : > { %v1775_v57 = vmul.f32 %v4469_v56, %v1682_v17  ;;  %v4471_v17 = vld [vmem:[%s4626_s14 + $0x38] sm:$0xff]  ;;  %4251 = vrcp.f32 %v5591_v1  ;;  %vm1944_vm14 = vweird.f32 %v5580_v33  ;;  %vm7036_vm9 = vcmask 1043459  }
 0x172   : > { %v1807_v55 = vrot.slane %v1806_v61, 2  ;;  %v3832_v58 = vunpack.c.l.b16 %v3683_v7  ;;  %v1695_v26 = vpop.permute.xlu2 %1694  ;;  %v1772_v25 = vmul.f32 %v4471_v17, %v7028_v11  ;;  %v7029_v44 = vld [vmem:[#allocation13_spill] sm:$0xff] }
 0x173   : > { %v1823_v60 = vsel %vm398_vm0, %v1775_v57, 0.0  ;;  %v1777_v56 = vmul.f32 %v5308_v35, %v1695_v26 }
 0x174   : > { %v1808_v23 = vadd.f32 %v1807_v55, %v1806_v61  ;;  %v3839_v19 = vsel %vm7026_vm5, %v3832_v58, %v3838_v15  ;;  %v5568_v21 = vpop.f32.mrf.mxu3  ;;  %v4472_v58 = vld [vmem:[%s4626_s14 + $0x30] sm:$0xff] }
 0x175   : > { %v3840_v20 = vpack.c.b16 %v3839_v19, %v3839_v19  ;;  %v1771_v47 = vmul.f32 %v4472_v58, %v5498_v3  ;;  %v1812_v19 = vsel %vm398_vm0, %v1772_v25, 0.0  ;;  %v5613_v3 = vrot.slane %v5415_v28, 6 }
 0x176   : > { %v1809_v32 = vrot.slane %v1808_v23, 1  ;;  %v1619_v0 = vpop.permute.xlu1 %1618  ;;  %v5599_v55 = vpop.eup %4249  ;;  %v5629_v25 = vrot.slane %v5415_v28, 7 }
 0x177   : > { %3898 = vmatmul.bf16.vlgmr.msrb.gmra.mxu3 %v3840_v20  ;;  %v1940_v15 = vmul.f32 %v5599_v55, %v5580_v33  ;;  %v1811_v2 = vsel %vm398_vm0, %v1771_v47, 0.0  ;;  %4253 = vrcp.f32 %v5613_v3  ;;  %vm1945_vm3 = vweird.f32 %v5599_v55 }
 0x178   : > { %v1810_v54 = vadd.f32 %v1809_v32, %v1808_v23  ;;  %v1707_v32 = vpop.permute.xlu0 %1706  ;;  %4255 = vrcp.f32 %v5629_v25  ;;  %vm5676_vm13 = vmor %vm1944_vm14, %vm1945_vm3  ;;  %vm1959_vm4 = vweird.f32 %v5613_v3  ;;  %vm1974_vm3 = vweird.f32 %v5629_v25 }
 0x179   : > { %v1941_v57 = vsub.f32 1.0, %v1940_v15 }
 0x17a   : > { %v5570_v4 = vmul.f32 %v1922_v31, %v1810_v54  ;;  %v1778_v54 = vmul.f32 %v5278_v13, %v7029_v44  ;;  %v4473_v31 = vld [vmem:[%s4626_s14 + $0x40] sm:$0xff]  ;;  %v4476_v44 = vld [vmem:[%s4626_s14 + $0x10] sm:$0xff] }
 0x17b   : > { %v1942_v15 = vmul.f32 %v5599_v55, %v1941_v57 }
 0x17c   : > { %v5582_v18 = vpop.f32.mrf.mxu3  ;;  %v1834_v26 = vsel %vm398_vm0, %v1778_v54, 0.0 }
 0x17e   : > { %v1676_v41 = vpop.permute.xlu1 %1675 }
 0x17f   : > { %v1774_v59 = vmul.f32 %v4468_v38, %v1676_v41 }
 0x181   : > { %v1822_v61 = vsel %vm398_vm0, %v1774_v59, 0.0  ;;  %v5620_v59 = vpop.eup %4251 }
 0x182   : > { %v1688_v52 = vpop.permute.xlu2 %1687  ;;  %v1824_v5 = vadd.f32 %v1823_v60, %v1822_v61  ;;  %v1779_v60 = vmul.f32 %v5300_v37, %v1707_v32  ;;  %v1895_v35 = vmul.f32 %v5620_v59, %v5591_v1  ;;  %vm1900_vm1 = vweird.f32 %v5620_v59 }
 0x183   : > { %v1776_v42 = vmul.f32 %v4470_v46, %v1688_v52  ;;  %v1813_v52 = vadd.f32 %v1812_v19, %v1811_v2  ;;  %v1926_v46 = vsub.f32 1.0, %v1925_v24  ;;  %vm5691_vm5 = vmor %vm1899_vm15, %vm1900_vm1 }
 0x184   : > { %v5595_v7 = vpop.f32.mrf.mxu3  ;;  %v1836_v28 = vsel %vm398_vm0, %v1779_v60, 0.0 }
 0x185   : > { %v1825_v48 = vsel %vm398_vm0, %v1776_v42, 0.0  ;;  %v4474_v42 = vld [vmem:[%s4626_s14 + $0x8] sm:$0xff]  ;;  %v1927_v37 = vmul.f32 %v5597_v39, %v1926_v46  ;;  %v5651_v46 = vpop.eup %4253 }
 0x186   : > { %v1826_v23 = vadd.f32 %v1825_v48, %v1824_v5  ;;  %v1766_v61 = vmul.f32 %v4474_v42, %v5521_v30  ;;  %v4475_v48 = vld [vmem:[%s4626_s14] sm:$0xff]  ;;  %v1833_v30 = vsel %vm398_vm0, %v1777_v56, 0.0  ;;  %v1933_v56 = vand.u32 2147483647, %v5577_v51 }
 0x187   : > { %v1765_v5 = vmul.f32 %v4475_v48, %v1619_v0  ;;  %v1835_v32 = vadd.f32 %v1834_v26, %v1833_v30  ;;  %v1943_v42 = vadd.f32 %v5599_v55, %v1942_v15 }
 0x188   : > { %v1827_v20 = vrot.slane %v1826_v23, 4  ;;  %v1790_v47 = vsel %vm398_vm0, %v1766_v61, 0.0  ;;  %vm1934_vm12 = vcmp.eq.f32.partialorder %v1933_v56, 8.507059e+37 }
 0x189   : > { %v1947_v56 = vsel %vm5676_vm13, %v5599_v55, %v1943_v42 }
 0x18a   : > { %v1828_v17 = vadd.f32 %v1827_v20, %v1826_v23  ;;  %v1789_v23 = vsel %vm398_vm0, %v1765_v5, 0.0  ;;  %v1935_v20 = vand.u32 2147483648, %v5577_v51 }
 0x18c   : > { %v5618_v38 = vpop.f32.mrf.mxu3  ;;  %v1829_v24 = vrot.slane %v1828_v17, 2 }
 0x18e   : > { %v1669_v6 = vpop.permute.xlu1 %1668  ;;  %v1830_v48 = vadd.f32 %v1829_v24, %v1828_v17  ;;  %v1950_v17 = vand.u32 2147483648, %v5580_v33  ;;  %v1726_v42 = vpop.permute.xlu0 %1725 }
 0x18f   : > { %v1773_v41 = vmul.f32 %v4473_v31, %v1669_v6  ;;  %v1896_v6 = vsub.f32 1.0, %v1895_v35  ;;  %v1936_v35 = vor.u32 1.1754944e-38, %v1935_v20 }
 0x191   : > { %v1814_v13 = vsel %vm398_vm0, %v1773_v41, 0.0  ;;  %v1791_v41 = vadd.f32 %v1790_v47, %v1789_v23  ;;  %v1897_v26 = vmul.f32 %v5620_v59, %v1896_v6  ;;  %v1831_v47 = vrot.slane %v1830_v48, 1 }
 0x192   : > { %v1815_v11 = vadd.f32 %v1814_v13, %v1813_v52  ;;  %v5637_v58 = vpop.permute.xlu2 %1719  ;;  %v1928_v52 = vadd.f32 %v5597_v39, %v1927_v37  ;;  %v1903_v6 = vand.u32 2147483647, %v5591_v1 }
 0x193   : > { %v1898_v20 = vadd.f32 %v5620_v59, %v1897_v26  ;;  %v1832_v61 = vadd.f32 %v1831_v47, %v1830_v48 }
 0x194   : > { %v1816_v0 = vrot.slane %v1815_v11, 4  ;;  %v5647_v31 = vpop.f32.mrf.mxu3  ;;  %v1932_v51 = vsel %vm5659_vm11, %v5597_v39, %v1928_v52  ;;  %v1905_v39 = vand.u32 2147483648, %v5591_v1  ;;  %v1955_v52 = vmul.f32 %v5651_v46, %v5613_v3 }
 0x195   : > { %v1781_v1 = vmul.f32 %v5330_v16, %v5637_v58  ;;  %vm1904_vm8 = vcmp.eq.f32.partialorder %v1903_v6, 8.507059e+37  ;;  %vm1960_vm11 = vweird.f32 %v5651_v46 }
 0x196   : > { %v1817_v19 = vadd.f32 %v1816_v0, %v1815_v11  ;;  %v1631_v2 = vpop.permute.xlu1 %1630  ;;  %v1837_v11 = vadd.f32 %v1836_v28, %v1835_v32  ;;  %v1948_v0 = vand.u32 2147483647, %v5580_v33  ;;  %v1937_v32 = vsel %vm1934_vm12, %v1936_v35, %v1932_v51  ;;  %vm5728_vm14 = vmor %vm1959_vm4, %vm1960_vm11 }
 0x197   : > { %v1767_v54 = vmul.f32 %v4476_v44, %v1631_v2  ;;  %v1902_v35 = vsel %vm5691_vm5, %v5620_v59, %v1898_v20  ;;  %v2045_v59 = vrot.slane %v5570_v4, 7  ;;  %vm7043_vm5 = vcmask 1045509  }
 0x198   : > { %v1818_v57 = vrot.slane %v1817_v19, 2  ;;  %v1838_v2 = vrot.slane %v1837_v11, 4  ;;  %vm1949_vm6 = vcmp.eq.f32.partialorder %v1948_v0, 8.507059e+37 }
 0x199   : > { %v1792_v60 = vsel %vm398_vm0, %v1767_v54, 0.0 }
 0x19a   : > { %v1819_v5 = vadd.f32 %v1818_v57, %v1817_v19  ;;  %v1793_v13 = vadd.f32 %v1792_v60, %v1791_v41  ;;  %v5681_v24 = vpop.permute.xlu2 %1738  ;;  %v5683_v19 = vpop.eup %4255  ;;  %v1951_v57 = vor.u32 1.1754944e-38, %v1950_v17  ;;  %v1906_v60 = vor.u32 1.1754944e-38, %v1905_v39 }
 0x19b   : > { %v1845_v17 = vsel %vm398_vm0, %v1781_v1, 0.0  ;;  %v1970_v39 = vmul.f32 %v5683_v19, %v5629_v25  ;;  %vm1975_vm12 = vweird.f32 %v5683_v19 }
 0x19c   : > { %v1820_v30 = vrot.slane %v1819_v5, 1  ;;  %v1794_v37 = vrot.slane %v1793_v13, 4  ;;  %v5687_v44 = vpop.f32.mrf.mxu3  ;;  %v1952_v51 = vsel %vm1949_vm6, %v1951_v57, %v1947_v56  ;;  %v1907_v28 = vsel %vm1904_vm8, %v1906_v60, %v1902_v35  ;;  %vm5742_vm1 = vmor %vm1974_vm3, %vm1975_vm12 }
 0x19e   : > { %v1821_v23 = vadd.f32 %v1820_v30, %v1819_v5  ;;  %v1795_v15 = vadd.f32 %v1794_v37, %v1793_v13  ;;  %v1839_v13 = vadd.f32 %v1838_v2, %v1837_v11  ;;  %v1956_v30 = vsub.f32 1.0, %v1955_v52 }
 0x19f   : > { %v1953_v37 = vmul.f32 %v1952_v51, %v1832_v61  ;;  %v1782_v11 = vmul.f32 %v5421_v43, %v1726_v42  ;;  %v1971_v52 = vsub.f32 1.0, %v1970_v39  ;;  %v1980_v42 = vand.u32 2147483648, %v5629_v25 }
 0x1a0   : > { %v1938_v33 = vmul.f32 %v1937_v32, %v1821_v23  ;;  %v1796_v41 = vrot.slane %v1795_v15, 2  ;;  %v1840_v0 = vrot.slane %v1839_v13, 2  ;;  %v1957_v43 = vmul.f32 %v5651_v46, %v1956_v30 }
 0x1a1   : > { %v2049_v32 = vrot.slane %v1953_v37, 5  ;;  %v1847_v4 = vsel %vm398_vm0, %v1782_v11, 0.0 }
 0x1a2   : > { %v1797_v5 = vadd.f32 %v1796_v41, %v1795_v15  ;;  %v5711_v23 = vpop.permute.xlu2 %1356  ;;  %v2047_v15 = vrot.slane %v1938_v33, 6  ;;  %v1965_v33 = vand.u32 2147483648, %v5613_v3  ;;  %v1958_v60 = vadd.f32 %v5651_v46, %v1957_v43 }
 0x1a4   : > { %v1798_v26 = vrot.slane %v1797_v5, 1  ;;  %v5708_v58 = vpop.f32.mrf.mxu3  ;;  %v1966_v30 = vor.u32 1.1754944e-38, %v1965_v33 }
 0x1a6   : > { %v1799_v55 = vadd.f32 %v1798_v26, %v1797_v5  ;;  %v1714_v48 = vpop.permute.xlu1 %1713  ;;  %v1963_v5 = vand.u32 2147483647, %v5613_v3  ;;  %v1972_v26 = vmul.f32 %v5683_v19, %v1971_v52  ;;  %v1962_v3 = vsel %vm5728_vm14, %v5651_v46, %v1958_v60  ;;  %v4477_v60 = vld [vmem:[%s4626_s14 + $0xb0] sm:$0xff] }
 0x1a7   : > { %v1780_v16 = vmul.f32 %v5341_v22, %v1714_v48  ;;  %v1841_v22 = vadd.f32 %v1840_v0, %v1839_v13  ;;  %v1978_v0 = vand.u32 2147483647, %v5629_v25  ;;  %v1981_v25 = vor.u32 1.1754944e-38, %v1980_v42 }
 0x1a8   : > { %v1908_v47 = vmul.f32 %v1907_v28, %v1799_v55  ;;  %vm1964_vm15 = vcmp.eq.f32.partialorder %v1963_v5, 8.507059e+37  ;;  %v1973_v48 = vadd.f32 %v5683_v19, %v1972_v26 }
 0x1a9   : > { %v1844_v2 = vsel %vm398_vm0, %v1780_v16, 0.0  ;;  %v1842_v13 = vrot.slane %v1841_v22, 1  ;;  %vm1979_vm13 = vcmp.eq.f32.partialorder %v1978_v0, 8.507059e+37 }
 0x1aa   : > { %v2046_v20 = vsel %vm1198_vm10, %v2045_v59, %v1908_v47  ;;  %v1846_v6 = vadd.f32 %v1845_v17, %v1844_v2  ;;  %v1758_v28 = vpop.permute.xlu2 %1757  ;;  %v1967_v59 = vsel %vm1964_vm15, %v1966_v30, %v1962_v3  ;;  %v1784_v47 = vmul.f32 %v5427_v63, %v5681_v24 }
 0x1ab   : > { %v2048_v54 = vsel %vm1163_vm7, %v2047_v15, %v2046_v20  ;;  %v1843_v55 = vadd.f32 %v1842_v13, %v1841_v22  ;;  %v7041_v15 = vld [vmem:[#allocation7_spill] sm:$0xff]  ;;  %v1745_v20 = vpop.permute.xlu0 %1744  ;;  %v1787_v5 = vmul.f32 %v4477_v60, %v1758_v28  ;;  %v4478_v13 = vld [vmem:[%s4626_s14 + $0xb8] sm:$0xff] }
 0x1ac   : > { %v2050_v41 = vsel %vm7036_vm9, %v2049_v32, %v2048_v54  ;;  %v1848_v56 = vadd.f32 %v1847_v4, %v1846_v6  ;;  %v5726_v1 = vpop.f32.mrf.mxu3  ;;  %v5749_v2 = vmax.f32 %v7041_v15, 1.0  ;;  %v1856_v24 = vsel %vm398_vm0, %v1784_v47, 0.0 }
 0x1ad   : > { %v1968_v32 = vmul.f32 %v1967_v59, %v1843_v55  ;;  %v1785_v22 = vmul.f32 %v5462_v9, %v1745_v20  ;;  %v1867_v28 = vsel %vm398_vm0, %v1787_v5, 0.0 }
 0x1ae   : > { %v1849_v57 = vrot.slane %v1848_v56, 4  ;;  %v1733_v61 = vpop.permute.xlu1 %1732  ;;  %v5760_v4 = vrot.slane %v5749_v2, 1  ;;  %4257 = vrcp.f32 %v5749_v2  ;;  %vm1989_vm6 = vweird.f32 %v5749_v2 }
 0x1af   : > { %v1783_v11 = vmul.f32 %v5436_v10, %v1733_v61  ;;  %v1977_v10 = vsel %vm5742_vm1, %v5683_v19, %v1973_v48  ;;  %v2051_v52 = vrot.slane %v1968_v32, 4  ;;  %v1858_v9 = vsel %vm398_vm0, %v1785_v22, 0.0 }
 0x1b0   : > { %v1850_v51 = vadd.f32 %v1849_v57, %v1848_v56  ;;  %v1982_v56 = vsel %vm1979_vm13, %v1981_v25, %v1977_v10  ;;  %v7042_v57 = vld [vmem:[#allocation6_spill] sm:$0xff]  ;;  %4259 = vrcp.f32 %v5760_v4  ;;  %vm2004_vm9 = vweird.f32 %v5760_v4 }
 0x1b1   : > { %v1855_v63 = vsel %vm398_vm0, %v1783_v11, 0.0  ;;  %v5763_v61 = vmax.f32 %v7042_v57, 1.0  ;;  %v2052_v26 = vsel %vm1169_vm2, %v2051_v52, %v2050_v41 }
 0x1b2   : > { %v1851_v37 = vrot.slane %v1850_v51, 2  ;;  %v1857_v33 = vadd.f32 %v1856_v24, %v1855_v63 }
 0x1b3   : > { %4261 = vrcp.f32 %v5763_v61  ;;  %vm1603_vm14 = vweird.f32 %v5763_v61 }
 0x1b4   : > { %v1852_v17 = vadd.f32 %v1851_v37, %v1850_v51  ;;  %v5751_v6 = vpop.f32.mrf.mxu3  ;;  %v1859_v30 = vadd.f32 %v1858_v9, %v1857_v33  ;;  %v4479_v37 = vld [vmem:[%s4626_s14 + $0xa8] sm:$0xff]  ;;  %v5778_v11 = vpop.eup %4257 }
 0x1b5   : > { %v1985_v32 = vmul.f32 %v5778_v11, %v5749_v2  ;;  %vm1990_vm8 = vweird.f32 %v5778_v11 }
 0x1b6   : > { %v1853_v46 = vrot.slane %v1852_v17, 1  ;;  %v1351_v39 = vpop.permute.xlu1 %1350  ;;  %v5783_v47 = vpop.eup %4259  ;;  %vm5812_vm11 = vmor %vm1989_vm6, %vm1990_vm8  ;;  %vm7048_vm6 = vcmask 1046534   ;;  %vm7049_vm8 = vcmask 1047559  }
 0x1b7   : > { %v2000_v25 = vmul.f32 %v5783_v47, %v5760_v4  ;;  %v1385_v63 = vmul.f32 %v4479_v37, %v1351_v39  ;;  %v1986_v22 = vsub.f32 1.0, %v1985_v32  ;;  %vm2005_vm4 = vweird.f32 %v5783_v47 }
 0x1b8   : > { %v1854_v43 = vadd.f32 %v1853_v46, %v1852_v17  ;;  %v1860_v17 = vrot.slane %v1859_v30, 4  ;;  %vm5825_vm3 = vmor %vm2004_vm9, %vm2005_vm4  ;;  %vm2562_vm4 = vcmask 130112  }
 0x1b9   : > { %v5785_v46 = vpop.eup %4261  ;;  %vm7050_vm9 = vmmov %vm7049_vm8 }
 0x1ba   : > { %v1764_v54 = vpop.permute.xlu2 %1763  ;;  %v1983_v19 = vmul.f32 %v1982_v56, %v1854_v43  ;;  %v1861_v20 = vadd.f32 %v1860_v17, %v1859_v30  ;;  %v1599_v43 = vmul.f32 %v5785_v46, %v5763_v61  ;;  %v2001_v56 = vsub.f32 1.0, %v2000_v25 }
 0x1bb   : > { %v1788_v35 = vmul.f32 %v4478_v13, %v1764_v54  ;;  %v1386_v54 = vmul.f32 %v4477_v60, %v5711_v23  ;;  %v1995_v60 = vand.u32 2147483648, %v5749_v2  ;;  %v1607_v25 = vand.u32 2147483647, %v5763_v61 }
 0x1bc   : > { %v5772_v55 = vpop.f32.mrf.mxu3  ;;  %v2053_v42 = vrot.slane %v1983_v19, 3  ;;  %v1862_v52 = vrot.slane %v1861_v20, 2  ;;  %v1600_v57 = vsub.f32 1.0, %v1599_v43  ;;  %v1465_v19 = vsel %vm398_vm0, %v1385_v63, 0.0 }
 0x1bd   : > { %v1869_v41 = vsel %vm398_vm0, %v1788_v35, 0.0  ;;  %v1987_v35 = vmul.f32 %v5778_v11, %v1986_v22  ;;  %v2002_v39 = vmul.f32 %v5783_v47, %v2001_v56  ;;  %vm1604_vm12 = vweird.f32 %v5785_v46 }
 0x1be   : > { %v1752_v51 = vpop.permute.xlu1 %1751  ;;  %v5781_v59 = vsel %vm7043_vm5, %v2053_v42, %v2052_v26  ;;  %v1466_v26 = vsel %vm398_vm0, %v1386_v54, 0.0  ;;  %v1863_v9 = vadd.f32 %v1862_v52, %v1861_v20  ;;  %v1996_v63 = vor.u32 1.1754944e-38, %v1995_v60  ;;  %vm1605_vm13 = vmor %vm1603_vm14, %vm1604_vm12 }
 0x1bf   : > { %v1786_v3 = vmul.f32 %v4479_v37, %v1752_v51  ;;  %v1467_v30 = vadd.f32 %v1466_v26, %v1465_v19  ;;  %vm1608_vm5 = vcmp.eq.f32.partialorder %v1607_v25, 8.507059e+37 }
 0x1c1   : > { %v1866_v48 = vsel %vm398_vm0, %v1786_v3, 0.0  ;;  %v1601_v3 = vmul.f32 %v5785_v46, %v1600_v57 }
 0x1c2   : > { %v1868_v0 = vadd.f32 %v1867_v28, %v1866_v48  ;;  %v1993_v28 = vand.u32 2147483647, %v5749_v2  ;;  %v1864_v48 = vrot.slane %v1863_v9, 1  ;;  %v1609_v2 = vand.u32 2147483648, %v5763_v61 }
 0x1c3   : > { %v1602_v43 = vadd.f32 %v5785_v46, %v1601_v3 }
 0x1c4   : > { %v1870_v16 = vadd.f32 %v1869_v41, %v1868_v0  ;;  %v5793_v24 = vpop.f32.mrf.mxu3  ;;  %v2010_v41 = vand.u32 2147483648, %v5760_v4  ;;  %vm1994_vm15 = vcmp.eq.f32.partialorder %v1993_v28, 8.507059e+37  ;;  %v1865_v52 = vadd.f32 %v1864_v48, %v1863_v9 }
 0x1c6   : > { %v1871_v15 = vrot.slane %v1870_v16, 4  ;;  %v2011_v56 = vor.u32 1.1754944e-38, %v2010_v41 }
 0x1c8   : > { %v1872_v10 = vadd.f32 %v1871_v15, %v1870_v16  ;;  %v2003_v16 = vadd.f32 %v5783_v47, %v2002_v39  ;;  %v2008_v15 = vand.u32 2147483647, %v5760_v4 }
 0x1ca   : > { %v1873_v33 = vrot.slane %v1872_v10, 2  ;;  %v2007_v4 = vsel %vm5825_vm3, %v5783_v47, %v2003_v16  ;;  %vm2009_vm1 = vcmp.eq.f32.partialorder %v2008_v15, 8.507059e+37 }
 0x1cc   : > { %v1874_v37 = vadd.f32 %v1873_v33, %v1872_v10  ;;  %v5810_v0 = vpop.f32.mrf.mxu3 }
 0x1ce   : > { %v1363_v5 = vpop.permute.xlu1 %1362  ;;  %v1875_v32 = vrot.slane %v1874_v37, 1 }
 0x1cf   : > { %v1387_v51 = vmul.f32 %v4478_v13, %v1363_v5  ;;  %v1988_v13 = vadd.f32 %v5778_v11, %v1987_v35  ;;  %v1610_v35 = vor.u32 1.1754944e-38, %v1609_v2 }
 0x1d0   : > { %v1876_v33 = vadd.f32 %v1875_v32, %v1874_v37 }
 0x1d1   : > { %v1468_v23 = vsel %vm398_vm0, %v1387_v51, 0.0  ;;  %v1992_v54 = vsel %vm5812_vm11, %v5778_v11, %v1988_v13  ;;  %v2012_v51 = vsel %vm2009_vm1, %v2011_v56, %v2007_v4  ;;  %v1606_v11 = vsel %vm1605_vm13, %v5785_v46, %v1602_v43 }
 0x1d2   : > { %v1469_v42 = vadd.f32 %v1468_v23, %v1467_v30  ;;  %v1997_v19 = vsel %vm1994_vm15, %v1996_v63, %v1992_v54  ;;  %v2013_v30 = vmul.f32 %v2012_v51, %v1876_v33  ;;  %v1611_v23 = vsel %vm1608_vm5, %v1610_v35, %v1606_v11 }
 0x1d3   : > { %v1998_v26 = vmul.f32 %v1997_v19, %v1865_v52  ;;  %vm2566_vm11 = vcmask 195712   ;;  %vm7052_vm13 = vcmask 1043459  }
 0x1d4   : > { %v1470_v20 = vrot.slane %v1469_v42, 4  ;;  %v5840_v39 = vpop.f32.mrf.mxu3  ;;  %v2057_v37 = vrot.slane %v2013_v30, 1 }
 0x1d5   : > { %v2055_v47 = vrot.slane %v1998_v26, 2 }
 0x1d6   : > { %v1471_v22 = vadd.f32 %v1470_v20, %v1469_v42 }
 0x1d7   : > { %v2056_v61 = vsel %vm7048_vm6, %v2055_v47, %v5781_v59  ;;  %v5859_v59 = vld [vmem:[%s6960_s6] sm:$0xff] }
 0x1d8   : > { %v1472_v57 = vrot.slane %v1471_v22, 2  ;;  %v2058_v28 = vsel %vm7050_vm9, %v2057_v37, %v2056_v61  ;;  %v5880_v51 = vperm.slane %v5859_v59, 2  ;;  %vm7053_vm9 = vcmask 1045509  }
 0x1da   : > { %v1473_v5 = vadd.f32 %v1472_v57, %v1471_v22 }
 0x1dc   : > { %v1474_v9 = vrot.slane %v1473_v5, 1  ;;  %v5848_v46 = vpop.f32.mrf.mxu3 }
 0x1de   : > { %v1475_v3 = vadd.f32 %v1474_v9, %v1473_v5 }
 0x1e0   : > { %v1612_v60 = vmul.f32 %v1611_v23, %v1475_v3 }
 0x1e2   : > { %v2034_v42 = vrot.slane %v1612_v60, 1 }
 0x1e4   : > { %v2035_v13 = vsel %vm7049_vm8, %v2034_v42, %v5574_v50  ;;  %v5850_v41 = vpop.f32.mrf.mxu3  ;;  %v5862_v50 = vperm.slane %v5859_v59, 1 }
 0x1e5   : > { %v2060_v48 = vpack.c.bf16 %v2058_v28, %v2035_v13 }
 0x1e7   : > { %4069 = vmatmul.msk.bf16.vlgmr.msrb.gmra.mxu0 %vm398_vm0, %v2060_v48 }
 0x1fa   : > { %v5852_v17 = vpop.f32.mrf.mxu3 }
 0x202   : > { %v3901_v16 = vpop.f32.mrf.mxu3 }
 0x264   : > { %v5854_v15 = vpop.f32.mrf.mxu0 }
 0x265   : > { %v2110_v32 = vperm.slane %v5854_v15, 0  ;;  %v2096_v20 = vrot.slane %v5854_v15, 1  ;;  %v2097_v25 = vrot.slane %v5854_v15, 2  ;;  %v2098_v4 = vrot.slane %v5854_v15, 3 }
 0x266   : > { %v2099_v47 = vrot.slane %v5854_v15, 4 }
 0x267   : > { %v2144_v2 = vadd.f32 %v2110_v32, %v5344_v36  ;;  %v2143_v10 = vadd.f32 %v2110_v32, %v5311_v49  ;;  %v2142_v43 = vadd.f32 %v2110_v32, %v5237_v12  ;;  %v2111_v63 = vperm.slane %v2096_v20, 0 }
 0x268   : > { %v2112_v22 = vperm.slane %v2097_v25, 0  ;;  %v2113_v26 = vperm.slane %v2098_v4, 0  ;;  %v2114_v20 = vperm.slane %v2099_v47, 0 }
 0x269   : > { %v2193_v54 = vadd.f32 %v5862_v50, %v2144_v2  ;;  %v2192_v52 = vadd.f32 %v5862_v50, %v2143_v10  ;;  %v2147_v56 = vadd.f32 %v2111_v63, %v5465_v53  ;;  %v2191_v33 = vadd.f32 %v5862_v50, %v2142_v43 }
 0x26a   : > { %v2146_v57 = vadd.f32 %v2111_v63, %v5424_v62  ;;  %v2145_v19 = vadd.f32 %v2111_v63, %v5388_v40  ;;  %v2150_v35 = vadd.f32 %v2112_v22, %v5547_v45  ;;  %v2149_v11 = vadd.f32 %v2112_v22, %v5527_v29 }
 0x26b   : > { %4263 = vtanh.f32 %v2193_v54  ;;  %v2196_v5 = vadd.f32 %v5862_v50, %v2147_v56  ;;  %v2148_v3 = vadd.f32 %v2112_v22, %v5502_v27  ;;  %v2153_v60 = vadd.f32 %v2113_v26, %v5595_v7 }
 0x26c   : > { %4265 = vtanh.f32 %v2192_v52  ;;  %v2195_v30 = vadd.f32 %v5862_v50, %v2146_v57  ;;  %v2194_v9 = vadd.f32 %v5862_v50, %v2145_v19  ;;  %v2199_v37 = vadd.f32 %v5862_v50, %v2150_v35  ;;  %v5891_v28 = vpop.f32.mrf.mxu0 }
 0x26d   : > { %4267 = vtanh.f32 %v2191_v33  ;;  %v2152_v13 = vadd.f32 %v2113_v26, %v5582_v18  ;;  %v2198_v16 = vadd.f32 %v5862_v50, %v2149_v11  ;;  %v2151_v32 = vadd.f32 %v2113_v26, %v5568_v21 }
 0x26e   : > { %4269 = vtanh.f32 %v2196_v5  ;;  %v2197_v2 = vadd.f32 %v5862_v50, %v2148_v3  ;;  %v2202_v43 = vadd.f32 %v5862_v50, %v2153_v60  ;;  %v2156_v63 = vadd.f32 %v2114_v20, %v5687_v44 }
 0x26f   : > { %4271 = vtanh.f32 %v2195_v30  ;;  %v2103_v22 = vrot.slane %v5891_v28, 1  ;;  %v2201_v54 = vadd.f32 %v5862_v50, %v2152_v13  ;;  %v2155_v52 = vadd.f32 %v2114_v20, %v5647_v31 }
 0x270   : > { %4273 = vtanh.f32 %v2194_v9  ;;  %v2100_v56 = vrot.slane %v5854_v15, 5  ;;  %v2104_v33 = vrot.slane %v5891_v28, 2  ;;  %v2105_v57 = vrot.slane %v5891_v28, 3 }
 0x271   : > { %v4264_v23 = vpop.eup %4263  ;;  %4275 = vtanh.f32 %v2199_v37  ;;  %v2200_v19 = vadd.f32 %v5862_v50, %v2151_v32  ;;  %v2106_v35 = vrot.slane %v5891_v28, 4  ;;  %v5909_v26 = vperm.slane %v5891_v28, 0 }
 0x272   : > { %v4266_v42 = vpop.eup %4265  ;;  %v2290_v61 = vmul.f32 %v4264_v23, %v5880_v51  ;;  %4277 = vtanh.f32 %v2198_v16  ;;  %v2115_v30 = vperm.slane %v2100_v56, 0  ;;  %v2107_v11 = vrot.slane %v5891_v28, 5 }
 0x273   : > { %v2289_v48 = vmul.f32 %v4266_v42, %v5880_v51  ;;  %v4268_v25 = vpop.eup %4267  ;;  %4279 = vtanh.f32 %v2197_v2  ;;  %v2205_v9 = vadd.f32 %v5862_v50, %v2156_v63  ;;  %v2154_v3 = vadd.f32 %v2114_v20, %v5618_v38 }
 0x274   : > { %2340 = vadd.xlane.f32.xlu2 %v2290_v61  ;;  %v2288_v10 = vmul.f32 %v4268_v25, %v5880_v51  ;;  %v4270_v4 = vpop.eup %4269  ;;  %4281 = vtanh.f32 %v2202_v43  ;;  %v2204_v37 = vadd.f32 %v5862_v50, %v2155_v52  ;;  %v2157_v60 = vadd.f32 %v2115_v30, %v5708_v58 }
 0x275   : > { %2338 = vadd.xlane.f32.xlu1 %v2289_v48  ;;  %v4272_v5 = vpop.eup %4271  ;;  %v2293_v23 = vmul.f32 %v4270_v4, %v5880_v51  ;;  %4283 = vtanh.f32 %v2201_v54  ;;  %v2108_v61 = vrot.slane %v5891_v28, 6  ;;  %v2158_v48 = vadd.f32 %v2115_v30, %v5726_v1 }
 0x276   : > { %2336 = vadd.xlane.f32.xlu0 %v2288_v10  ;;  %v4274_v47 = vpop.eup %4273  ;;  %v2292_v13 = vmul.f32 %v4272_v5, %v5880_v51  ;;  %4285 = vtanh.f32 %v2200_v19  ;;  %v2167_v16 = vadd.f32 %v5909_v26, %v5311_v49  ;;  %v2206_v32 = vadd.f32 %v5862_v50, %v2157_v60 }
 0x277   : > { %v4276_v42 = vpop.eup %4275  ;;  %v2101_v20 = vrot.slane %v5854_v15, 6  ;;  %v2159_v25 = vadd.f32 %v2115_v30, %v5751_v6  ;;  %v2291_v10 = vmul.f32 %v4274_v47, %v5880_v51  ;;  %4287 = vtanh.f32 %v2205_v9 }
 0x278   : > { %v4278_v2 = vpop.eup %4277  ;;  %v2203_v43 = vadd.f32 %v5862_v50, %v2154_v3  ;;  %v5928_v63 = vadd.f32 %v5862_v50, %v2158_v48  ;;  %v2296_v52 = vmul.f32 %v4276_v42, %v5880_v51  ;;  %4289 = vtanh.f32 %v2204_v37 }
 0x279   : > { %v4280_v54 = vpop.eup %4279  ;;  %v5932_v49 = vadd.f32 %v5862_v50, %v2159_v25  ;;  %v2102_v56 = vrot.slane %v5854_v15, 7  ;;  %v2166_v19 = vadd.f32 %v5909_v26, %v5237_v12  ;;  %v2119_v5 = vperm.slane %v2103_v22, 0 }
 0x27a   : > { %v4282_v4 = vpop.eup %4281  ;;  %v5937_v30 = vperm.slane %v2104_v33, 0  ;;  %v2121_v9 = vperm.slane %v2105_v57, 0  ;;  %v2295_v47 = vmul.f32 %v4278_v2, %v5880_v51  ;;  %4291 = vtanh.f32 %v2206_v32 }
 0x27b   : > { %v4284_v3 = vpop.eup %4283  ;;  %v5941_v37 = vperm.slane %v2101_v20, 0  ;;  %v2294_v42 = vmul.f32 %v4280_v54, %v5880_v51  ;;  %v2170_v48 = vadd.f32 %v2119_v5, %v5424_v62  ;;  %v2171_v12 = vadd.f32 %v2119_v5, %v5465_v53 }
 0x27c   : > { %2346 = vadd.xlane.f32.xlu2 %v2293_v23  ;;  %v2216_v23 = vadd.f32 %v5862_v50, %v2167_v16  ;;  %v4286_v60 = vpop.eup %4285  ;;  %4293 = vtanh.f32 %v2203_v43  ;;  %v2173_v22 = vadd.f32 %v5937_v30, %v5527_v29  ;;  %v2169_v33 = vadd.f32 %v2119_v5, %v5388_v40 }
 0x27d   : > { %2344 = vadd.xlane.f32.xlu1 %v2292_v13  ;;  %v2215_v13 = vadd.f32 %v5862_v50, %v2166_v19  ;;  %v2175_v57 = vadd.f32 %v2121_v9, %v5568_v21  ;;  %v5951_v16 = vpop.eup %4287  ;;  %v2219_v32 = vadd.f32 %v5862_v50, %v2170_v48  ;;  %v2220_v20 = vadd.f32 %v5862_v50, %v2171_v12 }
 0x27e   : > { %2342 = vadd.xlane.f32.xlu0 %v2291_v10  ;;  %v2174_v25 = vadd.f32 %v5937_v30, %v5547_v45  ;;  %v2122_v62 = vperm.slane %v2106_v35, 0  ;;  %v5957_v2 = vpop.eup %4289  ;;  %v2299_v53 = vmul.f32 %v4282_v4, %v5880_v51  ;;  %4295 = vtanh.f32 %v2216_v23 }
 0x27f   : > { %v2222_v40 = vadd.f32 %v5862_v50, %v2173_v22  ;;  %v2160_v29 = vadd.f32 %v5941_v37, %v5772_v55  ;;  %4297 = vtanh.f32 %v2215_v13  ;;  %v2218_v21 = vadd.f32 %v5862_v50, %v2169_v33 }
 0x280   : > { %v2177_v10 = vadd.f32 %v2121_v9, %v5595_v7  ;;  %v2168_v45 = vadd.f32 %v5909_v26, %v5344_v36  ;;  %v4292_v35 = vpop.eup %4291  ;;  %v2298_v43 = vmul.f32 %v4284_v3, %v5880_v51  ;;  %4299 = vtanh.f32 %v2219_v32 }
 0x281   : > { %v2224_v54 = vadd.f32 %v5862_v50, %v2175_v57  ;;  %4301 = vtanh.f32 %v2220_v20  ;;  %v2223_v4 = vadd.f32 %v5862_v50, %v2174_v25  ;;  %v5972_v19 = vmul.f32 %v4292_v35, %v5880_v51 }
 0x282   : > { %v2179_v7 = vadd.f32 %v2122_v62, %v5647_v31  ;;  %v4294_v5 = vpop.eup %4293  ;;  %4303 = vtanh.f32 %v2222_v40  ;;  %v2226_v36 = vadd.f32 %v5862_v50, %v2177_v10  ;;  %v2178_v26 = vadd.f32 %v2122_v62, %v5618_v38 }
 0x283   : > { %v2123_v3 = vperm.slane %v2107_v11, 0  ;;  %4305 = vtanh.f32 %v2218_v21  ;;  %v2161_v38 = vadd.f32 %v5941_v37, %v5793_v24  ;;  %v5995_v48 = vperm.slane %v2102_v56, 0 }
 0x284   : > { %2352 = vadd.xlane.f32.xlu2 %v2296_v52  ;;  %v2176_v52 = vadd.f32 %v2121_v9, %v5582_v18  ;;  %v2217_v18 = vadd.f32 %v5862_v50, %v2168_v45  ;;  %v2180_v9 = vadd.f32 %v2122_v62, %v5687_v44  ;;  %v5982_v23 = vpop.eup %4295  ;;  %4307 = vtanh.f32 %v2224_v54 }
 0x285   : > { %2350 = vadd.xlane.f32.xlu1 %v2295_v47  ;;  %v2209_v47 = vadd.f32 %v5862_v50, %v2160_v29  ;;  %v5988_v13 = vpop.eup %4297  ;;  %4309 = vtanh.f32 %v2223_v4  ;;  %v2228_v11 = vadd.f32 %v5862_v50, %v2179_v7  ;;  %v2124_v44 = vperm.slane %v2108_v61, 0 }
 0x286   : > { %2348 = vadd.xlane.f32.xlu0 %v2294_v42  ;;  %v2225_v31 = vadd.f32 %v5862_v50, %v2176_v52  ;;  %v2181_v42 = vadd.f32 %v2123_v3, %v5708_v58  ;;  %v5997_v12 = vpop.eup %4299  ;;  %v2109_v22 = vrot.slane %v5891_v28, 7  ;;  %v2297_v58 = vmul.f32 %v4286_v60, %v5880_v51 }
 0x287   : > { %4311 = vtanh.f32 %v2226_v36  ;;  %v2227_v33 = vadd.f32 %v5862_v50, %v2178_v26  ;;  %v6002_v57 = vpop.eup %4301  ;;  %v2229_v15 = vadd.f32 %v5862_v50, %v2180_v9  ;;  %v2182_v56 = vadd.f32 %v2123_v3, %v5726_v1 }
 0x288   : > { %4313 = vtanh.f32 %v2217_v18  ;;  %v2230_v61 = vadd.f32 %v5862_v50, %v2181_v42  ;;  %v6007_v32 = vpop.eup %4303  ;;  %v2184_v28 = vadd.f32 %v2124_v44, %v5772_v55  ;;  %v2183_v60 = vadd.f32 %v2123_v3, %v5751_v6 }
 0x289   : > { %4315 = vtanh.f32 %v2225_v31  ;;  %v2210_v20 = vadd.f32 %v5862_v50, %v2161_v38  ;;  %v6012_v25 = vpop.eup %4305  ;;  %v2302_v62 = vmul.f32 %v5951_v16, %v5880_v51  ;;  %v2301_v40 = vmul.f32 %v5957_v2, %v5880_v51 }
 0x28a   : > { %4317 = vtanh.f32 %v2228_v11  ;;  %v6018_v1 = vpop.eup %4307  ;;  %v2300_v55 = vmul.f32 %v4294_v5, %v5880_v51  ;;  %v2162_v6 = vadd.f32 %v5941_v37, %v5810_v0  ;;  %v2231_v16 = vadd.f32 %v5862_v50, %v2182_v56 }
 0x28b   : > { %4319 = vtanh.f32 %v2227_v33  ;;  %v6025_v29 = vpop.eup %4309  ;;  %v2125_v10 = vperm.slane %v2109_v22, 0  ;;  %v2233_v35 = vadd.f32 %v5862_v50, %v2184_v28  ;;  %v2232_v2 = vadd.f32 %v5862_v50, %v2183_v60 }
 0x28c   : > { %2358 = vadd.xlane.f32.xlu2 %v2299_v53  ;;  %v2163_v53 = vadd.f32 %v5995_v48, %v5840_v39  ;;  %4321 = vtanh.f32 %v2230_v61  ;;  %v2185_v37 = vadd.f32 %v2124_v44, %v5793_v24  ;;  %v2164_v36 = vadd.f32 %v5995_v48, %v5848_v46 }
 0x28d   : > { %2356 = vadd.xlane.f32.xlu1 %v2298_v43  ;;  %v4312_v45 = vpop.eup %4311  ;;  %4323 = vtanh.f32 %v2229_v15  ;;  %v2211_v43 = vadd.f32 %v5862_v50, %v2162_v6  ;;  %v2187_v4 = vadd.f32 %v2125_v10, %v5840_v39  ;;  %v2189_v26 = vadd.f32 %v2125_v10, %v5850_v41 }
 0x28e   : > { %2354 = vadd.xlane.f32.xlu0 %v2297_v58  ;;  %v2212_v21 = vadd.f32 %v5862_v50, %v2163_v53  ;;  %v4314_v54 = vpop.eup %4313  ;;  %v6033_v52 = vmul.f32 %v4312_v45, %v5880_v51  ;;  %4325 = vtanh.f32 %v5928_v63  ;;  %v2186_v39 = vadd.f32 %v2124_v44, %v5810_v0 }
 0x28f   : > { %v4316_v7 = vpop.eup %4315  ;;  %v6039_v5 = vmul.f32 %v4314_v54, %v5880_v51  ;;  %4327 = vtanh.f32 %v2209_v47  ;;  %v2236_v24 = vadd.f32 %v5862_v50, %v2187_v4  ;;  %v2213_v47 = vadd.f32 %v5862_v50, %v2164_v36 }
 0x290   : > { %v4318_v3 = vpop.eup %4317  ;;  %v6045_v18 = vmul.f32 %v4316_v7, %v5880_v51  ;;  %4329 = vtanh.f32 %v5932_v49  ;;  %v2238_v31 = vadd.f32 %v5862_v50, %v2189_v26  ;;  %v2433_v38 = vrot.slane %v5859_v59, 4 }
 0x291   : > { %v4320_v63 = vpop.eup %4319  ;;  %v6051_v9 = vmul.f32 %v4318_v3, %v5880_v51  ;;  %4331 = vtanh.f32 %v2231_v16  ;;  %v2165_v0 = vadd.f32 %v5995_v48, %v5850_v41  ;;  %v2234_v22 = vadd.f32 %v5862_v50, %v2185_v37 }
 0x292   : > { %v4322_v42 = vpop.eup %4321  ;;  %v6057_v11 = vmul.f32 %v4320_v63, %v5880_v51  ;;  %4333 = vtanh.f32 %v2233_v35  ;;  %v2188_v58 = vadd.f32 %v2125_v10, %v5848_v46  ;;  %v2312_v59 = vmul.f32 %v5988_v13, %v5880_v51  ;;  %4145 = vpush %v2433_v38 }
 0x293   : > { %v4324_v49 = vpop.eup %4323  ;;  %v6062_v44 = vmul.f32 %v4322_v42, %v5880_v51  ;;  %4335 = vtanh.f32 %v2232_v2  ;;  %v2214_v41 = vadd.f32 %v5862_v50, %v2165_v0  ;;  %v2235_v56 = vadd.f32 %v5862_v50, %v2186_v39 }
 0x294   : > { %2364 = vadd.xlane.f32.xlu2 %v2302_v62  ;;  %v4326_v33 = vpop.eup %4325  ;;  %v6069_v61 = vmul.f32 %v4324_v49, %v5880_v51  ;;  %4337 = vtanh.f32 %v2210_v20  ;;  %v2237_v46 = vadd.f32 %v5862_v50, %v2188_v58  ;;  %v2316_v13 = vmul.f32 %v5997_v12, %v5880_v51 }
 0x295   : > { %2362 = vadd.xlane.f32.xlu1 %v2301_v40  ;;  %v4328_v48 = vpop.eup %4327  ;;  %v6073_v15 = vmul.f32 %v4326_v33, %v5880_v51  ;;  %4339 = vtanh.f32 %v2212_v21  ;;  %v2172_v62 = vadd.f32 %v5937_v30, %v5502_v27  ;;  %v2319_v4 = vmul.f32 %v6007_v32, %v5880_v51 }
 0x296   : > { %2360 = vadd.xlane.f32.xlu0 %v2300_v55  ;;  %v4330_v28 = vpop.eup %4329  ;;  %v6080_v60 = vmul.f32 %v4328_v48, %v5880_v51  ;;  %4341 = vtanh.f32 %v2211_v43  ;;  %v2313_v55 = vmul.f32 %v5982_v23, %v5880_v51  ;;  %v2317_v43 = vmul.f32 %v6002_v57, %v5880_v51 }
 0x297   : > { %v4332_v20 = vpop.eup %4331  ;;  %v2305_v53 = vmul.f32 %v4330_v28, %v5880_v51  ;;  %4343 = vtanh.f32 %v2234_v22  ;;  %v2221_v30 = vadd.f32 %v5862_v50, %v2172_v62  ;;  %v2315_v3 = vmul.f32 %v6012_v25, %v5880_v51 }
 0x298   : > { %v4334_v40 = vpop.eup %4333  ;;  %v2328_v6 = vmul.f32 %v4332_v20, %v5880_v51  ;;  %4345 = vtanh.f32 %v2236_v24  ;;  %v2321_v0 = vmul.f32 %v6018_v1, %v5880_v51  ;;  %v2320_v25 = vmul.f32 %v6025_v29, %v5880_v51 }
 0x299   : > { %v4336_v12 = vpop.eup %4335  ;;  %v2330_v16 = vmul.f32 %v4334_v40, %v5880_v51  ;;  %4347 = vtanh.f32 %v2235_v56 }
 0x29a   : > { %v4338_v21 = vpop.eup %4337  ;;  %v2329_v10 = vmul.f32 %v4336_v12, %v5880_v51  ;;  %4349 = vtanh.f32 %v2213_v47 }
 0x29b   : > { %v4340_v27 = vpop.eup %4339  ;;  %v2307_v45 = vmul.f32 %v4338_v21, %v5880_v51  ;;  %4351 = vtanh.f32 %v2238_v31 }
 0x29c   : > { %2384 = vadd.xlane.f32.xlu2 %v2312_v59  ;;  %v4342_v23 = vpop.eup %4341  ;;  %v2309_v35 = vmul.f32 %v4340_v27, %v5880_v51  ;;  %4353 = vtanh.f32 %v2214_v41 }
 0x29d   : > { %2392 = vadd.xlane.f32.xlu1 %v2316_v13  ;;  %v4344_v2 = vpop.eup %4343  ;;  %v2308_v54 = vmul.f32 %v4342_v23, %v5880_v51  ;;  %4355 = vtanh.f32 %v2237_v46 }
 0x29e   : > { %2386 = vadd.xlane.f32.xlu0 %v2313_v55  ;;  %v4346_v37 = vpop.eup %4345  ;;  %v2331_v50 = vmul.f32 %v4344_v2, %v5880_v51  ;;  %4357 = vtanh.f32 %v2221_v30 }
 0x29f   : > { %v4348_v7 = vpop.eup %4347  ;;  %v2333_v36 = vmul.f32 %v4346_v37, %v5880_v51 }
 0x2a0   : > { %v4350_v26 = vpop.eup %4349  ;;  %v2332_v57 = vmul.f32 %v4348_v7, %v5880_v51 }
 0x2a1   : > { %v4352_v24 = vpop.eup %4351  ;;  %v2310_v39 = vmul.f32 %v4350_v26, %v5880_v51 }
 0x2a2   : > { %v4354_v63 = vpop.eup %4353  ;;  %v2335_v32 = vmul.f32 %v4352_v24, %v5880_v51 }
 0x2a3   : > { %v4356_v47 = vpop.eup %4355  ;;  %v2311_v31 = vmul.f32 %v4354_v63, %v5880_v51 }
 0x2a4   : > { %2394 = vadd.xlane.f32.xlu2 %v2317_v43  ;;  %v2334_v42 = vmul.f32 %v4356_v47, %v5880_v51  ;;  %v4358_v38 = vpop.eup %4357 }
 0x2a5   : > { %2398 = vadd.xlane.f32.xlu1 %v2319_v4  ;;  %v2318_v49 = vmul.f32 %v4358_v38, %v5880_v51  ;;  %v7051_v51 = vlaneseq }
 0x2a6   : > { %2390 = vadd.xlane.f32.xlu0 %v2315_v3 }
 0x2ac   : > { %2402 = vadd.xlane.f32.xlu2 %v2321_v0 }
 0x2ad   : > { %2400 = vadd.xlane.f32.xlu1 %v2320_v25 }
 0x2ae   : > { %2396 = vadd.xlane.f32.xlu0 %v2318_v49 }
 0x2b4   : > { %2406 = vadd.xlane.f32.xlu2 %v6033_v52 }
 0x2b5   : > { %2388 = vadd.xlane.f32.xlu1 %v6039_v5 }
 0x2b6   : > { %2404 = vadd.xlane.f32.xlu0 %v6045_v18 }
 0x2bc   : > { %2366 = vadd.xlane.f32.xlu2 %v5972_v19  ;;  %v6123_v19 = vand.u32 127, %v7051_v51 }
 0x2bd   : > { %2410 = vadd.xlane.f32.xlu1 %v6051_v9 }
 0x2be   : > { %2408 = vadd.xlane.f32.xlu0 %v6057_v11  ;;  %v6128_v29 = vadd.s32 4294967280, %v6123_v19  ;;  %v6131_v5 = vadd.s32 4294967288, %v6123_v19 }
 0x2c3   : > { %s4146_s30 = spop %4145 }
 0x2c4   : > { %2414 = vadd.xlane.f32.xlu2 %v6062_v44  ;;  %v6125_v1 = vstv %s4146_s30 }
 0x2c5   : > { %2412 = vadd.xlane.f32.xlu1 %v6069_v61 }
 0x2c6   : > { %2368 = vadd.xlane.f32.xlu0 %v6073_v15 }
 0x2cc   : > { %2372 = vadd.xlane.f32.xlu2 %v6080_v60 }
 0x2cd   : > { %2370 = vadd.xlane.f32.xlu1 %v2305_v53 }
 0x2ce   : > { %2416 = vadd.xlane.f32.xlu0 %v2328_v6 }
 0x2d4   : > { %2420 = vadd.xlane.f32.xlu2 %v2330_v16 }
 0x2d5   : > { %2418 = vadd.xlane.f32.xlu1 %v2329_v10 }
 0x2d6   : > { %2374 = vadd.xlane.f32.xlu0 %v2307_v45 }
 0x2dc   : > { %2378 = vadd.xlane.f32.xlu2 %v2309_v35 }
 0x2dd   : > { %2376 = vadd.xlane.f32.xlu1 %v2308_v54 }
 0x2de   : > { %2422 = vadd.xlane.f32.xlu0 %v2331_v50 }
 0x2e4   : > { %2426 = vadd.xlane.f32.xlu2 %v2333_v36 }
 0x2e5   : > { %2424 = vadd.xlane.f32.xlu1 %v2332_v57 }
 0x2e6   : > { %2380 = vadd.xlane.f32.xlu0 %v2310_v39 }
 0x2e7   : > { %v2341_v52 = vpop.xlane.xlu2 %2340 }
 0x2e8   : > { %v2439_v18 = vadd.f32 %v6125_v1, %v2341_v52  ;;  %v2339_v9 = vpop.xlane.xlu1 %2338 }
 0x2e9   : > { %v2438_v11 = vadd.f32 %v6125_v1, %v2339_v9  ;;  %v2337_v22 = vpop.xlane.xlu0 %2336 }
 0x2ea   : > { %v2565_v44 = vperm.slane %v2439_v18, %v6128_v29  ;;  %v2437_v33 = vadd.f32 %v6125_v1, %v2337_v22 }
 0x2eb   : > { %v2561_v58 = vperm.slane %v2438_v11, %v6131_v5 }
 0x2ec   : > { %2430 = vadd.xlane.f32.xlu2 %v2335_v32  ;;  %v2559_v59 = vperm.slane %v2437_v33, %v6123_v19 }
 0x2ed   : > { %2382 = vadd.xlane.f32.xlu1 %v2311_v31 }
 0x2ee   : > { %v2563_v61 = vsel %vm2562_vm4, %v2561_v58, %v2559_v59  ;;  %2428 = vadd.xlane.f32.xlu0 %v2334_v42 }
 0x2ef   : > { %v2347_v41 = vpop.xlane.xlu2 %2346  ;;  %v6141_v48 = vsel %vm2566_vm11, %v2565_v44, %v2563_v61 }
 0x2f0   : > { %v2442_v15 = vadd.f32 %v6125_v1, %v2347_v41  ;;  %v2345_v56 = vpop.xlane.xlu1 %2344 }
 0x2f1   : > { %v2441_v46 = vadd.f32 %v6125_v1, %v2345_v56  ;;  %v2343_v13 = vpop.xlane.xlu0 %2342 }
 0x2f2   : > { %v2571_v28 = vperm.slane %v2442_v15, %v6128_v29  ;;  %v2440_v20 = vadd.f32 %v6125_v1, %v2343_v13 }
 0x2f3   : > { %v2569_v60 = vperm.slane %v2441_v46, %v6131_v5 }
 0x2f4   : > { %v2568_v62 = vperm.slane %v2440_v20, %v6123_v19 }
 0x2f6   : > { %v2570_v53 = vsel %vm2562_vm4, %v2569_v60, %v2568_v62 }
 0x2f7   : > { %v2353_v40 = vpop.xlane.xlu2 %2352  ;;  %v6151_v55 = vsel %vm2566_vm11, %v2571_v28, %v2570_v53 }
 0x2f8   : > { %v2445_v6 = vadd.f32 %v6125_v1, %v2353_v40  ;;  %v2351_v12 = vpop.xlane.xlu1 %2350 }
 0x2f9   : > { %v2444_v16 = vadd.f32 %v6125_v1, %v2351_v12  ;;  %v2349_v10 = vpop.xlane.xlu0 %2348 }
 0x2fa   : > { %v2576_v21 = vperm.slane %v2445_v6, %v6128_v29  ;;  %v2443_v30 = vadd.f32 %v6125_v1, %v2349_v10 }
 0x2fb   : > { %v2574_v27 = vperm.slane %v2444_v16, %v6131_v5 }
 0x2fc   : > { %v2573_v45 = vperm.slane %v2443_v30, %v6123_v19 }
 0x2fe   : > { %v2575_v23 = vsel %vm2562_vm4, %v2574_v27, %v2573_v45 }
 0x2ff   : > { %v2359_v35 = vpop.xlane.xlu2 %2358  ;;  %v6161_v2 = vsel %vm2566_vm11, %v2576_v21, %v2575_v23 }
 0x300   : > { %v2448_v43 = vadd.f32 %v6125_v1, %v2359_v35  ;;  %v2357_v54 = vpop.xlane.xlu1 %2356 }
 0x301   : > { %v2447_v37 = vadd.f32 %v6125_v1, %v2357_v54  ;;  %v2355_v50 = vpop.xlane.xlu0 %2354 }
 0x302   : > { %v2581_v4 = vperm.slane %v2448_v43, %v6128_v29  ;;  %v2446_v36 = vadd.f32 %v6125_v1, %v2355_v50 }
 0x303   : > { %v2579_v7 = vperm.slane %v2447_v37, %v6131_v5 }
 0x304   : > { %v2578_v26 = vperm.slane %v2446_v36, %v6123_v19 }
 0x306   : > { %v2580_v3 = vsel %vm2562_vm4, %v2579_v7, %v2578_v26 }
 0x307   : > { %v2365_v57 = vpop.xlane.xlu2 %2364  ;;  %v6171_v24 = vsel %vm2566_vm11, %v2581_v4, %v2580_v3 }
 0x308   : > { %v2451_v39 = vadd.f32 %v6125_v1, %v2365_v57  ;;  %v2363_v63 = vpop.xlane.xlu1 %2362 }
 0x309   : > { %v2450_v32 = vadd.f32 %v6125_v1, %v2363_v63  ;;  %v2361_v31 = vpop.xlane.xlu0 %2360 }
 0x30a   : > { %v2586_v47 = vperm.slane %v2451_v39, %v6128_v29  ;;  %v2449_v38 = vadd.f32 %v6125_v1, %v2361_v31 }
 0x30b   : > { %v2584_v42 = vperm.slane %v2450_v32, %v6131_v5 }
 0x30c   : > { %v2583_v0 = vperm.slane %v2449_v38, %v6123_v19 }
 0x30e   : > { %v2585_v25 = vsel %vm2562_vm4, %v2584_v42, %v2583_v0  ;;  %v4482_v42 = vld [vmem:[%s4621_s11 + $0x8] sm:$0xf] }
 0x30f   : > { %v2385_v49 = vpop.xlane.xlu2 %2384  ;;  %v6181_v51 = vsel %vm2566_vm11, %v2586_v47, %v2585_v25  ;;  %v4481_v47 = vld [vmem:[%s4621_s11 + $0x4] sm:$0xf]  ;;  %vm2487_vm3 = vcmp.gt.f32.partialorder %v4482_v42, 0.5  ;;  %v6218_v25 = vld [vmem:[%s4621_s11 + $0xc] sm:$0xf] }
 0x310   : > { %v2461_v52 = vadd.f32 %v6125_v1, %v2385_v49  ;;  %v2393_v18 = vpop.xlane.xlu1 %2392  ;;  %vm2486_vm14 = vcmp.gt.f32.partialorder %v4481_v47, 0.5  ;;  %vm2488_vm12 = vcmp.gt.f32.partialorder %v6218_v25, 0.5 }
 0x311   : > { %v2465_v9 = vadd.f32 %v6125_v1, %v2393_v18  ;;  %v2387_v11 = vpop.xlane.xlu0 %2386  ;;  %v6215_v0 = vsel %vm2486_vm14, %v6151_v55, -1e+30  ;;  %v6226_v18 = vld [vmem:[%s4621_s11 + $0x10] sm:$0xf]  ;;  %v6233_v55 = vsel %vm2488_vm12, %v6171_v24, -1e+30 }
 0x312   : > { %v2603_v44 = vperm.slane %v2461_v52, %v6123_v19  ;;  %v2462_v22 = vadd.f32 %v6125_v1, %v2387_v11  ;;  %v6223_v52 = vsel %vm2487_vm3, %v6161_v2, -1e+30  ;;  %vm2489_vm15 = vcmp.gt.f32.partialorder %v6226_v18, 0.5  ;;  %v4485_v11 = vld [vmem:[%s4621_s11] sm:$0xf] }
 0x313   : > { %v2609_v58 = vperm.slane %v2465_v9, %v6131_v5  ;;  %v2691_v9 = vrot.slane %v6215_v0, 7  ;;  %vm2485_vm1 = vcmp.gt.f32.partialorder %v4485_v11, 0.5 }
 0x314   : > { %v2604_v33 = vperm.slane %v2462_v22, %v6131_v5  ;;  %v2693_v22 = vrot.slane %v6223_v52, 6  ;;  %v6249_v24 = vsel %vm2485_vm1, %v6141_v48, -1e+30 }
 0x316   : > { %v2605_v59 = vsel %vm2562_vm4, %v2604_v33, %v2603_v44  ;;  %v2695_v33 = vrot.slane %v6233_v55, 5 }
 0x317   : > { %v2395_v61 = vpop.xlane.xlu2 %2394 }
 0x318   : > { %v2466_v41 = vadd.f32 %v6125_v1, %v2395_v61  ;;  %v2399_v15 = vpop.xlane.xlu1 %2398 }
 0x319   : > { %v2468_v56 = vadd.f32 %v6125_v1, %v2399_v15  ;;  %v2391_v28 = vpop.xlane.xlu0 %2390  ;;  %v2692_v15 = vsel %vm1198_vm10, %v2691_v9, %v6249_v24 }
 0x31a   : > { %v2611_v46 = vperm.slane %v2466_v41, %v6128_v29  ;;  %v2464_v60 = vadd.f32 %v6125_v1, %v2391_v28 }
 0x31b   : > { %v2614_v13 = vperm.slane %v2468_v56, %v6131_v5 }
 0x31c   : > { %v2608_v20 = vperm.slane %v2464_v60, %v6123_v19 }
 0x31e   : > { %v2610_v62 = vsel %vm2562_vm4, %v2609_v58, %v2608_v20  ;;  %v6244_v58 = vsel %vm2489_vm15, %v6181_v51, -1e+30  ;;  %v2694_v20 = vsel %vm1163_vm7, %v2693_v22, %v2692_v15 }
 0x31f   : > { %v2403_v53 = vpop.xlane.xlu2 %2402  ;;  %v2612_v40 = vsel %vm2566_vm11, %v2611_v46, %v2610_v62  ;;  %v2697_v48 = vrot.slane %v6244_v58, 4 }
 0x320   : > { %v2401_v6 = vpop.xlane.xlu1 %2400  ;;  %v6239_v2 = vsel %vm2486_vm14, %v2612_v40, -1e+30  ;;  %vm2721_vm14 = vcmask 195584  }
 0x321   : > { %v2469_v12 = vadd.f32 %v6125_v1, %v2401_v6  ;;  %v2397_v16 = vpop.xlane.xlu0 %2396  ;;  %v2705_v51 = vrot.slane %v6239_v2, 7  ;;  %v2696_v6 = vsel %vm7052_vm13, %v2695_v33, %v2694_v20 }
 0x322   : > { %v2467_v21 = vadd.f32 %v6125_v1, %v2397_v16 }
 0x323   : > { %v2616_v10 = vperm.slane %v2469_v12, %v6128_v29 }
 0x324   : > { %v2613_v27 = vperm.slane %v2467_v21, %v6123_v19  ;;  %v6271_v21 = vld [vmem:[%s4621_s11 + $0x14] sm:$0xf] }
 0x325   : > { %vm2490_vm5 = vcmp.gt.f32.partialorder %v6271_v21, 0.5 }
 0x326   : > { %v2615_v30 = vsel %vm2562_vm4, %v2614_v13, %v2613_v27 }
 0x327   : > { %v2407_v45 = vpop.xlane.xlu2 %2406  ;;  %v2617_v23 = vsel %vm2566_vm11, %v2616_v10, %v2615_v30 }
 0x328   : > { %v2389_v35 = vpop.xlane.xlu1 %2388  ;;  %v2472_v41 = vadd.f32 %v6125_v1, %v2407_v45  ;;  %v6258_v28 = vsel %vm2487_vm3, %v2617_v23, -1e+30  ;;  %v6279_v23 = vsel %vm1169_vm2, %v2697_v48, %v2696_v6  ;;  %vm7054_vm3 = vcmask 1046534  }
 0x329   : > { %v2463_v43 = vadd.f32 %v6125_v1, %v2389_v35  ;;  %v2405_v54 = vpop.xlane.xlu0 %2404  ;;  %v2707_v12 = vrot.slane %v6258_v28, 6 }
 0x32a   : > { %v2471_v44 = vadd.f32 %v6125_v1, %v2405_v54  ;;  %v2621_v16 = vperm.slane %v2472_v41, %v6128_v29 }
 0x32b   : > { %v2606_v37 = vperm.slane %v2463_v43, %v6128_v29 }
 0x32c   : > { %v2619_v13 = vperm.slane %v2471_v44, %v6131_v5 }
 0x32d   : > { %v2607_v4 = vsel %vm2566_vm11, %v2606_v37, %v2605_v59  ;;  %v2470_v59 = vadd.f32 %v6125_v1, %v2403_v53 }
 0x32e   : > { %v6254_v56 = vsel %vm2485_vm1, %v2607_v4, -1e+30  ;;  %vm7058_vm1 = vmmov %vm7054_vm3 }
 0x32f   : > { %v2367_v50 = vpop.xlane.xlu2 %2366  ;;  %v2618_v62 = vperm.slane %v2470_v59, %v6123_v19  ;;  %v2706_v53 = vsel %vm1198_vm10, %v2705_v51, %v6254_v56 }
 0x330   : > { %v2411_v7 = vpop.xlane.xlu1 %2410  ;;  %v2452_v30 = vadd.f32 %v6125_v1, %v2367_v50  ;;  %v6282_v35 = vsel %vm1163_vm7, %v2707_v12, %v2706_v53 }
 0x331   : > { %v2409_v36 = vpop.xlane.xlu0 %2408  ;;  %v2620_v27 = vsel %vm2562_vm4, %v2619_v13, %v2618_v62  ;;  %v2474_v43 = vadd.f32 %v6125_v1, %v2411_v7  ;;  %v4487_v62 = vld [vmem:[%s4621_s11 + $0x18] sm:$0xf] }
 0x332   : > { %v2473_v54 = vadd.f32 %v6125_v1, %v2409_v36  ;;  %v2622_v42 = vsel %vm2566_vm11, %v2621_v16, %v2620_v27  ;;  %v2588_v11 = vperm.slane %v2452_v30, %v6123_v19  ;;  %vm2491_vm6 = vcmp.gt.f32.partialorder %v4487_v62, 0.5 }
 0x334   : > { %v2623_v22 = vperm.slane %v2473_v54, %v6123_v19 }
 0x337   : > { %v6207_v26 = vpop.xlane.xlu2 %2414 }
 0x338   : > { %v2413_v3 = vpop.xlane.xlu1 %2412 }
 0x339   : > { %v2369_v57 = vpop.xlane.xlu0 %2368  ;;  %v2475_v4 = vadd.f32 %v6125_v1, %v2413_v3  ;;  %v2476_v3 = vadd.f32 %v6125_v1, %v6207_v26 }
 0x33a   : > { %v2453_v40 = vadd.f32 %v6125_v1, %v2369_v57 }
 0x33b   : > { %v2626_v41 = vperm.slane %v2475_v4, %v6128_v29 }
 0x33c   : > { %v2589_v57 = vperm.slane %v2453_v40, %v6131_v5 }
 0x33e   : > { %v2590_v15 = vsel %vm2562_vm4, %v2589_v57, %v2588_v11 }
 0x33f   : > { %v2373_v39 = vpop.xlane.xlu2 %2372 }
 0x340   : > { %v2371_v63 = vpop.xlane.xlu1 %2370  ;;  %v2455_v50 = vadd.f32 %v6125_v1, %v2373_v39 }
 0x341   : > { %v2417_v32 = vpop.xlane.xlu0 %2416  ;;  %v2454_v10 = vadd.f32 %v6125_v1, %v2371_v63 }
 0x342   : > { %v2477_v63 = vadd.f32 %v6125_v1, %v2417_v32  ;;  %v2624_v32 = vperm.slane %v2474_v43, %v6131_v5  ;;  %v2593_v26 = vperm.slane %v2455_v50, %v6123_v19 }
 0x344   : > { %v2625_v40 = vsel %vm2562_vm4, %v2624_v32, %v2623_v22 }
 0x345   : > { %v2627_v27 = vsel %vm2566_vm11, %v2626_v41, %v2625_v40 }
 0x347   : > { %v6210_v31 = vpop.xlane.xlu2 %2420 }
 0x348   : > { %v2419_v38 = vpop.xlane.xlu1 %2418 }
 0x349   : > { %v2375_v49 = vpop.xlane.xlu0 %2374  ;;  %v2478_v9 = vadd.f32 %v6125_v1, %v2419_v38  ;;  %v2479_v38 = vadd.f32 %v6125_v1, %v6210_v31  ;;  %v2628_v31 = vperm.slane %v2476_v3, %v6123_v19 }
 0x34a   : > { %v2456_v45 = vadd.f32 %v6125_v1, %v2375_v49  ;;  %v2591_v49 = vperm.slane %v2454_v10, %v6128_v29  ;;  %v6323_v10 = vsel %vm2488_vm12, %v2622_v42, -1e+30  ;;  %vm7055_vm12 = vmmov %vm7052_vm13 }
 0x34b   : > { %v2631_v13 = vperm.slane %v2478_v9, %v6128_v29  ;;  %v2633_v6 = vperm.slane %v2479_v38, %v6123_v19  ;;  %v6344_v9 = vsel %vm2489_vm15, %v2627_v27, -1e+30  ;;  %vm7056_vm15 = vcmask 1047559   ;;  %vm7060_vm13 = vmmov %vm7055_vm12 }
 0x34c   : > { %v2594_v44 = vperm.slane %v2456_v45, %v6131_v5  ;;  %v2592_v51 = vsel %vm2566_vm11, %v2591_v49, %v2590_v15  ;;  %v2709_v49 = vrot.slane %v6323_v10, 5 }
 0x34d   : > { %v6328_v30 = vsel %vm2490_vm5, %v2592_v51, -1e+30 }
 0x34e   : > { %v2595_v20 = vsel %vm2562_vm4, %v2594_v44, %v2593_v26 }
 0x34f   : > { %v2379_v61 = vpop.xlane.xlu2 %2378 }
 0x350   : > { %v2377_v46 = vpop.xlane.xlu1 %2376  ;;  %v2458_v12 = vadd.f32 %v6125_v1, %v2379_v61 }
 0x351   : > { %v2423_v60 = vpop.xlane.xlu0 %2422  ;;  %v2457_v37 = vadd.f32 %v6125_v1, %v2377_v46  ;;  %v2629_v46 = vperm.slane %v2477_v63, %v6131_v5 }
 0x352   : > { %v2480_v7 = vadd.f32 %v6125_v1, %v2423_v60 }
 0x353   : > { %v2596_v33 = vperm.slane %v2457_v37, %v6128_v29  ;;  %v2630_v45 = vsel %vm2562_vm4, %v2629_v46, %v2628_v31 }
 0x354   : > { %v2634_v48 = vperm.slane %v2480_v7, %v6131_v5  ;;  %v2632_v54 = vsel %vm2566_vm11, %v2631_v13, %v2630_v45  ;;  %v2699_v7 = vrot.slane %v6328_v30, 3 }
 0x355   : > { %v2597_v16 = vsel %vm2566_vm11, %v2596_v33, %v2595_v20  ;;  %v6350_v3 = vsel %vm2490_vm5, %v2632_v54, -1e+30  ;;  %v2711_v33 = vrot.slane %v6344_v9, 4 }
 0x356   : > { %v2635_v37 = vsel %vm2562_vm4, %v2634_v48, %v2633_v6  ;;  %v6336_v57 = vsel %vm2491_vm6, %v2597_v16, -1e+30  ;;  %v2700_v26 = vsel %vm7053_vm9, %v2699_v7, %v6279_v23 }
 0x357   : > { %v2427_v47 = vpop.xlane.xlu2 %2426  ;;  %v2701_v38 = vrot.slane %v6336_v57, 2 }
 0x358   : > { %v2425_v36 = vpop.xlane.xlu1 %2424  ;;  %v2482_v50 = vadd.f32 %v6125_v1, %v2427_v47 }
 0x359   : > { %v2481_v39 = vadd.f32 %v6125_v1, %v2425_v36  ;;  %v2381_v59 = vpop.xlane.xlu0 %2380  ;;  %v2598_v36 = vperm.slane %v2458_v12, %v6123_v19  ;;  %v2702_v13 = vsel %vm7054_vm3, %v2701_v38, %v2700_v26 }
 0x35a   : > { %v2459_v60 = vadd.f32 %v6125_v1, %v2381_v59  ;;  %v2638_v21 = vperm.slane %v2482_v50, %v6123_v19 }
 0x35b   : > { %v2636_v53 = vperm.slane %v2481_v39, %v6128_v29  ;;  %v4488_v39 = vld [vmem:[%s4621_s11 + $0x1c] sm:$0xf] }
 0x35c   : > { %v2599_v61 = vperm.slane %v2459_v60, %v6131_v5  ;;  %vm2492_vm8 = vcmp.gt.f32.partialorder %v4488_v39, 0.5 }
 0x35d   : > { %v2637_v63 = vsel %vm2566_vm11, %v2636_v53, %v2635_v37 }
 0x35e   : > { %v6356_v32 = vsel %vm2491_vm6, %v2637_v63, -1e+30  ;;  %v2600_v18 = vsel %vm2562_vm4, %v2599_v61, %v2598_v36  ;;  %vm7062_vm6 = vmmov %vm7058_vm1 }
 0x35f   : > { %v2431_v43 = vpop.xlane.xlu2 %2430  ;;  %v2715_v51 = vrot.slane %v6356_v32, 2 }
 0x360   : > { %v2484_v25 = vadd.f32 %v6125_v1, %v2431_v43  ;;  %v2383_v4 = vpop.xlane.xlu1 %2382 }
 0x361   : > { %v2460_v42 = vadd.f32 %v6125_v1, %v2383_v4  ;;  %v2429_v11 = vpop.xlane.xlu0 %2428 }
 0x362   : > { %v2483_v44 = vadd.f32 %v6125_v1, %v2429_v11  ;;  %v2641_v22 = vperm.slane %v2484_v25, %v6128_v29  ;;  %v2713_v1 = vrot.slane %v6350_v3, 3 }
 0x363   : > { %v2601_v47 = vperm.slane %v2460_v42, %v6128_v29 }
 0x364   : > { %v2639_v41 = vperm.slane %v2483_v44, %v6131_v5  ;;  %v2710_v5 = vsel %vm7055_vm12, %v2709_v49, %v6282_v35 }
 0x365   : > { %v2602_v59 = vsel %vm2566_vm11, %v2601_v47, %v2600_v18  ;;  %v2712_v23 = vsel %vm1169_vm2, %v2711_v33, %v2710_v5 }
 0x366   : > { %v2666_v15 = vsel %vm2492_vm8, %v2602_v59, -1e+30  ;;  %v2640_v46 = vsel %vm2562_vm4, %v2639_v41, %v2638_v21  ;;  %vm7057_vm4 = vmmov %vm7053_vm9 }
 0x367   : > { %v2703_v29 = vrot.slane %v2666_v15, 1  ;;  %v2642_v19 = vsel %vm2566_vm11, %v2641_v22, %v2640_v46  ;;  %v2714_v20 = vsel %vm7057_vm4, %v2713_v1, %v2712_v23  ;;  %vm7059_vm11 = vmmov %vm7056_vm15 }
 0x368   : > { %v6377_v60 = vsel %vm2492_vm8, %v2642_v19, -1e+30  ;;  %v2716_v53 = vsel %vm7058_vm1, %v2715_v51, %v2714_v20  ;;  %vm7061_vm5 = vmmov %vm7057_vm4 }
 0x369   : > { %v2704_v48 = vsel %vm7056_vm15, %v2703_v29, %v2702_v13  ;;  %v2717_v62 = vrot.slane %v6377_v60, 1  ;;  %vm7063_vm8 = vmmov %vm7059_vm11 }
 0x36a   : > { %v2722_v31 = vsel %vm2721_vm14, %v2704_v48, -inf  ;;  %vm7064_vm9 = vmmov %vm7055_vm12 }
 0x36b   : > { %2723 = vmax.xlane.f32.xlu0 %v2722_v31  ;;  %v2718_v40 = vsel %vm7059_vm11, %v2717_v62, %v2716_v53  ;;  %vm7065_vm3 = vmmov %vm7057_vm4 }
 0x36c   : > { %v2725_v35 = vsel %vm2721_vm14, %v2718_v40, -inf  ;;  %vm7066_vm12 = vmmov %vm7058_vm1 }
 0x36d   : > { %2726 = vmax.xlane.f32.xlu1 %v2725_v35  ;;  %vm7067_vm15 = vmmov %vm7063_vm8 }
 0x3de   : > { %v2724_v6 = vpop.xlane.xlu0 %2723 }
 0x3df   : > { %v2730_v12 = vrot.slane %v2724_v6, 1  ;;  %v2731_v16 = vrot.slane %v2724_v6, 2  ;;  %v2732_v27 = vrot.slane %v2724_v6, 3  ;;  %v2733_v45 = vrot.slane %v2724_v6, 4 }
 0x3e0   : > { %v2734_v43 = vrot.slane %v2724_v6, 5  ;;  %v2760_v54 = vsub.f32 %v6249_v24, %v2724_v6  ;;  %v2735_v37 = vrot.slane %v2724_v6, 6  ;;  %v2727_v50 = vpop.xlane.xlu1 %2726  ;;  %v2736_v63 = vrot.slane %v2724_v6, 7 }
 0x3e1   : > { %v2761_v61 = vsub.f32 %v6215_v0, %v2730_v12  ;;  %v2762_v25 = vsub.f32 %v6223_v52, %v2731_v16  ;;  %v2763_v4 = vsub.f32 %v6233_v55, %v2732_v27  ;;  %v2737_v49 = vrot.slane %v2727_v50, 1 }
 0x3e2   : > { %v2776_v42 = vmul.f32 1.442695, %v2760_v54  ;;  %v2738_v7 = vrot.slane %v2727_v50, 2  ;;  %v2764_v36 = vsub.f32 %v6244_v58, %v2733_v45  ;;  %v2739_v44 = vrot.slane %v2727_v50, 3 }
 0x3e3   : > { %v2778_v11 = vmul.f32 1.442695, %v2761_v61  ;;  %v2780_v47 = vmul.f32 1.442695, %v2762_v25  ;;  %v2768_v39 = vsub.f32 %v6254_v56, %v2727_v50  ;;  %v2782_v24 = vmul.f32 1.442695, %v2763_v4 }
 0x3e4   : > { %4359 = vpow2.f32 %v2776_v42  ;;  %v2740_v18 = vrot.slane %v2727_v50, 4  ;;  %v2769_v0 = vsub.f32 %v6239_v2, %v2737_v49  ;;  %v2741_v52 = vrot.slane %v2727_v50, 5 }
 0x3e5   : > { %4361 = vpow2.f32 %v2778_v11  ;;  %v2770_v55 = vsub.f32 %v6258_v28, %v2738_v7  ;;  %v2792_v22 = vmul.f32 1.442695, %v2768_v39  ;;  %v2765_v33 = vsub.f32 %v6328_v30, %v2734_v43 }
 0x3e6   : > { %4363 = vpow2.f32 %v2780_v47  ;;  %v2794_v38 = vmul.f32 1.442695, %v2769_v0  ;;  %v2766_v58 = vsub.f32 %v6336_v57, %v2735_v37  ;;  %v2771_v21 = vsub.f32 %v6323_v10, %v2739_v44 }
 0x3e7   : > { %4365 = vpow2.f32 %v2792_v22  ;;  %v2796_v56 = vmul.f32 1.442695, %v2770_v55  ;;  %v2767_v59 = vsub.f32 %v2666_v15, %v2736_v63  ;;  %v2784_v41 = vmul.f32 1.442695, %v2764_v36 }
 0x3e8   : > { %4367 = vpow2.f32 %v2794_v38  ;;  %v2786_v1 = vmul.f32 1.442695, %v2765_v33  ;;  %v2788_v2 = vmul.f32 1.442695, %v2766_v58  ;;  %v2742_v26 = vrot.slane %v2727_v50, 6 }
 0x3e9   : > { %4369 = vpow2.f32 %v2796_v56  ;;  %v2743_v46 = vrot.slane %v2727_v50, 7  ;;  %v2790_v29 = vmul.f32 1.442695, %v2767_v59  ;;  %v2772_v30 = vsub.f32 %v6344_v9, %v2740_v18 }
 0x3ea   : > { %v6397_v28 = vpop.eup %4359  ;;  %4371 = vpow2.f32 %v2782_v24  ;;  %v2773_v57 = vsub.f32 %v6350_v3, %v2741_v52  ;;  %v2798_v10 = vmul.f32 1.442695, %v2771_v21  ;;  %v2774_v15 = vsub.f32 %v6356_v32, %v2742_v26 }
 0x3eb   : > { %v6401_v51 = vpop.eup %4361  ;;  %4373 = vpow2.f32 %v2784_v41  ;;  %v2775_v13 = vsub.f32 %v6377_v60, %v2743_v46  ;;  %v2800_v48 = vmul.f32 1.442695, %v2772_v30 }
 0x3ec   : > { %v6405_v19 = vpop.eup %4363  ;;  %4375 = vpow2.f32 %v2786_v1  ;;  %v2824_v5 = vrot.slane %v6401_v51, 7  ;;  %v2802_v3 = vmul.f32 1.442695, %v2773_v57  ;;  %v2804_v20 = vmul.f32 1.442695, %v2774_v15 }
 0x3ed   : > { %v6408_v23 = vpop.eup %4365  ;;  %4377 = vpow2.f32 %v2788_v2  ;;  %v2826_v9 = vrot.slane %v6405_v19, 6  ;;  %v2806_v62 = vmul.f32 1.442695, %v2775_v13 }
 0x3ee   : > { %v6411_v31 = vpop.eup %4367  ;;  %4379 = vpow2.f32 %v2790_v29  ;;  %v2825_v32 = vsel %vm1198_vm10, %v2824_v5, %v6397_v28 }
 0x3ef   : > { %v6415_v60 = vpop.eup %4369  ;;  %4381 = vpow2.f32 %v2798_v10  ;;  %v2838_v53 = vrot.slane %v6411_v31, 7  ;;  %v2827_v35 = vsel %vm1163_vm7, %v2826_v9, %v2825_v32 }
 0x3f0   : > { %v6418_v40 = vpop.eup %4371  ;;  %4383 = vpow2.f32 %v2800_v48  ;;  %v2840_v16 = vrot.slane %v6415_v60, 6 }
 0x3f1   : > { %v6421_v6 = vpop.eup %4373  ;;  %v2828_v12 = vrot.slane %v6418_v40, 5  ;;  %4385 = vpow2.f32 %v2802_v3  ;;  %v2839_v43 = vsel %vm1198_vm10, %v2838_v53, %v6408_v23 }
 0x3f2   : > { %v6425_v27 = vpop.eup %4375  ;;  %v2830_v45 = vrot.slane %v6421_v6, 4  ;;  %4387 = vpow2.f32 %v2804_v20  ;;  %v2841_v7 = vsel %vm1163_vm7, %v2840_v16, %v2839_v43 }
 0x3f3   : > { %v6430_v54 = vpop.eup %4377  ;;  %v2829_v37 = vsel %vm7060_vm13, %v2828_v12, %v2827_v35  ;;  %v2832_v61 = vrot.slane %v6425_v27, 3  ;;  %4389 = vpow2.f32 %v2806_v62 }
 0x3f4   : > { %v6434_v25 = vpop.eup %4379  ;;  %v2831_v4 = vsel %vm1169_vm2, %v2830_v45, %v2829_v37  ;;  %v2834_v50 = vrot.slane %v6430_v54, 2 }
 0x3f5   : > { %v6438_v63 = vpop.eup %4381  ;;  %v2833_v42 = vsel %vm7061_vm5, %v2832_v61, %v2831_v4  ;;  %v2836_v49 = vrot.slane %v6434_v25, 1 }
 0x3f6   : > { %v6443_v36 = vpop.eup %4383  ;;  %v2835_v11 = vsel %vm7062_vm6, %v2834_v50, %v2833_v42  ;;  %v2842_v47 = vrot.slane %v6438_v63, 5 }
 0x3f7   : > { %v6447_v44 = vpop.eup %4385  ;;  %v2837_v39 = vsel %vm7063_vm8, %v2836_v49, %v2835_v11  ;;  %v2844_v24 = vrot.slane %v6443_v36, 4 }
 0x3f8   : > { %v6451_v18 = vpop.eup %4387  ;;  %v2854_v0 = vsel %vm2721_vm14, %v2837_v39, 0.0  ;;  %v2843_v52 = vsel %vm7064_vm9, %v2842_v47, %v2841_v7  ;;  %v2846_v55 = vrot.slane %v6447_v44, 3 }
 0x3f9   : > { %v6456_v22 = vpop.eup %4389  ;;  %2855 = vadd.xlane.f32.xlu2 %v2854_v0  ;;  %v2845_v38 = vsel %vm1169_vm2, %v2844_v24, %v2843_v52  ;;  %v2848_v33 = vrot.slane %v6451_v18, 2 }
 0x3fa   : > { %v2847_v58 = vsel %vm7065_vm3, %v2846_v55, %v2845_v38  ;;  %v2850_v21 = vrot.slane %v6456_v22, 1 }
 0x3fb   : > { %v2849_v56 = vsel %vm7066_vm12, %v2848_v33, %v2847_v58 }
 0x3fc   : > { %v2851_v59 = vsel %vm7067_vm15, %v2850_v21, %v2849_v56 }
 0x3fd   : > { %v2857_v41 = vsel %vm2721_vm14, %v2851_v59, 0.0 }
 0x3fe   : > { %2858 = vadd.xlane.f32.xlu0 %v2857_v41 }
 0x46c   : > { %v6465_v1 = vpop.xlane.xlu2 %2855 }
 0x46d   : > { %4391 = vrcp.f32 %v6465_v1  ;;  %v2862_v2 = vrot.slane %v6465_v1, 1  ;;  %v2863_v26 = vrot.slane %v6465_v1, 2  ;;  %v2901_v10 = vand.u32 2147483647, %v6465_v1 }
 0x46e   : > { %v2903_v15 = vand.u32 2147483648, %v6465_v1  ;;  %vm2897_vm4 = vweird.f32 %v6465_v1  ;;  %v2864_v37 = vrot.slane %v6465_v1, 3  ;;  %v6477_v7 = vrot.slane %v6465_v1, 5 }
 0x46f   : > { %4393 = vrcp.f32 %v2862_v2  ;;  %vm2902_vm1 = vcmp.eq.f32.partialorder %v2901_v10, 8.507059e+37  ;;  %vm2912_vm5 = vweird.f32 %v2862_v2  ;;  %v2916_v35 = vand.u32 2147483647, %v2862_v2 }
 0x470   : > { %4395 = vrcp.f32 %v2863_v26  ;;  %v2904_v32 = vor.u32 1.1754944e-38, %v2903_v15  ;;  %v2918_v12 = vand.u32 2147483648, %v2862_v2  ;;  %v2933_v39 = vand.u32 2147483648, %v2863_v26 }
 0x471   : > { %4397 = vrcp.f32 %v2864_v37  ;;  %vm2917_vm8 = vcmp.eq.f32.partialorder %v2916_v35, 8.507059e+37  ;;  %vm2927_vm3 = vweird.f32 %v2863_v26  ;;  %v2931_v0 = vand.u32 2147483647, %v2863_v26 }
 0x472   : > { %v2919_v49 = vor.u32 1.1754944e-38, %v2918_v12  ;;  %4399 = vrcp.f32 %v6477_v7  ;;  %v2934_v38 = vor.u32 1.1754944e-38, %v2933_v39  ;;  %v6482_v33 = vrot.slane %v6465_v1, 4 }
 0x473   : > { %v4392_v46 = vpop.eup %4391  ;;  %vm2932_vm15 = vcmp.eq.f32.partialorder %v2931_v0, 8.507059e+37  ;;  %v6485_v21 = vrot.slane %v6465_v1, 6  ;;  %v2978_v12 = vand.u32 2147483648, %v6477_v7 }
 0x474   : > { %v2893_v29 = vmul.f32 %v4392_v46, %v6465_v1  ;;  %vm2898_vm14 = vweird.f32 %v4392_v46  ;;  %4401 = vrcp.f32 %v6482_v33 }
 0x475   : > { %v4394_v30 = vpop.eup %4393  ;;  %vm2899_vm11 = vmor %vm2897_vm4, %vm2898_vm14  ;;  %4403 = vrcp.f32 %v6485_v21  ;;  %vm2942_vm4 = vweird.f32 %v2864_v37 }
 0x476   : > { %v2894_v57 = vsub.f32 1.0, %v2893_v29  ;;  %v2908_v13 = vmul.f32 %v4394_v30, %v2862_v2  ;;  %v4396_v9 = vpop.eup %4395  ;;  %vm2913_vm13 = vweird.f32 %v4394_v30  ;;  %v6494_v29 = vrot.slane %v6465_v1, 7 }
 0x477   : > { %v2923_v62 = vmul.f32 %v4396_v9, %v2863_v26  ;;  %vm2914_vm6 = vmor %vm2912_vm5, %vm2913_vm13  ;;  %vm2928_vm9 = vweird.f32 %v4396_v9  ;;  %v4398_v24 = vpop.eup %4397  ;;  %vm2972_vm5 = vweird.f32 %v6477_v7 }
 0x478   : > { %v2895_v5 = vmul.f32 %v4392_v46, %v2894_v57  ;;  %v2909_v48 = vsub.f32 1.0, %v2908_v13  ;;  %vm2929_vm12 = vmor %vm2927_vm3, %vm2928_vm9  ;;  %v2938_v52 = vmul.f32 %v4398_v24, %v2864_v37  ;;  %v4400_v59 = vpop.eup %4399  ;;  %vm2943_vm14 = vweird.f32 %v4398_v24 }
 0x479   : > { %v2924_v43 = vsub.f32 1.0, %v2923_v62  ;;  %v2968_v26 = vmul.f32 %v4400_v59, %v6477_v7  ;;  %v2946_v13 = vand.u32 2147483647, %v2864_v37  ;;  %4405 = vrcp.f32 %v6494_v29 }
 0x47a   : > { %v2896_v3 = vadd.f32 %v4392_v46, %v2895_v5  ;;  %v2910_v20 = vmul.f32 %v4394_v30, %v2909_v48  ;;  %v2939_v56 = vsub.f32 1.0, %v2938_v52  ;;  %vm2973_vm13 = vweird.f32 %v4400_v59 }
 0x47b   : > { %v2925_v50 = vmul.f32 %v4396_v9, %v2924_v43  ;;  %v2969_v10 = vsub.f32 1.0, %v2968_v26  ;;  %v6514_v43 = vpop.xlane.xlu0 %2858  ;;  %v2961_v52 = vand.u32 2147483647, %v6482_v33  ;;  %v3008_v26 = vand.u32 2147483648, %v6494_v29 }
 0x47c   : > { %v2900_v53 = vsel %vm2899_vm11, %v4392_v46, %v2896_v3  ;;  %v2911_v45 = vadd.f32 %v4394_v30, %v2910_v20  ;;  %v2940_v2 = vmul.f32 %v4398_v24, %v2939_v56  ;;  %vm2947_vm11 = vcmp.eq.f32.partialorder %v2946_v13, 8.507059e+37 }
 0x47d   : > { %v2905_v16 = vsel %vm2902_vm1, %v2904_v32, %v2900_v53  ;;  %v2926_v47 = vadd.f32 %v4396_v9, %v2925_v50  ;;  %vm2944_vm1 = vmor %vm2942_vm4, %vm2943_vm14  ;;  %v2970_v48 = vmul.f32 %v4400_v59, %v2969_v10  ;;  %vm2987_vm14 = vweird.f32 %v6485_v21 }
 0x47e   : > { %v2906_v61 = vmul.f32 %v6397_v28, %v2905_v16  ;;  %v2915_v4 = vsel %vm2914_vm6, %v4394_v30, %v2911_v45  ;;  %v6496_v30 = vpop.eup %4401  ;;  %v2941_v57 = vadd.f32 %v4398_v24, %v2940_v2  ;;  %v2976_v45 = vand.u32 2147483647, %v6477_v7  ;;  %vm2974_vm6 = vmor %vm2972_vm5, %vm2973_vm13 }
 0x47f   : > { %v2920_v11 = vsel %vm2917_vm8, %v2919_v49, %v2915_v4  ;;  %v2930_v55 = vsel %vm2929_vm12, %v4396_v9, %v2926_v47  ;;  %v6498_v15 = vpop.eup %4403  ;;  %v2953_v1 = vmul.f32 %v6496_v30, %v6482_v33  ;;  %v2971_v20 = vadd.f32 %v4400_v59, %v2970_v48 }
 0x480   : > { %v3132_v42 = vperm.slane %v2906_v61, 0  ;;  %v2921_v28 = vmul.f32 %v6401_v51, %v2920_v11  ;;  %v2935_v51 = vsel %vm2932_vm15, %v2934_v38, %v2930_v55  ;;  %v2945_v5 = vsel %vm2944_vm1, %v4398_v24, %v2941_v57  ;;  %v6507_v35 = vpop.eup %4405 }
 0x481   : > { %v2936_v41 = vmul.f32 %v6405_v19, %v2935_v51  ;;  %v2948_v19 = vand.u32 2147483648, %v2864_v37  ;;  %v2983_v9 = vmul.f32 %v6498_v15, %v6485_v21  ;;  %v2954_v62 = vsub.f32 1.0, %v2953_v1 }
 0x482   : > { %3149 = vperm.xlu0 %4174, %v3132_v42   ;;  %3143 = vperm.xlu2 %4181, %v3132_v42   ;;  %v3151_v58 = vperm.slane %v2921_v28, 0  ;;  %v2975_v37 = vsel %vm2974_vm6, %v4400_v59, %v2971_v20  ;;  %v2998_v50 = vmul.f32 %v6507_v35, %v6494_v29  ;;  %vm2977_vm8 = vcmp.eq.f32.partialorder %v2976_v45, 8.507059e+37 }
 0x483   : > { %3137 = vperm.xlu1 %4180, %v3132_v42   ;;  %v3170_v46 = vperm.slane %v2936_v41, 0  ;;  %v2949_v3 = vor.u32 1.1754944e-38, %v2948_v19  ;;  %v2984_v53 = vsub.f32 1.0, %v2983_v9  ;;  %v2955_v61 = vmul.f32 %v6496_v30, %v2954_v62 }
 0x484   : > { %v2979_v42 = vor.u32 1.1754944e-38, %v2978_v12  ;;  %vm2958_vm9 = vweird.f32 %v6496_v30  ;;  %v6524_v7 = vrot.slane %v6514_v43, 1  ;;  %vm2988_vm3 = vweird.f32 %v6498_v15 }
 0x485   : > { %v2950_v32 = vsel %vm2947_vm11, %v2949_v3, %v2945_v5  ;;  %v2985_v4 = vmul.f32 %v6498_v15, %v2984_v53  ;;  %v2956_v11 = vadd.f32 %v6496_v30, %v2955_v61  ;;  %v2999_v39 = vsub.f32 1.0, %v2998_v50  ;;  %vm2989_vm4 = vmor %vm2987_vm14, %vm2988_vm3 }
 0x486   : > { %v2951_v16 = vmul.f32 %v6418_v40, %v2950_v32  ;;  %v2980_v40 = vsel %vm2977_vm8, %v2979_v42, %v2975_v37  ;;  %vm2957_vm12 = vweird.f32 %v6482_v33  ;;  %v2963_v24 = vand.u32 2147483648, %v6482_v33 }
 0x487   : > { %v2986_v47 = vadd.f32 %v6498_v15, %v2985_v4  ;;  %v2993_v28 = vand.u32 2147483648, %v6485_v21  ;;  %v2981_v0 = vmul.f32 %v6425_v27, %v2980_v40  ;;  %vm2959_vm15 = vmor %vm2957_vm12, %vm2958_vm9  ;;  %v2991_v55 = vand.u32 2147483647, %v6485_v21 }
 0x488   : > { %v6520_v49 = vperm.slane %v2951_v16, 0  ;;  %4407 = vrcp.f32 %v6524_v7  ;;  %v2960_v38 = vsel %vm2959_vm15, %v6496_v30, %v2956_v11  ;;  %v3000_v51 = vmul.f32 %v6507_v35, %v2999_v39 }
 0x489   : > { %v2964_v56 = vor.u32 1.1754944e-38, %v2963_v24  ;;  %v2994_v59 = vor.u32 1.1754944e-38, %v2993_v28  ;;  %v6541_v41 = vperm.slane %v2981_v0, 0  ;;  %vm2962_vm1 = vcmp.eq.f32.partialorder %v2961_v52, 8.507059e+37 }
 0x48a   : > { %4182 = vset.pattern.permute.xlu0 %v4605_v14  ;;  %4183 = vset.pattern.permute.xlu2 %v4805_v34  ;;  %vm2992_vm11 = vcmp.eq.f32.partialorder %v2991_v55, 8.507059e+37  ;;  %v3001_v21 = vadd.f32 %v6507_v35, %v3000_v51  ;;  %vm3003_vm13 = vweird.f32 %v6507_v35  ;;  %vm3002_vm5 = vweird.f32 %v6494_v29 }
 0x48b   : > { %3156 = vperm.xlu1 %4180, %v3151_v58   ;;  %v2965_v27 = vsel %vm2962_vm1, %v2964_v56, %v2960_v38  ;;  %v3006_v57 = vand.u32 2147483647, %v6494_v29  ;;  %4409 = vrcp.f32 %v6514_v43  ;;  %vm3004_vm6 = vmor %vm3002_vm5, %vm3003_vm13  ;;  %v3009_v19 = vor.u32 1.1754944e-38, %v3008_v26 }
 0x48c   : > { %v3005_v10 = vsel %vm3004_vm6, %v6507_v35, %v3001_v21  ;;  %v6568_v20 = vrot.slane %v6514_v43, 4  ;;  %vm3032_vm3 = vweird.f32 %v6524_v7  ;;  %v3036_v12 = vand.u32 2147483647, %v6524_v7 }
 0x48d   : > { %vm3007_vm8 = vcmp.eq.f32.partialorder %v3006_v57, 8.507059e+37  ;;  %v6579_v50 = vrot.slane %v6514_v43, 5  ;;  %v3023_v11 = vand.u32 2147483648, %v6514_v43  ;;  %v3021_v39 = vand.u32 2147483647, %v6514_v43 }
 0x48e   : > { %v4408_v2 = vpop.eup %4407  ;;  %v3010_v48 = vsel %vm3007_vm8, %v3009_v19, %v3005_v10  ;;  %vm3037_vm15 = vcmp.eq.f32.partialorder %v3036_v12, 8.507059e+37 }
 0x48f   : > { %v3011_v1 = vmul.f32 %v6434_v25, %v3010_v48  ;;  %vm3033_vm9 = vweird.f32 %v4408_v2  ;;  %v3038_v25 = vand.u32 2147483648, %v6524_v7  ;;  %v3024_v52 = vor.u32 1.1754944e-38, %v3023_v11 }
 0x490   : > { %vm3034_vm12 = vmor %vm3032_vm3, %vm3033_vm9  ;;  %v3083_v48 = vand.u32 2147483648, %v6568_v20  ;;  %vm3077_vm3 = vweird.f32 %v6568_v20 }
 0x491   : > { %v4410_v29 = vpop.eup %4409  ;;  %v6565_v32 = vperm.slane %v3011_v1, 0  ;;  %v3039_v61 = vor.u32 1.1754944e-38, %v3038_v25  ;;  %v3098_v25 = vand.u32 2147483648, %v6579_v50 }
 0x492   : > { %3168 = vperm.xlu2 %4183, %v3151_v58   ;;  %3162 = vperm.xlu0 %4182, %v3151_v58   ;;  %v2990_v58 = vsel %vm2989_vm4, %v6498_v15, %v2986_v47  ;;  %v3028_v15 = vmul.f32 %v4408_v2, %v6524_v7  ;;  %v3013_v3 = vmul.f32 %v4410_v29, %v6514_v43  ;;  %vm3018_vm14 = vweird.f32 %v4410_v29 }
 0x493   : > { %3175 = vperm.xlu1 %4180, %v3170_v46   ;;  %v2995_v33 = vsel %vm2992_vm11, %v2994_v59, %v2990_v58  ;;  %vm3017_vm4 = vweird.f32 %v6514_v43  ;;  %vm3022_vm11 = vcmp.eq.f32.partialorder %v3021_v39, 8.507059e+37 }
 0x494   : > { %v2996_v30 = vmul.f32 %v6430_v54, %v2995_v33  ;;  %v3029_v54 = vsub.f32 1.0, %v3028_v15  ;;  %v3014_v53 = vsub.f32 1.0, %v3013_v3  ;;  %vm3019_vm1 = vmor %vm3017_vm4, %vm3018_vm14  ;;  %vm3092_vm4 = vweird.f32 %v6579_v50 }
 0x496   : > { %v6556_v5 = vperm.slane %v2996_v30, 0  ;;  %v3030_v9 = vmul.f32 %v4408_v2, %v3029_v54  ;;  %v3015_v45 = vmul.f32 %v4410_v29, %v3014_v53 }
 0x498   : > { %v3031_v62 = vadd.f32 %v4408_v2, %v3030_v9  ;;  %v3016_v42 = vadd.f32 %v4410_v29, %v3015_v45 }
 0x49a   : > { %4184 = vset.pattern.permute.xlu2 %v4605_v14  ;;  %4186 = vset.pattern.permute.xlu0 %v4591_v8  ;;  %v3035_v16 = vsel %vm3034_vm12, %v4408_v2, %v3031_v62  ;;  %v3020_v24 = vsel %vm3019_vm1, %v4410_v29, %v3016_v42  ;;  %v3099_v42 = vor.u32 1.1754944e-38, %v3098_v25 }
 0x49b   : > { %4185 = vset.pattern.permute.xlu1 %v4805_v34  ;;  %v3040_v4 = vsel %vm3037_vm15, %v3039_v61, %v3035_v16  ;;  %v3025_v38 = vsel %vm3022_vm11, %v3024_v52, %v3020_v24  ;;  %v3096_v16 = vand.u32 2147483647, %v6579_v50 }
 0x49c   : > { %v3041_v47 = vmul.f32 %v6411_v31, %v3040_v4  ;;  %v6596_v31 = vrot.slane %v6514_v43, 6 }
 0x49d   : > { %vm3097_vm11 = vcmp.eq.f32.partialorder %v3096_v16, 8.507059e+37 }
 0x49e   : > { %v6590_v55 = vperm.slane %v3041_v47, 0  ;;  %v3113_v47 = vand.u32 2147483648, %v6596_v31 }
 0x4a2   : > { %3181 = vperm.xlu2 %4184, %v3170_v46   ;;  %3194 = vperm.xlu0 %4186, %v6520_v49  }
 0x4a3   : > { %3187 = vperm.xlu1 %4185, %v3170_v46   ;;  %v2966_v46 = vmul.f32 %v6421_v6, %v2965_v27  ;;  %v6559_v6 = vrot.slane %v6514_v43, 3  ;;  %v3026_v27 = vmul.f32 %v6408_v23, %v3025_v38  ;;  %v6610_v23 = vrot.slane %v6514_v43, 7 }
 0x4a5   : > { %v3208_v13 = vperm.slane %v2966_v46, 0  ;;  %4411 = vrcp.f32 %v6559_v6  ;;  %v3068_v59 = vand.u32 2147483648, %v6559_v6  ;;  %vm3062_vm5 = vweird.f32 %v6559_v6 }
 0x4a6   : > { %4413 = vrcp.f32 %v6568_v20  ;;  %v3066_v33 = vand.u32 2147483647, %v6559_v6  ;;  %v6607_v30 = vperm.slane %v3026_v27, 0 }
 0x4a7   : > { %4415 = vrcp.f32 %v6579_v50  ;;  %v3069_v46 = vor.u32 1.1754944e-38, %v3068_v59 }
 0x4a8   : > { %vm3067_vm8 = vcmp.eq.f32.partialorder %v3066_v33, 8.507059e+37 }
 0x4aa   : > { %3200 = vperm.xlu2 %4184, %v6520_v49   ;;  %3232 = vperm.xlu0 %4186, %v6541_v41  }
 0x4ab   : > { %4187 = vset.pattern.permute.xlu1 %v4591_v8  ;;  %v4412_v35 = vpop.eup %4411 }
 0x4ac   : > { %v3058_v37 = vmul.f32 %v4412_v35, %v6559_v6  ;;  %v4414_v7 = vpop.eup %4413  ;;  %vm3063_vm13 = vweird.f32 %v4412_v35 }
 0x4ad   : > { %v3073_v0 = vmul.f32 %v4414_v7, %v6568_v20  ;;  %v4416_v56 = vpop.eup %4415  ;;  %vm3064_vm6 = vmor %vm3062_vm5, %vm3063_vm13  ;;  %vm3078_vm9 = vweird.f32 %v4414_v7 }
 0x4ae   : > { %v3059_v40 = vsub.f32 1.0, %v3058_v37  ;;  %v3088_v26 = vmul.f32 %v4416_v56, %v6579_v50  ;;  %vm3079_vm12 = vmor %vm3077_vm3, %vm3078_vm9  ;;  %vm3093_vm14 = vweird.f32 %v4416_v56  ;;  %vm3107_vm9 = vweird.f32 %v6596_v31 }
 0x4af   : > { %v3074_v51 = vsub.f32 1.0, %v3073_v0  ;;  %vm3094_vm1 = vmor %vm3092_vm4, %vm3093_vm14  ;;  %vm3122_vm4 = vweird.f32 %v6610_v23 }
 0x4b0   : > { %v3060_v28 = vmul.f32 %v4412_v35, %v3059_v40  ;;  %v3089_v19 = vsub.f32 1.0, %v3088_v26 }
 0x4b1   : > { %v3075_v2 = vmul.f32 %v4414_v7, %v3074_v51  ;;  %v3114_v51 = vor.u32 1.1754944e-38, %v3113_v47  ;;  %v6722_v47 = vld [vmem:[%s4626_s14 + $0x30] sm:$0xff] }
 0x4b2   : > { %3219 = vperm.xlu2 %4184, %v3208_v13   ;;  %3251 = vperm.xlu0 %4186, %v6556_v5   ;;  %v3061_v58 = vadd.f32 %v4412_v35, %v3060_v28  ;;  %v3090_v29 = vmul.f32 %v4416_v56, %v3089_v19  ;;  %v3111_v28 = vand.u32 2147483647, %v6596_v31 }
 0x4b3   : > { %3213 = vperm.xlu1 %4187, %v3208_v13   ;;  %v3076_v15 = vadd.f32 %v4414_v7, %v3075_v2  ;;  %v3126_v2 = vand.u32 2147483647, %v6610_v23 }
 0x4b4   : > { %v3065_v21 = vsel %vm3064_vm6, %v4412_v35, %v3061_v58 }
 0x4b5   : > { %v3070_v57 = vsel %vm3067_vm8, %v3069_v46, %v3065_v21  ;;  %v3080_v54 = vsel %vm3079_vm12, %v4414_v7, %v3076_v15 }
 0x4b6   : > { %v3071_v6 = vmul.f32 %v6438_v63, %v3070_v57 }
 0x4b8   : > { %v6628_v3 = vperm.slane %v3071_v6, 0  ;;  %v6685_v6 = vld [vmem:[%s4626_s14 + $0x10] sm:$0xff] }
 0x4ba   : > { %3238 = vperm.xlu2 %4184, %v6541_v41   ;;  %3270 = vperm.xlu0 %4186, %v6565_v32  }
 0x4bb   : > { %4188 = vset.pattern.permute.xlu1 %v4805_v34 }
 0x4c2   : > { %3257 = vperm.xlu2 %4184, %v6556_v5   ;;  %4191 = vset.pattern.permute.xlu0 %v4605_v14 }
 0x4c3   : > { %3206 = vperm.xlu1 %4188, %v6520_v49   ;;  %v6593_v49 = vrot.slane %v6514_v43, 2  ;;  %v3081_v43 = vand.u32 2147483647, %v6568_v20  ;;  %v3091_v20 = vadd.f32 %v4416_v56, %v3090_v29 }
 0x4c5   : > { %4417 = vrcp.f32 %v6593_v49  ;;  %vm3082_vm15 = vcmp.eq.f32.partialorder %v3081_v43, 8.507059e+37  ;;  %v3095_v45 = vsel %vm3094_vm1, %v4416_v56, %v3091_v20  ;;  %vm3047_vm6 = vweird.f32 %v6593_v49 }
 0x4c6   : > { %4419 = vrcp.f32 %v6596_v31  ;;  %v3053_v11 = vand.u32 2147483648, %v6593_v49  ;;  %v3051_v24 = vand.u32 2147483647, %v6593_v49 }
 0x4c7   : > { %4421 = vrcp.f32 %v6610_v23 }
 0x4c8   : > { %v3054_v58 = vor.u32 1.1754944e-38, %v3053_v11  ;;  %vm3052_vm12 = vcmp.eq.f32.partialorder %v3051_v24, 8.507059e+37 }
 0x4ca   : > { %3276 = vperm.xlu2 %4184, %v6565_v32   ;;  %3314 = vperm.xlu0 %4191, %v6590_v55  }
 0x4cb   : > { %3225 = vperm.xlu1 %4188, %v3208_v13   ;;  %v6612_v10 = vpop.eup %4417 }
 0x4cc   : > { %v6616_v13 = vpop.eup %4419  ;;  %v3043_v1 = vmul.f32 %v6612_v10, %v6593_v49  ;;  %vm3048_vm13 = vweird.f32 %v6612_v10 }
 0x4cd   : > { %v3103_v9 = vmul.f32 %v6616_v13, %v6596_v31  ;;  %v4422_v35 = vpop.eup %4421  ;;  %vm3108_vm5 = vweird.f32 %v6616_v13  ;;  %vm3049_vm8 = vmor %vm3047_vm6, %vm3048_vm13  ;;  %v3128_v31 = vand.u32 2147483648, %v6610_v23  ;;  %vm7068_vm13 = vcmask 1043459  }
 0x4ce   : > { %v3044_v62 = vsub.f32 1.0, %v3043_v1  ;;  %v3118_v4 = vmul.f32 %v4422_v35, %v6610_v23  ;;  %vm3109_vm3 = vmor %vm3107_vm9, %vm3108_vm5  ;;  %vm3123_vm14 = vweird.f32 %v4422_v35  ;;  %vm7069_vm5 = vcmask 1045509  }
 0x4cf   : > { %v3104_v53 = vsub.f32 1.0, %v3103_v9  ;;  %vm3124_vm1 = vmor %vm3122_vm4, %vm3123_vm14  ;;  %v3129_v26 = vor.u32 1.1754944e-38, %v3128_v31  ;;  %vm7070_vm6 = vcmask 1046534  }
 0x4d0   : > { %v3045_v37 = vmul.f32 %v6612_v10, %v3044_v62  ;;  %v3119_v7 = vsub.f32 1.0, %v3118_v4  ;;  %vm7072_vm9 = vmmov %vm7068_vm13 }
 0x4d1   : > { %v3105_v61 = vmul.f32 %v6616_v13, %v3104_v53 }
 0x4d2   : > { %3295 = vperm.xlu2 %4184, %v6607_v30   ;;  %4195 = vset.pattern.permute.xlu0 %v4591_v8  ;;  %v3120_v38 = vmul.f32 %v4422_v35, %v3119_v7  ;;  %v6718_v7 = vld [vmem:[%s4626_s14 + $0x20] sm:$0xff] }
 0x4d3   : > { %3244 = vperm.xlu1 %4188, %v6541_v41   ;;  %v3084_v41 = vor.u32 1.1754944e-38, %v3083_v48  ;;  %v3106_v50 = vadd.f32 %v6616_v13, %v3105_v61 }
 0x4d4   : > { %v3121_v49 = vadd.f32 %v4422_v35, %v3120_v38 }
 0x4d5   : > { %v3085_v63 = vsel %vm3082_vm15, %v3084_v41, %v3080_v54  ;;  %v3110_v52 = vsel %vm3109_vm3, %v6616_v13, %v3106_v50  ;;  %vm3112_vm15 = vcmp.eq.f32.partialorder %v3111_v28, 8.507059e+37  ;;  %v6681_v13 = vld [vmem:[%s4626_s14] sm:$0xff]  ;;  %vm7073_vm3 = vmmov %vm7069_vm5 }
 0x4d6   : > { %v3086_v12 = vmul.f32 %v6443_v36, %v3085_v63  ;;  %v3046_v36 = vadd.f32 %v6612_v10, %v3045_v37  ;;  %v3115_v59 = vsel %vm3112_vm15, %v3114_v51, %v3110_v52 }
 0x4d7   : > { %v3116_v21 = vmul.f32 %v6451_v18, %v3115_v59 }
 0x4d8   : > { %v6640_v40 = vperm.slane %v3086_v12, 0  ;;  %v3050_v0 = vsel %vm3049_vm8, %v6612_v10, %v3046_v36  ;;  %v4082_v12 = vld [vmem:[%s6959_s5 + $0x18] sm:$0xf0]  ;;  %vm7071_vm8 = vcmask 1047559  }
 0x4d9   : > { %vm7075_vm15 = vmmov %vm7071_vm8 }
 0x4da   : > { %4190 = vset.pattern.permute.xlu2 %v4805_v34  ;;  %3346 = vperm.xlu0 %4195, %v6628_v3  }
 0x4db   : > { %3263 = vperm.xlu1 %4188, %v6556_v5   ;;  %v3100_v5 = vsel %vm3097_vm11, %v3099_v42, %v3095_v45  ;;  %vm3127_vm11 = vcmp.eq.f32.partialorder %v3126_v2, 8.507059e+37  ;;  %v6710_v45 = vld [vmem:[%s4626_s14 + $0x38] sm:$0xff] }
 0x4dc   : > { %v3101_v39 = vmul.f32 %v6447_v44, %v3100_v5  ;;  %v3055_v44 = vsel %vm3052_vm12, %v3054_v58, %v3050_v0  ;;  %v3144_v27 = vpop.permute.xlu2 %3143  ;;  %v6714_v5 = vld [vmem:[%s4626_s14 + $0x28] sm:$0xff]  ;;  %vm7074_vm12 = vmmov %vm7070_vm6 }
 0x4dd   : > { %v3056_v33 = vmul.f32 %v6415_v60, %v3055_v44  ;;  %v6676_v60 = vld [vmem:[%s4626_s14 + $0x8] sm:$0xff] }
 0x4de   : > { %v6658_v56 = vperm.slane %v3101_v39, 0  ;;  %v3437_v18 = vmul.f32 %v6676_v60, %v3144_v27 }
 0x4df   : > { %v6668_v46 = vperm.slane %v3056_v33, 0 }
 0x4e0   : > { %v3485_v54 = vsel %vm398_vm0, %v3437_v18, 0.0  ;;  %v6741_v18 = vld [vmem:[%s4626_s14 + $0x50] sm:$0xff] }
 0x4e2   : > { %3301 = vperm.xlu2 %4190, %v6607_v30   ;;  %3365 = vperm.xlu0 %4195, %v6640_v40  }
 0x4e3   : > { %4189 = vset.pattern.permute.xlu1 %v4591_v8 }
 0x4ea   : > { %4192 = vset.pattern.permute.xlu2 %v4591_v8  ;;  %3384 = vperm.xlu0 %4195, %v6658_v56   ;;  %v3125_v8 = vsel %vm3124_vm1, %v4422_v35, %v3121_v49  ;;  %v6699_v35 = vld [vmem:[%s4626_s14 + $0x18] sm:$0xff] }
 0x4eb   : > { %3289 = vperm.xlu1 %4189, %v6607_v30   ;;  %v6670_v30 = vperm.slane %v3116_v21, 0  ;;  %v3130_v57 = vsel %vm3127_vm11, %v3129_v26, %v3125_v8  ;;  %v4080_v26 = vld [vmem:[%s6959_s5 + $0x10] sm:$0xf] }
 0x4ec   : > { %v3169_v23 = vpop.permute.xlu2 %3168  ;;  %v3131_v15 = vmul.f32 %v6456_v22, %v3130_v57  ;;  %v4143_v57 = vld [vmem:[%s6959_s5 + $0x14] sm:$0xf0] }
 0x4ed   : > { %v3441_v36 = vmul.f32 %v6714_v5, %v3169_v23 }
 0x4ee   : > { %v6690_v1 = vperm.slane %v3131_v15, 0 }
 0x4ef   : > { %v3498_v51 = vsel %vm398_vm0, %v3441_v36, 0.0 }
 0x4f2   : > { %3327 = vperm.xlu2 %4192, %v6668_v46   ;;  %3403 = vperm.xlu0 %4195, %v6670_v30  }
 0x4f3   : > { %3308 = vperm.xlu1 %4189, %v6590_v55  }
 0x4f4   : > { %v3150_v10 = vpop.permute.xlu0 %3149 }
 0x4f5   : > { %v3138_v19 = vpop.permute.xlu1 %3137  ;;  %v3438_v43 = vmul.f32 %v6685_v6, %v3150_v10  ;;  %v4081_v10 = vor.u32 %v4143_v57, %v4080_v26 }
 0x4f6   : > { %v3436_v48 = vmul.f32 %v6681_v13, %v3138_v19 }
 0x4f7   : > { %v3487_v41 = vsel %vm398_vm0, %v3438_v43, 0.0  ;;  %v6746_v43 = vld [vmem:[%s4626_s14 + $0x48] sm:$0xff]  ;;  %3796 = vmatpush.bf16.msrb.mxu1 %v4081_v10 }
 0x4f8   : > { %v3484_v29 = vsel %vm398_vm0, %v3436_v48, 0.0 }
 0x4f9   : > { %v3486_v9 = vadd.f32 %v3485_v54, %v3484_v29 }
 0x4fa   : > { %4196 = vset.pattern.permute.xlu2 %v4605_v14  ;;  %3422 = vperm.xlu0 %4195, %v6690_v1  }
 0x4fb   : > { %v3488_v22 = vadd.f32 %v3487_v41, %v3486_v9  ;;  %4193 = vset.pattern.permute.xlu1 %v4605_v14  ;;  %v4142_v14 = vld [vmem:[%s6959_s5 + $0x14] sm:$0xf]  ;;  %v6750_v9 = vld [vmem:[%s4626_s14 + $0x40] sm:$0xff] }
 0x4fc   : > { %v3182_v63 = vpop.permute.xlu2 %3181  ;;  %v4085_v42 = vor.u32 %v4142_v14, %v4082_v12  ;;  %v6758_v14 = vld [vmem:[%s4626_s14 + $0x80] sm:$0xff] }
 0x4fd   : > { %v3489_v20 = vrot.slane %v3488_v22, 4  ;;  %v3157_v62 = vpop.permute.xlu1 %3156  ;;  %v3443_v37 = vmul.f32 %v6710_v45, %v3182_v63 }
 0x4fe   : > { %v3439_v25 = vmul.f32 %v6699_v35, %v3157_v62  ;;  %3809 = vmatpush.bf16.msrb.mxu2 %v4085_v42  ;;  %v6763_v42 = vld [vmem:[%s4626_s14 + $0x78] sm:$0xff] }
 0x4ff   : > { %v3490_v53 = vadd.f32 %v3489_v20, %v3488_v22  ;;  %v3507_v52 = vsel %vm398_vm0, %v3443_v37, 0.0 }
 0x500   : > { %v3495_v24 = vsel %vm398_vm0, %v3439_v25, 0.0 }
 0x501   : > { %v3491_v16 = vrot.slane %v3490_v53, 2 }
 0x502   : > { %3352 = vperm.xlu2 %4196, %v6628_v3   ;;  %4197 = vset.pattern.permute.xlu0 %v4805_v34 }
 0x503   : > { %3333 = vperm.xlu1 %4193, %v6668_v46   ;;  %v3492_v0 = vadd.f32 %v3491_v16, %v3490_v53 }
 0x504   : > { %v3201_v61 = vpop.permute.xlu2 %3200  ;;  %v3163_v4 = vpop.permute.xlu0 %3162 }
 0x505   : > { %v3176_v50 = vpop.permute.xlu1 %3175  ;;  %v3440_v11 = vmul.f32 %v6718_v7, %v3163_v4  ;;  %v3493_v49 = vrot.slane %v3492_v0, 1  ;;  %v3446_v23 = vmul.f32 %v6741_v18, %v3201_v61 }
 0x506   : > { %v3442_v39 = vmul.f32 %v6722_v47, %v3176_v50 }
 0x507   : > { %v3496_v28 = vsel %vm398_vm0, %v3440_v11, 0.0  ;;  %v3494_v21 = vadd.f32 %v3493_v49, %v3492_v0  ;;  %v3518_v22 = vsel %vm398_vm0, %v3446_v23, 0.0 }
 0x508   : > { %v3506_v38 = vsel %vm398_vm0, %v3442_v39, 0.0  ;;  %v3497_v58 = vadd.f32 %v3496_v28, %v3495_v24 }
 0x509   : > { %v3508_v44 = vadd.f32 %v3507_v52, %v3506_v38  ;;  %4423 = vtanh.f32 %v3494_v21 }
 0x50a   : > { %v3499_v59 = vadd.f32 %v3498_v51, %v3497_v58  ;;  %3371 = vperm.xlu2 %4196, %v6640_v40   ;;  %3415 = vperm.xlu0 %4197, %v6670_v30   ;;  %v6772_v51 = vld [vmem:[%s4626_s14 + $0x68] sm:$0xff] }
 0x50b   : > { %4194 = vset.pattern.permute.xlu1 %v4805_v34 }
 0x50c   : > { %v3500_v31 = vrot.slane %v3499_v59, 4  ;;  %v3220_v33 = vpop.permute.xlu2 %3219 }
 0x50e   : > { %v3501_v27 = vadd.f32 %v3500_v31, %v3499_v59  ;;  %v6776_v31 = vld [vmem:[%s4626_s14 + $0x60] sm:$0xff] }
 0x50f   : > { %v4424_v25 = vpop.eup %4423 }
 0x510   : > { %v3502_v2 = vrot.slane %v3501_v27, 2  ;;  %v3700_v61 = vpack.c.bf16 %v4424_v25, %v4424_v25 }
 0x512   : > { %v3503_v8 = vadd.f32 %v3502_v2, %v3501_v27  ;;  %3390 = vperm.xlu2 %4196, %v6658_v56   ;;  %v3736_v0 = vunpack.c.l.b16 %v3700_v61  ;;  %v6802_v61 = vld [vmem:[%s4626_s14 + $0x88] sm:$0xff] }
 0x513   : > { %3320 = vperm.xlu1 %4194, %v6590_v55  }
 0x514   : > { %v3504_v15 = vrot.slane %v3503_v8, 1  ;;  %v3195_v19 = vpop.permute.xlu0 %3194  ;;  %v3239_v63 = vpop.permute.xlu2 %3238 }
 0x515   : > { %v3188_v48 = vpop.permute.xlu1 %3187  ;;  %v3445_v54 = vmul.f32 %v6746_v43, %v3195_v19  ;;  %v3452_v12 = vmul.f32 %v6758_v14, %v3239_v63 }
 0x516   : > { %v3505_v29 = vadd.f32 %v3504_v15, %v3503_v8  ;;  %v3444_v41 = vmul.f32 %v6750_v9, %v3188_v48  ;;  %v6787_v15 = vld [vmem:[%s4626_s14 + $0x58] sm:$0xff] }
 0x517   : > { %v3517_v55 = vsel %vm398_vm0, %v3445_v54, 0.0 }
 0x518   : > { %4425 = vtanh.f32 %v3505_v29  ;;  %v3509_v20 = vsel %vm398_vm0, %v3444_v41, 0.0  ;;  %v3519_v62 = vadd.f32 %v3518_v22, %v3517_v55  ;;  %v6795_v22 = vld [vmem:[%s4626_s14 + $0x70] sm:$0xff] }
 0x519   : > { %v3510_v53 = vadd.f32 %v3509_v20, %v3508_v44  ;;  %v3449_v44 = vmul.f32 %v6772_v51, %v3220_v33 }
 0x51a   : > { %3409 = vperm.xlu2 %4196, %v6670_v30   ;;  %v3540_v30 = vsel %vm398_vm0, %v3452_v12, 0.0 }
 0x51b   : > { %v3511_v16 = vrot.slane %v3510_v53, 4  ;;  %3339 = vperm.xlu1 %4194, %v6668_v46   ;;  %v3529_v21 = vsel %vm398_vm0, %v3449_v44, 0.0 }
 0x51c   : > { %v3233_v37 = vpop.permute.xlu0 %3232  ;;  %v3258_v57 = vpop.permute.xlu2 %3257 }
 0x51d   : > { %v3512_v4 = vadd.f32 %v3511_v16, %v3510_v53  ;;  %v3451_v36 = vmul.f32 %v6763_v42, %v3233_v37 }
 0x51e   : > { %v4426_v50 = vpop.eup %4425 }
 0x51f   : > { %v3701_v11 = vpack.c.bf16 %v4426_v50, %v4426_v50  ;;  %v3513_v39 = vrot.slane %v3512_v4, 2  ;;  %v3539_v24 = vsel %vm398_vm0, %v3451_v36, 0.0  ;;  %v6806_v50 = vld [vmem:[%s4626_s14 + $0x90] sm:$0xff] }
 0x520   : > { %v3541_v28 = vadd.f32 %v3540_v30, %v3539_v24 }
 0x521   : > { %v3737_v52 = vunpack.c.l.b16 %v3701_v11  ;;  %v3514_v46 = vadd.f32 %v3513_v39, %v3512_v4 }
 0x522   : > { %3428 = vperm.xlu2 %4196, %v6690_v1  }
 0x523   : > { %v3752_v38 = vsel %vm1198_vm10, %v3737_v52, %v3736_v0  ;;  %v3515_v58 = vrot.slane %v3514_v46, 1  ;;  %3358 = vperm.xlu1 %4194, %v6628_v3   ;;  %v6811_v0 = vld [vmem:[%s4626_s14 + $0x98] sm:$0xff] }
 0x524   : > { %v3252_v12 = vpop.permute.xlu0 %3251  ;;  %v3455_v52 = vmul.f32 %v6811_v0, %v3258_v57 }
 0x525   : > { %v3516_v59 = vadd.f32 %v3515_v58, %v3514_v46  ;;  %v3214_v49 = vpop.permute.xlu1 %3213  ;;  %v3454_v11 = vmul.f32 %v6806_v50, %v3252_v12  ;;  %v4072_v12 = vld [vmem:[%s6959_s5] sm:$0xf] }
 0x526   : > { %v3448_v27 = vmul.f32 %v6776_v31, %v3214_v49 }
 0x527   : > { %4427 = vtanh.f32 %v3516_v59  ;;  %v3550_v58 = vsel %vm398_vm0, %v3454_v11, 0.0 }
 0x528   : > { %v3528_v2 = vsel %vm398_vm0, %v3448_v27, 0.0 }
 0x529   : > { %v3530_v8 = vadd.f32 %v3529_v21, %v3528_v2  ;;  %v3551_v2 = vsel %vm398_vm0, %v3455_v52, 0.0 }
 0x52a   : > { %4198 = vset.pattern.permute.xlu2 %v4805_v34 }
 0x52b   : > { %3377 = vperm.xlu1 %4194, %v6640_v40   ;;  %v6791_v40 = vpop.permute.xlu2 %3276 }
 0x52d   : > { %v4428_v3 = vpop.eup %4427 }
 0x52e   : > { %v3702_v26 = vpack.c.bf16 %v4428_v3, %v4428_v3  ;;  %v6819_v3 = vld [vmem:[%s4626_s14 + $0xa0] sm:$0xff] }
 0x530   : > { %v3738_v33 = vunpack.c.l.b16 %v3702_v26  ;;  %v3552_v26 = vadd.f32 %v3551_v2, %v3550_v58 }
 0x532   : > { %v3753_v23 = vsel %vm1163_vm7, %v3738_v33, %v3752_v38  ;;  %3282 = vperm.xlu2 %4198, %v6565_v32  }
 0x533   : > { %3396 = vperm.xlu1 %4194, %v6658_v56   ;;  %v6799_v25 = vpop.permute.xlu2 %3295 }
 0x535   : > { %v3207_v10 = vpop.permute.xlu1 %3206 }
 0x536   : > { %v3447_v19 = vmul.f32 %v6787_v15, %v3207_v10 }
 0x538   : > { %v3520_v34 = vsel %vm398_vm0, %v3447_v19, 0.0 }
 0x539   : > { %v3521_v48 = vadd.f32 %v3520_v34, %v3519_v62 }
 0x53b   : > { %v3522_v54 = vrot.slane %v3521_v48, 4  ;;  %3434 = vperm.xlu1 %4194, %v6690_v1  }
 0x53c   : > { %v6815_v44 = vpop.permute.xlu2 %3301 }
 0x53d   : > { %v3523_v29 = vadd.f32 %v3522_v54, %v3521_v48  ;;  %v3226_v41 = vpop.permute.xlu1 %3225 }
 0x53e   : > { %v3450_v32 = vmul.f32 %v6795_v22, %v3226_v41 }
 0x53f   : > { %v3524_v56 = vrot.slane %v3523_v29, 2 }
 0x540   : > { %v3531_v55 = vsel %vm398_vm0, %v3450_v32, 0.0 }
 0x541   : > { %v3525_v63 = vadd.f32 %v3524_v56, %v3523_v29  ;;  %v3532_v20 = vadd.f32 %v3531_v55, %v3530_v8  ;;  %v3271_v29 = vpop.permute.xlu0 %3270 }
 0x543   : > { %v3526_v53 = vrot.slane %v3525_v63, 1  ;;  %v3533_v62 = vrot.slane %v3532_v20, 4 }
 0x545   : > { %v3527_v1 = vadd.f32 %v3526_v53, %v3525_v63  ;;  %v3534_v16 = vadd.f32 %v3533_v62, %v3532_v20  ;;  %v3245_v37 = vpop.permute.xlu1 %3244  ;;  %v4140_v62 = vld [vmem:[%s6959_s5 + $0x4] sm:$0xf] }
 0x546   : > { %v3453_v4 = vmul.f32 %v6802_v61, %v3245_v37 }
 0x547   : > { %4429 = vtanh.f32 %v3527_v1  ;;  %v3535_v36 = vrot.slane %v3534_v16, 2 }
 0x548   : > { %v3542_v30 = vsel %vm398_vm0, %v3453_v4, 0.0 }
 0x549   : > { %v3536_v39 = vadd.f32 %v3535_v36, %v3534_v16  ;;  %v3543_v24 = vadd.f32 %v3542_v30, %v3541_v28  ;;  %v4141_v16 = vld [vmem:[%s6959_s5 + $0x4] sm:$0xf0]  ;;  %v3315_v37 = vpop.permute.xlu0 %3314 }
 0x54a   : > { %v4073_v36 = vor.u32 %v4141_v16, %v4072_v12 }
 0x54b   : > { %v3537_v46 = vrot.slane %v3536_v39, 1  ;;  %v3544_v38 = vrot.slane %v3543_v24, 4 }
 0x54c   : > { %v6824_v41 = vpop.permute.xlu2 %3327  ;;  %3797 = vmatpush.bf16.msrb.mxu1 %v4073_v36 }
 0x54d   : > { %v4430_v59 = vpop.eup %4429  ;;  %v3538_v49 = vadd.f32 %v3537_v46, %v3536_v39  ;;  %v3545_v27 = vadd.f32 %v3544_v38, %v3543_v24  ;;  %v3264_v21 = vpop.permute.xlu1 %3263 }
 0x54e   : > { %v3703_v8 = vpack.c.bf16 %v4430_v59, %v4430_v59  ;;  %v3456_v28 = vmul.f32 %v6819_v3, %v3264_v21 }
 0x54f   : > { %4431 = vtanh.f32 %v3538_v49  ;;  %v3546_v33 = vrot.slane %v3545_v27, 2 }
 0x550   : > { %v3739_v57 = vunpack.c.l.b16 %v3703_v8  ;;  %v3553_v10 = vsel %vm398_vm0, %v3456_v28, 0.0 }
 0x551   : > { %v3547_v19 = vadd.f32 %v3546_v33, %v3545_v27  ;;  %v3554_v34 = vadd.f32 %v3553_v10, %v3552_v26  ;;  %v3347_v38 = vpop.permute.xlu0 %3346 }
 0x552   : > { %v3754_v48 = vsel %vm7068_vm13, %v3739_v57, %v3753_v23  ;;  %v4074_v23 = vld [vmem:[%s6959_s5 + $0x8] sm:$0xf0] }
 0x553   : > { %v3548_v54 = vrot.slane %v3547_v19, 1  ;;  %v3555_v20 = vrot.slane %v3554_v34, 4  ;;  %v4077_v1 = vor.u32 %v4140_v62, %v4074_v23  ;;  %v3461_v23 = vmul.f32 %v6676_v60, %v6799_v25 }
 0x555   : > { %v4432_v32 = vpop.eup %4431  ;;  %v3549_v56 = vadd.f32 %v3548_v54, %v3547_v19  ;;  %3810 = vmatpush.bf16.msrb.mxu2 %v4077_v1  ;;  %v3556_v39 = vadd.f32 %v3555_v20, %v3554_v34  ;;  %v6858_v20 = vld [vmem:[%s4626_s14 + $0xb0] sm:$0xff]  ;;  %v3573_v60 = vsel %vm398_vm0, %v3461_v23, 0.0 }
 0x556   : > { %v3704_v55 = vpack.c.bf16 %v4432_v32, %v4432_v32 }
 0x557   : > { %4433 = vtanh.f32 %v3549_v56  ;;  %v3557_v46 = vrot.slane %v3556_v39, 2 }
 0x558   : > { %v3740_v63 = vunpack.c.l.b16 %v3704_v55  ;;  %v6854_v55 = vld [vmem:[%s4626_s14 + $0xa8] sm:$0xff] }
 0x559   : > { %v3558_v58 = vadd.f32 %v3557_v46, %v3556_v39  ;;  %v6842_v2 = vpop.permute.xlu0 %3365  ;;  %v6873_v39 = vld [vmem:[%s4626_s14 + $0xb8] sm:$0xff]  ;;  %v3466_v46 = vmul.f32 %v6722_v47, %v6824_v41  ;;  %s3980_s14 = sshll.u32 %s7079_s25, 3 }
 0x55a   : > { %v3755_v53 = vsel %vm1169_vm2, %v3740_v63, %v3754_v48  ;;  %v3457_v63 = vmul.f32 %v6854_v55, %v3271_v29  ;;  %s303_s11 = scalar_lea.vmem %s6961_s7, %s3980_s14 }
 0x55b   : > { %v3559_v49 = vrot.slane %v3558_v58, 1  ;;  %v3594_v41 = vsel %vm398_vm0, %v3466_v46, 0.0 }
 0x55c   : > { %v3353_v4 = vpop.permute.xlu2 %3352  ;;  %v3561_v12 = vsel %vm398_vm0, %v3457_v63, 0.0 }
 0x55d   : > { %v4434_v11 = vpop.eup %4433  ;;  %v3290_v27 = vpop.permute.xlu1 %3289  ;;  %v3560_v21 = vadd.f32 %v3559_v49, %v3558_v58 }
 0x55e   : > { %v3705_v30 = vpack.c.bf16 %v4434_v11, %v4434_v11  ;;  %v3460_v62 = vmul.f32 %v6681_v13, %v3290_v27  ;;  %v3470_v27 = vmul.f32 %v6741_v18, %v3353_v4 }
 0x55f   : > { %4435 = vtanh.f32 %v3560_v21 }
 0x560   : > { %v3741_v24 = vunpack.c.l.b16 %v3705_v30  ;;  %v3572_v29 = vsel %vm398_vm0, %v3460_v62, 0.0  ;;  %v3606_v4 = vsel %vm398_vm0, %v3470_v27, 0.0 }
 0x561   : > { %v6846_v33 = vpop.permute.xlu0 %3384  ;;  %v3574_v49 = vadd.f32 %v3573_v60, %v3572_v29 }
 0x562   : > { %v3756_v52 = vsel %vm7069_vm5, %v3741_v24, %v3755_v53  ;;  %v3458_v53 = vmul.f32 %v6858_v20, %v6791_v40  ;;  %v3464_v24 = vmul.f32 %v6718_v7, %v3315_v37  ;;  %v3469_v37 = vmul.f32 %v6746_v43, %v3347_v38 }
 0x564   : > { %v6840_v59 = vpop.permute.xlu2 %3371  ;;  %v3562_v11 = vsel %vm398_vm0, %v3458_v53, 0.0  ;;  %v3605_v38 = vsel %vm398_vm0, %v3469_v37, 0.0 }
 0x565   : > { %v3309_v28 = vpop.permute.xlu1 %3308  ;;  %v4436_v26 = vpop.eup %4435  ;;  %v3563_v25 = vadd.f32 %v3562_v11, %v3561_v12  ;;  %v3607_v12 = vadd.f32 %v3606_v4, %v3605_v38  ;;  %v3473_v29 = vmul.f32 %v6772_v51, %v6840_v59 }
 0x566   : > { %v3706_v10 = vpack.c.bf16 %v4436_v26, %v4436_v26  ;;  %v3463_v1 = vmul.f32 %v6699_v35, %v3309_v28 }
 0x567   : > { %v3617_v51 = vsel %vm398_vm0, %v3473_v29, 0.0 }
 0x568   : > { %v3742_v34 = vunpack.c.l.b16 %v3706_v10  ;;  %v3583_v21 = vsel %vm398_vm0, %v3463_v1, 0.0 }
 0x569   : > { %v3404_v48 = vpop.permute.xlu0 %3403 }
 0x56a   : > { %v6849_v54 = vsel %vm7070_vm6, %v3742_v34, %v3756_v52  ;;  %v3462_v52 = vmul.f32 %v6685_v6, %v6815_v44  ;;  %v3478_v1 = vmul.f32 %v6806_v50, %v3404_v48 }
 0x56c   : > { %v6844_v8 = vpop.permute.xlu2 %3390  ;;  %v3575_v47 = vsel %vm398_vm0, %v3462_v52, 0.0  ;;  %v3638_v50 = vsel %vm398_vm0, %v3478_v1, 0.0 }
 0x56d   : > { %v3576_v18 = vadd.f32 %v3575_v47, %v3574_v49 }
 0x56f   : > { %v3577_v11 = vrot.slane %v3576_v18, 4 }
 0x571   : > { %v6867_v16 = vpop.permute.xlu0 %3422 }
 0x574   : > { %v3410_v57 = vpop.permute.xlu2 %3409 }
 0x575   : > { %v3334_v19 = vpop.permute.xlu1 %3333 }
 0x576   : > { %v3467_v30 = vmul.f32 %v6710_v45, %v3334_v19 }
 0x578   : > { %v3595_v7 = vsel %vm398_vm0, %v3467_v30, 0.0 }
 0x579   : > { %v3596_v10 = vadd.f32 %v3595_v7, %v3594_v41 }
 0x57c   : > { %v6851_v32 = vpop.permute.xlu2 %3428  ;;  %v3416_v19 = vpop.permute.xlu0 %3415 }
 0x585   : > { %v3321_v56 = vpop.permute.xlu1 %3320 }
 0x586   : > { %v3465_v35 = vmul.f32 %v6714_v5, %v3321_v56  ;;  %v3584_v5 = vsel %vm398_vm0, %v3464_v24, 0.0  ;;  %v3479_v56 = vmul.f32 %v6811_v0, %v3410_v57  ;;  %v3472_v57 = vmul.f32 %v6776_v31, %v6842_v2 }
 0x587   : > { %v3578_v24 = vadd.f32 %v3577_v11, %v3576_v18 }
 0x588   : > { %v3586_v6 = vsel %vm398_vm0, %v3465_v35, 0.0  ;;  %v3616_v52 = vsel %vm398_vm0, %v3472_v57, 0.0 }
 0x589   : > { %v3618_v49 = vadd.f32 %v3617_v51, %v3616_v52 }
 0x58c   : > { %v3283_v36 = vpop.permute.xlu2 %3282 }
 0x58d   : > { %v3459_v13 = vmul.f32 %v6873_v39, %v3283_v36  ;;  %v3340_v40 = vpop.permute.xlu1 %3339  ;;  %v3480_v36 = vmul.f32 %v6819_v3, %v3416_v19 }
 0x58e   : > { %v3468_v58 = vmul.f32 %v6750_v9, %v3340_v40  ;;  %v3585_v9 = vadd.f32 %v3584_v5, %v3583_v21  ;;  %v3579_v21 = vrot.slane %v3578_v24, 2 }
 0x58f   : > { %v3564_v45 = vsel %vm398_vm0, %v3459_v13, 0.0  ;;  %v3639_v13 = vsel %vm398_vm0, %v3479_v56, 0.0  ;;  %v3641_v3 = vsel %vm398_vm0, %v3480_v36, 0.0 }
 0x590   : > { %v3565_v28 = vadd.f32 %v3564_v45, %v3563_v25  ;;  %v3597_v26 = vsel %vm398_vm0, %v3468_v58, 0.0  ;;  %v3587_v63 = vadd.f32 %v3586_v6, %v3585_v9  ;;  %v3640_v59 = vadd.f32 %v3639_v13, %v3638_v50 }
 0x591   : > { %v3598_v62 = vadd.f32 %v3597_v26, %v3596_v10  ;;  %v3475_v6 = vmul.f32 %v6763_v42, %v6846_v33  ;;  %v3580_v18 = vadd.f32 %v3579_v21, %v3578_v24 }
 0x592   : > { %v3566_v44 = vrot.slane %v3565_v28, 4  ;;  %v3588_v40 = vrot.slane %v3587_v63, 4  ;;  %v3642_v2 = vadd.f32 %v3641_v3, %v3640_v59 }
 0x593   : > { %v3599_v25 = vrot.slane %v3598_v62, 4 }
 0x594   : > { %v3567_v34 = vadd.f32 %v3566_v44, %v3565_v28  ;;  %v3589_v46 = vadd.f32 %v3588_v40, %v3587_v63  ;;  %v3476_v28 = vmul.f32 %v6758_v14, %v6844_v8  ;;  %v3643_v44 = vrot.slane %v3642_v2, 4 }
 0x595   : > { %v3359_v43 = vpop.permute.xlu1 %3358  ;;  %v3600_v45 = vadd.f32 %v3599_v25, %v3598_v62  ;;  %v3627_v14 = vsel %vm398_vm0, %v3475_v6, 0.0  ;;  %v3482_v62 = vmul.f32 %v6858_v20, %v6851_v32 }
 0x596   : > { %v3568_v53 = vrot.slane %v3567_v34, 2  ;;  %v3471_v23 = vmul.f32 %v6787_v15, %v3359_v43  ;;  %v3590_v5 = vrot.slane %v3589_v46, 2  ;;  %v3644_v8 = vadd.f32 %v3643_v44, %v3642_v2 }
 0x597   : > { %v3601_v47 = vrot.slane %v3600_v45, 2  ;;  %v3650_v40 = vsel %vm398_vm0, %v3482_v62, 0.0 }
 0x598   : > { %v3569_v30 = vadd.f32 %v3568_v53, %v3567_v34  ;;  %v3608_v0 = vsel %vm398_vm0, %v3471_v23, 0.0  ;;  %v3591_v4 = vadd.f32 %v3590_v5, %v3589_v46  ;;  %v3581_v53 = vrot.slane %v3580_v18, 1 }
 0x599   : > { %v3609_v60 = vadd.f32 %v3608_v0, %v3607_v12  ;;  %v3602_v56 = vadd.f32 %v3601_v47, %v3600_v45  ;;  %v3645_v29 = vrot.slane %v3644_v8, 2 }
 0x59a   : > { %v3570_v15 = vrot.slane %v3569_v30, 1  ;;  %v3592_v12 = vrot.slane %v3591_v4, 1  ;;  %v3582_v13 = vadd.f32 %v3581_v53, %v3580_v18 }
 0x59b   : > { %v3610_v48 = vrot.slane %v3609_v60, 4  ;;  %v3646_v50 = vadd.f32 %v3645_v29, %v3644_v8 }
 0x59c   : > { %v3571_v35 = vadd.f32 %v3570_v15, %v3569_v30  ;;  %v3603_v30 = vrot.slane %v3602_v56, 1  ;;  %v3593_v20 = vadd.f32 %v3592_v12, %v3591_v4 }
 0x59d   : > { %v3378_v31 = vpop.permute.xlu1 %3377  ;;  %v3611_v27 = vadd.f32 %v3610_v48, %v3609_v60  ;;  %v3647_v52 = vrot.slane %v3646_v50, 1 }
 0x59e   : > { %4437 = vtanh.f32 %v3571_v35  ;;  %v3474_v58 = vmul.f32 %v6795_v22, %v3378_v31  ;;  %v3628_v22 = vsel %vm398_vm0, %v3476_v28, 0.0  ;;  %v3604_v3 = vadd.f32 %v3603_v30, %v3602_v56 }
 0x59f   : > { %v3612_v41 = vrot.slane %v3611_v27, 2  ;;  %v3629_v43 = vadd.f32 %v3628_v22, %v3627_v14  ;;  %4439 = vtanh.f32 %v3582_v13 }
 0x5a0   : > { %v3619_v7 = vsel %vm398_vm0, %v3474_v58, 0.0  ;;  %4441 = vtanh.f32 %v3593_v20 }
 0x5a1   : > { %v3620_v37 = vadd.f32 %v3619_v7, %v3618_v49  ;;  %v3613_v33 = vadd.f32 %v3612_v41, %v3611_v27  ;;  %4443 = vtanh.f32 %v3604_v3 }
 0x5a3   : > { %v3621_v9 = vrot.slane %v3620_v37, 4  ;;  %v3614_v0 = vrot.slane %v3613_v33, 1 }
 0x5a4   : > { %v4438_v26 = vpop.eup %4437 }
 0x5a5   : > { %v3707_v10 = vpack.c.bf16 %v4438_v26, %v4438_v26  ;;  %v3622_v19 = vadd.f32 %v3621_v9, %v3620_v37  ;;  %v3397_v34 = vpop.permute.xlu1 %3396  ;;  %v3615_v24 = vadd.f32 %v3614_v0, %v3613_v33  ;;  %v4440_v58 = vpop.eup %4439 }
 0x5a6   : > { %v3477_v63 = vmul.f32 %v6802_v61, %v3397_v34  ;;  %v3481_v61 = vmul.f32 %v6854_v55, %v6867_v16  ;;  %v4442_v49 = vpop.eup %4441  ;;  %v3708_v47 = vpack.c.bf16 %v4440_v58, %v4440_v58 }
 0x5a7   : > { %v3743_v42 = vunpack.c.l.b16 %v3707_v10  ;;  %v3623_v38 = vrot.slane %v3622_v19, 2  ;;  %4445 = vtanh.f32 %v3615_v24  ;;  %v4444_v21 = vpop.eup %4443  ;;  %v3709_v37 = vpack.c.bf16 %v4442_v49, %v4442_v49 }
 0x5a8   : > { %v3630_v23 = vsel %vm398_vm0, %v3477_v63, 0.0  ;;  %v3649_v25 = vsel %vm398_vm0, %v3481_v61, 0.0  ;;  %v3710_v6 = vpack.c.bf16 %v4444_v21, %v4444_v21  ;;  %v3744_v34 = vunpack.c.l.b16 %v3708_v47 }
 0x5a9   : > { %v3624_v1 = vadd.f32 %v3623_v38, %v3622_v19  ;;  %v3631_v36 = vadd.f32 %v3630_v23, %v3629_v43  ;;  %v6924_v11 = vsel %vm7071_vm8, %v3743_v42, %v6849_v54  ;;  %v3651_v48 = vadd.f32 %v3650_v40, %v3649_v25 }
 0x5aa   : > { %v3745_v22 = vunpack.c.l.b16 %v3709_v37  ;;  %v3746_v10 = vunpack.c.l.b16 %v3710_v6 }
 0x5ab   : > { %v3632_v57 = vrot.slane %v3631_v36, 4  ;;  %v3625_v32 = vrot.slane %v3624_v1, 1 }
 0x5ac   : > { %v3759_v56 = vsel %vm1198_vm10, %v3745_v22, %v3744_v34 }
 0x5ad   : > { %v3633_v60 = vadd.f32 %v3632_v57, %v3631_v36  ;;  %v3435_v15 = vpop.permute.xlu1 %3434  ;;  %v3626_v16 = vadd.f32 %v3625_v32, %v3624_v1  ;;  %v4446_v28 = vpop.eup %4445  ;;  %v3760_v42 = vsel %vm1163_vm7, %v3746_v10, %v3759_v56  ;;  %v4513_v32 = vld [vmem:[%s6960_s6] sm:$0xff] }
 0x5ae   : > { %v3483_v54 = vmul.f32 %v6873_v39, %v3435_v15  ;;  %v3648_v39 = vadd.f32 %v3647_v52, %v3646_v50  ;;  %v3711_v41 = vpack.c.bf16 %v4446_v28, %v4446_v28  ;;  %v3903_v20 = vperm.slane %v4513_v32, 3 }
 0x5af   : > { %v3634_v55 = vrot.slane %v3633_v60, 2  ;;  %4447 = vtanh.f32 %v3626_v16 }
 0x5b0   : > { %v3652_v51 = vsel %vm398_vm0, %v3483_v54, 0.0  ;;  %v3747_v14 = vunpack.c.l.b16 %v3711_v41 }
 0x5b1   : > { %v3635_v59 = vadd.f32 %v3634_v55, %v3633_v60  ;;  %v3653_v35 = vadd.f32 %v3652_v51, %v3651_v48 }
 0x5b2   : > { %v3761_v33 = vsel %vm7072_vm9, %v3747_v14, %v3760_v42 }
 0x5b3   : > { %v3636_v46 = vrot.slane %v3635_v59, 1  ;;  %v3654_v31 = vrot.slane %v3653_v35, 4 }
 0x5b5   : > { %v3637_v2 = vadd.f32 %v3636_v46, %v3635_v59  ;;  %v3655_v45 = vadd.f32 %v3654_v31, %v3653_v35  ;;  %v4448_v5 = vpop.eup %4447 }
 0x5b6   : > { %v3712_v26 = vpack.c.bf16 %v4448_v5, %v4448_v5 }
 0x5b7   : > { %4449 = vtanh.f32 %v3637_v2  ;;  %v3656_v27 = vrot.slane %v3655_v45, 2 }
 0x5b8   : > { %4451 = vtanh.f32 %v3648_v39  ;;  %v3748_v8 = vunpack.c.l.b16 %v3712_v26 }
 0x5b9   : > { %v3657_v7 = vadd.f32 %v3656_v27, %v3655_v45 }
 0x5ba   : > { %v3762_v53 = vsel %vm1169_vm2, %v3748_v8, %v3761_v33 }
 0x5bb   : > { %v3658_v44 = vrot.slane %v3657_v7, 1 }
 0x5bd   : > { %v4450_v9 = vpop.eup %4449  ;;  %v3659_v18 = vadd.f32 %v3658_v44, %v3657_v7 }
 0x5be   : > { %v3713_v4 = vpack.c.bf16 %v4450_v9, %v4450_v9  ;;  %v4452_v19 = vpop.eup %4451 }
 0x5bf   : > { %4453 = vtanh.f32 %v3659_v18  ;;  %v3714_v43 = vpack.c.bf16 %v4452_v19, %v4452_v19 }
 0x5c0   : > { %v3749_v63 = vunpack.c.l.b16 %v3713_v4 }
 0x5c1   : > { %v3750_v12 = vunpack.c.l.b16 %v3714_v43 }
 0x5c2   : > { %v3763_v62 = vsel %vm7073_vm3, %v3749_v63, %v3762_v53 }
 0x5c3   : > { %v3764_v36 = vsel %vm7074_vm12, %v3750_v12, %v3763_v62 }
 0x5c5   : > { %v4454_v38 = vpop.eup %4453 }
 0x5c6   : > { %v3715_v23 = vpack.c.bf16 %v4454_v38, %v4454_v38 }
 0x5c8   : > { %v3751_v1 = vunpack.c.l.b16 %v3715_v23 }
 0x5ca   : > { %v3765_v61 = vsel %vm7075_vm15, %v3751_v1, %v3764_v36 }
 0x5cb   : > { %v3766_v29 = vpack.c.b16 %v3765_v61, %v6924_v11 }
 0x5cd   : > { %4086 = vmatmul.msk.bf16.vlgmr.msrb.gmra.mxu1 %vm398_vm0, %v3766_v29  ;;  %4087 = vmatmul.msk.bf16.vlgmr.msrb.gmra.mxu2 %vm398_vm0, %v3766_v29 }
 0x64a   : > { %v3799_v30 = vpop.f32.mrf.mxu1 }
 0x650   : > { %v3812_v0 = vpop.f32.mrf.mxu2 }
 0x652   : > { %v3801_v57 = vpop.f32.mrf.mxu1 }
 0x658   : > { %v3813_v13 = vpop.f32.mrf.mxu2 }
 0x659   : > { %v3816_v40 = vadd.f32 %v3813_v13, %v3799_v30 }
 0x65b   : > { %v3900_v60 = vadd.f32 %v5852_v17, %v3816_v40 }
 0x65d   : > { %v3904_v11 = vadd.f32 %v3903_v20, %v3900_v60 }
 0x65f   : > { %3905 = vst [vmem:[%s303_s11] sm:$0xff] %v3904_v11 }
 0x660 PF: > { %s17_s24 = sadd.s32 1, %s4520_s24  }
 0x661   : > { %p14_p5 = scmp.ge.s32.totalorder %s17_s24, 4  }
 0x663   :  { %16 = sbr.rel (!%p14_p5) target bundleno = 1 (0x1), region = 81 }

</bundles_post_ra>
